<compile_context>
chip_gen: v5e
topology: v5e:2x2
jax: 0.10.0
libtpu: 0.0.40
codegen_flags: <defaults>
</compile_context>

<pallas_src>
import math
from functools import partial

import jax
import jax.numpy as jnp
from jax.experimental import pallas as pl
from jax.experimental.pallas import tpu as pltpu

_LOG2 = math.log(2.0)
_LANE = 128
_ROW = 16      # row-tile granularity (bf16 sublane packing = 16)


def _round_up(x, m):
    return ((x + m - 1) // m) * m


def _ssp(x, act_bf16):
    """Stable softplus (shift -log2 is folded into the following bias).

    Returns bf16 (the result always feeds a bf16 matmul).  On v6e/v7x the
    transcendentals run in bf16 (bf16 EUP); on v5e they stay f32.
    """
    if act_bf16:
        xb = x.astype(jnp.bfloat16)
        return jnp.maximum(xb, 0) + jnp.log1p(jnp.exp(-jnp.abs(xb)))
    a = jnp.maximum(x, 0.0) + jnp.log1p(jnp.exp(-jnp.abs(x)))
    return a.astype(jnp.bfloat16)


def _output_layer_kernel(n_res, n_read, n_output, act_bf16, *refs):
    """Fused forward of _OutputLayer for one (TM, F) atom tile.

    refs = [x (bf16, unpadded lanes),
            (w1, b1, w2, b2) * n_res,    # residual layers (bf16 W, f32 folded b)
            (w, b)           * n_read,   # read-out layers (dim decay)
            w_final, b_final,            # final bias-free linear (+ folded shift)
            out]                         # (TM, n_output) f32
    """
    idx = 0
    x_ref = refs[idx]; idx += 1
    res_params = []
    for _ in range(n_res):
        res_params.append(tuple(refs[idx:idx + 4])); idx += 4
    ro_params = []
    for _ in range(n_read):
        ro_params.append(tuple(refs[idx:idx + 2])); idx += 2
    w_fin_ref = refs[idx]; idx += 1
    b_fin_ref = refs[idx]; idx += 1
    out_ref = refs[idx]

    tm, F = x_ref.shape
    f_pad = _round_up(F, _LANE)

    # bf16 stream -> f32 residual stream; lane-pad once inside the kernel.
    x = x_ref[...].astype(jnp.float32)
    if f_pad > F:
        x = jnp.concatenate(
            [x, jnp.zeros((tm, f_pad - F), jnp.float32)], axis=-1)

    # residual layers: x + lin2(ssp(lin1(ssp(x))))   (ssp shift folded into b)
    for (w1, b1, w2, b2) in res_params:
        a = _ssp(x, act_bf16)
        y = jnp.dot(a, w1[...], preferred_element_type=jnp.float32) + b1[...]
        a = _ssp(y, act_bf16)
        y = jnp.dot(a, w2[...], preferred_element_type=jnp.float32) + b2[...]
        x = x + y

    out = x
    # read-out layers with dim decay, each preceded by the activation
    for (w, b) in ro_params:
        a = _ssp(out, act_bf16)
        out = jnp.dot(a, w[...], preferred_element_type=jnp.float32) + b[...]

    # final activation + bias-free linear (shift folded into b_final)
    a = _ssp(out, act_bf16)
    out = jnp.dot(a, w_fin_ref[...], preferred_element_type=jnp.float32) + b_fin_ref[...]

    # store only the real output columns (narrow HBM writeback)
    out_ref[...] = out[:, :n_output].astype(out_ref.dtype)


def init_output_layer_params(key, F, n_output, n_res_output, n_read_out,
                             zero_final_weight=True):
    """Logical (unpadded, f32) params mimicking torch.nn.Linear defaults."""
    params = {"res": [], "readout": []}

    def linear(key, d_in, d_out):
        k1, k2 = jax.random.split(key)
        bound = 1.0 / math.sqrt(d_in)
        w = jax.random.uniform(k1, (d_in, d_out), jnp.float32, -bound, bound)
        b = jax.random.uniform(k2, (1, d_out), jnp.float32, -bound, bound)
        return w, b

    for _ in range(n_res_output):
        key, k1, k2 = jax.random.split(key, 3)
        params["res"].append(linear(k1, F, F) + linear(k2, F, F))

    last_dim = F
    for _ in range(n_read_out):
        key, k = jax.random.split(key)
        this_dim = math.ceil(last_dim / 2)          # dim_decay=True
        params["readout"].append(linear(k, last_dim, this_dim))
        last_dim = this_dim

    if zero_final_weight:
        # faithful to `self.lin.weight.data.zero_()` (bias=False)
        params["w_final"] = jnp.zeros((last_dim, n_output), jnp.float32)
    else:
        key, k = jax.random.split(key)
        bound = 1.0 / math.sqrt(last_dim)
        params["w_final"] = jax.random.uniform(
            k, (last_dim, n_output), jnp.float32, -bound, bound)
    return params


def prepare_kernel_params(params, compute_dtype=jnp.bfloat16):
    """Pad dims to 128-lane multiples, cast W to bf16, fold ssp's -log2 into biases."""
    def pad_w(w):
        din, dout = w.shape
        return jnp.pad(
            w, ((0, _round_up(din, _LANE) - din), (0, _round_up(dout, _LANE) - dout))
        ).astype(compute_dtype)

    def fold_bias(b, w):
        # (softplus(x) - log2) @ W + b  ==  softplus(x) @ W + (b - log2 * 1^T W)
        b_f = b - _LOG2 * jnp.sum(w, axis=0, keepdims=True)
        dout = b_f.shape[1]
        return jnp.pad(b_f, ((0, 0), (0, _round_up(dout, _LANE) - dout))).astype(jnp.float32)

    kp = {"res": [], "readout": []}
    for (w1, b1, w2, b2) in params["res"]:
        kp["res"].append((pad_w(w1), fold_bias(b1, w1), pad_w(w2), fold_bias(b2, w2)))
    for (w, b) in params["readout"]:
        kp["readout"].append((pad_w(w), fold_bias(b, w)))
    w_fin = params["w_final"]
    kp["w_final"] = pad_w(w_fin)
    kp["b_final"] = fold_bias(jnp.zeros((1, w_fin.shape[1]), jnp.float32), w_fin)
    kp["n_output"] = int(w_fin.shape[1])
    return kp


def output_layer_forward(x, kparams, n_output):
    n_res = len(kparams["res"])
    n_read = len(kparams["readout"])
    N, F = x.shape
    f_pad = _round_up(F, _LANE)
    nout_pad = kparams["w_final"].shape[1]

    kind = jax.devices()[0].device_kind.lower()
    is_v7 = "v7" in kind
    old_gen = any(f"v{i}" in kind for i in (2, 3, 4, 5))
    act_bf16 = not old_gen          # bf16 softplus on v6e / v7x only

    # Atom tile: big blocks amortize per-step overhead; on v7x keep >= 2 grid
    # steps (when N allows) so dimension_semantics=("parallel",) feeds both TCs.
    tm_cap = 2048 if is_v7 else 1024
    if is_v7 and N > _ROW:
        tm = min(tm_cap, _round_up(pl.cdiv(N, 2), _ROW))
    else:
        tm = min(tm_cap, _round_up(N, _ROW))
    tm = max(tm, _ROW)
    grid = (pl.cdiv(N, tm),)

    # Stream x as bf16 (it only feeds bf16 matmuls); no lane/row padding in HBM.
    x_in = x.astype(jnp.bfloat16)

    args = [x_in]
    for p in kparams["res"]:
        args += list(p)
    for p in kparams["readout"]:
        args += list(p)
    args.append(kparams["w_final"])
    args.append(kparams["b_final"])

    # x streams per atom tile; weights/biases get constant index maps (VMEM resident).
    in_specs = [pl.BlockSpec((tm, F), lambda i: (i, 0))]
    for a in args[1:]:
        in_specs.append(pl.BlockSpec(a.shape, lambda i: (0, 0)))
    out_spec = pl.BlockSpec((tm, n_output), lambda i: (i, 0))

    # Explicit VMEM budget (resident weights + double-buffered streams + headroom).
    weight_bytes = sum(int(a.size) * a.dtype.itemsize for a in args[1:])
    max_dim = max(f_pad, nout_pad)
    est = (weight_bytes
           + 2 * tm * F * 2                 # double-buffered bf16 x tile
           + 2 * tm * n_output * 4          # double-buffered out tile
           + 8 * tm * max_dim * 4)          # live intermediates headroom
    cap = (48 << 20) if is_v7 else (100 << 20)
    vmem_limit = int(min(max(est, 16 << 20), cap))

    def build(use_bf16_act):
        kernel = partial(_output_layer_kernel, n_res, n_read, n_output, use_bf16_act)
        return pl.pallas_call(
            kernel,
            out_shape=jax.ShapeDtypeStruct((N, n_output), jnp.float32),
            grid=grid,
            in_specs=in_specs,
            out_specs=out_spec,
            compiler_params=pltpu.CompilerParams(
                dimension_semantics=("parallel",),
                vmem_limit_bytes=vmem_limit),
        )

    if act_bf16:
        try:
            out = jax.block_until_ready(build(True)(*args))
        except Exception:
            # Fallback if the bf16 transcendental path does not lower on this stack.
            out = jax.block_until_ready(build(False)(*args))
    else:
        out = jax.block_until_ready(build(False)(*args))

    regularization = 0.0  # no concrete dropout in this configuration
    return out, regularization


def output_layer_reference(x, params):
    """Pure-JAX f32 reference (unpadded, exact ssp) for correctness checking."""
    def ssp(v):
        return jnp.logaddexp(v, 0.0) - _LOG2

    out = x.astype(jnp.float32)
    for (w1, b1, w2, b2) in params["res"]:
        y = ssp(out) @ w1 + b1
        y = ssp(y) @ w2 + b2
        out = out + y
    for (w, b) in params["readout"]:
        out = ssp(out) @ w + b
    out = ssp(out) @ params["w_final"]
    return out, 0.0


if __name__ == "__main__":
    # small, module-consistent shapes (not a multiple of the tile -> tests ragged block)
    N_ATOMS = 200     # number of atoms (rows)
    F = 32            # feature dimension
    N_OUTPUT = 2      # e.g. (energy, charge)
    N_RES_OUTPUT = 2
    N_READ_OUT = 2    # dim decay 32 -> 16 -> 8

    key = jax.random.PRNGKey(0)
    k_x, k_p = jax.random.split(key)
    x = jax.random.normal(k_x, (N_ATOMS, F), jnp.float32)

    # PhysNet faithfully zero-inits the final weight; for the correctness check
    # we use a non-zero final weight so the residual/read-out math is exercised.
    params = init_output_layer_params(k_p, F, N_OUTPUT, N_RES_OUTPUT, N_READ_OUT,
                                      zero_final_weight=False)
    kparams = prepare_kernel_params(params)

    out, reg = output_layer_forward(x, kparams, N_OUTPUT)
    out = jax.block_until_ready(out)

    ref_out, ref_reg = output_layer_reference(x, params)
    assert out.shape == (N_ATOMS, N_OUTPUT)
    max_err = float(jnp.max(jnp.abs(out - ref_out)))
    # bf16 matmul inputs / bf16 softplus with f32 accumulation -> loosened tolerance
    assert jnp.allclose(out, ref_out, atol=1e-1, rtol=1e-1), f"max abs err {max_err}"
    assert reg == ref_reg == 0.0

    print("KERNEL_OK")
</pallas_src>

<mosaic_0001>
module attributes {stable_mosaic.version = 11 : i64} {
  func.func @_output_layer_kernel(%arg0: i32, %arg1: memref<208x32xbf16, #tpu.memory_space<vmem>>, %arg2: memref<128x128xbf16, #tpu.memory_space<vmem>>, %arg3: memref<1x128xf32, #tpu.memory_space<vmem>>, %arg4: memref<128x128xbf16, #tpu.memory_space<vmem>>, %arg5: memref<1x128xf32, #tpu.memory_space<vmem>>, %arg6: memref<128x128xbf16, #tpu.memory_space<vmem>>, %arg7: memref<1x128xf32, #tpu.memory_space<vmem>>, %arg8: memref<128x128xbf16, #tpu.memory_space<vmem>>, %arg9: memref<1x128xf32, #tpu.memory_space<vmem>>, %arg10: memref<128x128xbf16, #tpu.memory_space<vmem>>, %arg11: memref<1x128xf32, #tpu.memory_space<vmem>>, %arg12: memref<128x128xbf16, #tpu.memory_space<vmem>>, %arg13: memref<1x128xf32, #tpu.memory_space<vmem>>, %arg14: memref<128x128xbf16, #tpu.memory_space<vmem>>, %arg15: memref<1x128xf32, #tpu.memory_space<vmem>>, %arg16: memref<208x2xf32, #tpu.memory_space<vmem>>) attributes {dimension_semantics = [#tpu.dimension_semantics<parallel>], iteration_bounds = array<i64: 1>, scalar_prefetch = 0 : i64, scratch_operands = 0 : i64, tpu.core_type = #tpu.core_type<tc>, window_params = [{transform_indices = @transform_0, window_bounds = array<i64: 208, 32>}, {pipeline_mode = #tpu.pipeline_mode<synchronous>, transform_indices = @transform_1, window_bounds = array<i64: 128, 128>}, {pipeline_mode = #tpu.pipeline_mode<synchronous>, transform_indices = @transform_2, window_bounds = array<i64: 1, 128>}, {pipeline_mode = #tpu.pipeline_mode<synchronous>, transform_indices = @transform_3, window_bounds = array<i64: 128, 128>}, {pipeline_mode = #tpu.pipeline_mode<synchronous>, transform_indices = @transform_4, window_bounds = array<i64: 1, 128>}, {pipeline_mode = #tpu.pipeline_mode<synchronous>, transform_indices = @transform_5, window_bounds = array<i64: 128, 128>}, {pipeline_mode = #tpu.pipeline_mode<synchronous>, transform_indices = @transform_6, window_bounds = array<i64: 1, 128>}, {pipeline_mode = #tpu.pipeline_mode<synchronous>, transform_indices = @transform_7, window_bounds = array<i64: 128, 128>}, {pipeline_mode = #tpu.pipeline_mode<synchronous>, transform_indices = @transform_8, window_bounds = array<i64: 1, 128>}, {pipeline_mode = #tpu.pipeline_mode<synchronous>, transform_indices = @transform_9, window_bounds = array<i64: 128, 128>}, {pipeline_mode = #tpu.pipeline_mode<synchronous>, transform_indices = @transform_10, window_bounds = array<i64: 1, 128>}, {pipeline_mode = #tpu.pipeline_mode<synchronous>, transform_indices = @transform_11, window_bounds = array<i64: 128, 128>}, {pipeline_mode = #tpu.pipeline_mode<synchronous>, transform_indices = @transform_12, window_bounds = array<i64: 1, 128>}, {pipeline_mode = #tpu.pipeline_mode<synchronous>, transform_indices = @transform_13, window_bounds = array<i64: 128, 128>}, {pipeline_mode = #tpu.pipeline_mode<synchronous>, transform_indices = @transform_14, window_bounds = array<i64: 1, 128>}, {transform_indices = @transform_15, window_bounds = array<i64: 208, 2>}]} {
    %c0 = arith.constant 0 : index
    %c0_0 = arith.constant 0 : index
    %0 = vector.load %arg1[%c0, %c0_0] : memref<208x32xbf16, #tpu.memory_space<vmem>>, vector<208x32xbf16>
    %1 = arith.extf %0 : vector<208x32xbf16> to vector<208x32xf32>
    %cst = arith.constant 0.000000e+00 : f32
    %2 = vector.broadcast %cst : f32 to vector<208x96xf32>
    %3 = tpu.concatenate %1, %2 in 1 : vector<208x32xf32>, vector<208x96xf32> -> vector<208x128xf32>
    %4 = arith.truncf %3 : vector<208x128xf32> to vector<208x128xbf16>
    %cst_1 = arith.constant 0.000000e+00 : bf16
    %5 = vector.broadcast %cst_1 : bf16 to vector<208x128xbf16>
    %6 = arith.maximumf %4, %5 : vector<208x128xbf16>
    %7 = math.absf %4 : vector<208x128xbf16>
    %cst_2 = arith.constant 0.000000e+00 : bf16
    %8 = vector.broadcast %cst_2 : bf16 to vector<208x128xbf16>
    %9 = arith.subf %8, %7 : vector<208x128xbf16>
    %10 = math.exp %9 : vector<208x128xbf16>
    %11 = math.log1p %10 : vector<208x128xbf16>
    %12 = arith.addf %6, %11 : vector<208x128xbf16>
    %c0_3 = arith.constant 0 : index
    %c0_4 = arith.constant 0 : index
    %13 = vector.load %arg2[%c0_3, %c0_4] : memref<128x128xbf16, #tpu.memory_space<vmem>>, vector<128x128xbf16>
    %cst_5 = arith.constant dense<0.000000e+00> : vector<208x128xf32>
    %14 = tpu.matmul %12, %13, %cst_5 {dimension_numbers = #tpu.dot_dimension_numbers<[1], [0], [0], [1], [0, 0, 1, 1], [], []>} : vector<208x128xbf16>, vector<128x128xbf16>, vector<208x128xf32> -> vector<208x128xf32>
    %c0_6 = arith.constant 0 : index
    %c0_7 = arith.constant 0 : index
    %15 = vector.load %arg3[%c0_6, %c0_7] : memref<1x128xf32, #tpu.memory_space<vmem>>, vector<1x128xf32>
    %16 = vector.broadcast %15 : vector<1x128xf32> to vector<208x128xf32>
    %17 = arith.addf %14, %16 : vector<208x128xf32>
    %18 = arith.truncf %17 : vector<208x128xf32> to vector<208x128xbf16>
    %cst_8 = arith.constant 0.000000e+00 : bf16
    %19 = vector.broadcast %cst_8 : bf16 to vector<208x128xbf16>
    %20 = arith.maximumf %18, %19 : vector<208x128xbf16>
    %21 = math.absf %18 : vector<208x128xbf16>
    %cst_9 = arith.constant 0.000000e+00 : bf16
    %22 = vector.broadcast %cst_9 : bf16 to vector<208x128xbf16>
    %23 = arith.subf %22, %21 : vector<208x128xbf16>
    %24 = math.exp %23 : vector<208x128xbf16>
    %25 = math.log1p %24 : vector<208x128xbf16>
    %26 = arith.addf %20, %25 : vector<208x128xbf16>
    %c0_10 = arith.constant 0 : index
    %c0_11 = arith.constant 0 : index
    %27 = vector.load %arg4[%c0_10, %c0_11] : memref<128x128xbf16, #tpu.memory_space<vmem>>, vector<128x128xbf16>
    %cst_12 = arith.constant dense<0.000000e+00> : vector<208x128xf32>
    %28 = tpu.matmul %26, %27, %cst_12 {dimension_numbers = #tpu.dot_dimension_numbers<[1], [0], [0], [1], [0, 0, 1, 1], [], []>} : vector<208x128xbf16>, vector<128x128xbf16>, vector<208x128xf32> -> vector<208x128xf32>
    %c0_13 = arith.constant 0 : index
    %c0_14 = arith.constant 0 : index
    %29 = vector.load %arg5[%c0_13, %c0_14] : memref<1x128xf32, #tpu.memory_space<vmem>>, vector<1x128xf32>
    %30 = vector.broadcast %29 : vector<1x128xf32> to vector<208x128xf32>
    %31 = arith.addf %28, %30 : vector<208x128xf32>
    %32 = arith.addf %3, %31 : vector<208x128xf32>
    %33 = arith.truncf %32 : vector<208x128xf32> to vector<208x128xbf16>
    %cst_15 = arith.constant 0.000000e+00 : bf16
    %34 = vector.broadcast %cst_15 : bf16 to vector<208x128xbf16>
    %35 = arith.maximumf %33, %34 : vector<208x128xbf16>
    %36 = math.absf %33 : vector<208x128xbf16>
    %cst_16 = arith.constant 0.000000e+00 : bf16
    %37 = vector.broadcast %cst_16 : bf16 to vector<208x128xbf16>
    %38 = arith.subf %37, %36 : vector<208x128xbf16>
    %39 = math.exp %38 : vector<208x128xbf16>
    %40 = math.log1p %39 : vector<208x128xbf16>
    %41 = arith.addf %35, %40 : vector<208x128xbf16>
    %c0_17 = arith.constant 0 : index
    %c0_18 = arith.constant 0 : index
    %42 = vector.load %arg6[%c0_17, %c0_18] : memref<128x128xbf16, #tpu.memory_space<vmem>>, vector<128x128xbf16>
    %cst_19 = arith.constant dense<0.000000e+00> : vector<208x128xf32>
    %43 = tpu.matmul %41, %42, %cst_19 {dimension_numbers = #tpu.dot_dimension_numbers<[1], [0], [0], [1], [0, 0, 1, 1], [], []>} : vector<208x128xbf16>, vector<128x128xbf16>, vector<208x128xf32> -> vector<208x128xf32>
    %c0_20 = arith.constant 0 : index
    %c0_21 = arith.constant 0 : index
    %44 = vector.load %arg7[%c0_20, %c0_21] : memref<1x128xf32, #tpu.memory_space<vmem>>, vector<1x128xf32>
    %45 = vector.broadcast %44 : vector<1x128xf32> to vector<208x128xf32>
    %46 = arith.addf %43, %45 : vector<208x128xf32>
    %47 = arith.truncf %46 : vector<208x128xf32> to vector<208x128xbf16>
    %cst_22 = arith.constant 0.000000e+00 : bf16
    %48 = vector.broadcast %cst_22 : bf16 to vector<208x128xbf16>
    %49 = arith.maximumf %47, %48 : vector<208x128xbf16>
    %50 = math.absf %47 : vector<208x128xbf16>
    %cst_23 = arith.constant 0.000000e+00 : bf16
    %51 = vector.broadcast %cst_23 : bf16 to vector<208x128xbf16>
    %52 = arith.subf %51, %50 : vector<208x128xbf16>
    %53 = math.exp %52 : vector<208x128xbf16>
    %54 = math.log1p %53 : vector<208x128xbf16>
    %55 = arith.addf %49, %54 : vector<208x128xbf16>
    %c0_24 = arith.constant 0 : index
    %c0_25 = arith.constant 0 : index
    %56 = vector.load %arg8[%c0_24, %c0_25] : memref<128x128xbf16, #tpu.memory_space<vmem>>, vector<128x128xbf16>
    %cst_26 = arith.constant dense<0.000000e+00> : vector<208x128xf32>
    %57 = tpu.matmul %55, %56, %cst_26 {dimension_numbers = #tpu.dot_dimension_numbers<[1], [0], [0], [1], [0, 0, 1, 1], [], []>} : vector<208x128xbf16>, vector<128x128xbf16>, vector<208x128xf32> -> vector<208x128xf32>
    %c0_27 = arith.constant 0 : index
    %c0_28 = arith.constant 0 : index
    %58 = vector.load %arg9[%c0_27, %c0_28] : memref<1x128xf32, #tpu.memory_space<vmem>>, vector<1x128xf32>
    %59 = vector.broadcast %58 : vector<1x128xf32> to vector<208x128xf32>
    %60 = arith.addf %57, %59 : vector<208x128xf32>
    %61 = arith.addf %32, %60 : vector<208x128xf32>
    %62 = arith.truncf %61 : vector<208x128xf32> to vector<208x128xbf16>
    %cst_29 = arith.constant 0.000000e+00 : bf16
    %63 = vector.broadcast %cst_29 : bf16 to vector<208x128xbf16>
    %64 = arith.maximumf %62, %63 : vector<208x128xbf16>
    %65 = math.absf %62 : vector<208x128xbf16>
    %cst_30 = arith.constant 0.000000e+00 : bf16
    %66 = vector.broadcast %cst_30 : bf16 to vector<208x128xbf16>
    %67 = arith.subf %66, %65 : vector<208x128xbf16>
    %68 = math.exp %67 : vector<208x128xbf16>
    %69 = math.log1p %68 : vector<208x128xbf16>
    %70 = arith.addf %64, %69 : vector<208x128xbf16>
    %c0_31 = arith.constant 0 : index
    %c0_32 = arith.constant 0 : index
    %71 = vector.load %arg10[%c0_31, %c0_32] : memref<128x128xbf16, #tpu.memory_space<vmem>>, vector<128x128xbf16>
    %cst_33 = arith.constant dense<0.000000e+00> : vector<208x128xf32>
    %72 = tpu.matmul %70, %71, %cst_33 {dimension_numbers = #tpu.dot_dimension_numbers<[1], [0], [0], [1], [0, 0, 1, 1], [], []>} : vector<208x128xbf16>, vector<128x128xbf16>, vector<208x128xf32> -> vector<208x128xf32>
    %c0_34 = arith.constant 0 : index
    %c0_35 = arith.constant 0 : index
    %73 = vector.load %arg11[%c0_34, %c0_35] : memref<1x128xf32, #tpu.memory_space<vmem>>, vector<1x128xf32>
    %74 = vector.broadcast %73 : vector<1x128xf32> to vector<208x128xf32>
    %75 = arith.addf %72, %74 : vector<208x128xf32>
    %76 = arith.truncf %75 : vector<208x128xf32> to vector<208x128xbf16>
    %cst_36 = arith.constant 0.000000e+00 : bf16
    %77 = vector.broadcast %cst_36 : bf16 to vector<208x128xbf16>
    %78 = arith.maximumf %76, %77 : vector<208x128xbf16>
    %79 = math.absf %76 : vector<208x128xbf16>
    %cst_37 = arith.constant 0.000000e+00 : bf16
    %80 = vector.broadcast %cst_37 : bf16 to vector<208x128xbf16>
    %81 = arith.subf %80, %79 : vector<208x128xbf16>
    %82 = math.exp %81 : vector<208x128xbf16>
    %83 = math.log1p %82 : vector<208x128xbf16>
    %84 = arith.addf %78, %83 : vector<208x128xbf16>
    %c0_38 = arith.constant 0 : index
    %c0_39 = arith.constant 0 : index
    %85 = vector.load %arg12[%c0_38, %c0_39] : memref<128x128xbf16, #tpu.memory_space<vmem>>, vector<128x128xbf16>
    %cst_40 = arith.constant dense<0.000000e+00> : vector<208x128xf32>
    %86 = tpu.matmul %84, %85, %cst_40 {dimension_numbers = #tpu.dot_dimension_numbers<[1], [0], [0], [1], [0, 0, 1, 1], [], []>} : vector<208x128xbf16>, vector<128x128xbf16>, vector<208x128xf32> -> vector<208x128xf32>
    %c0_41 = arith.constant 0 : index
    %c0_42 = arith.constant 0 : index
    %87 = vector.load %arg13[%c0_41, %c0_42] : memref<1x128xf32, #tpu.memory_space<vmem>>, vector<1x128xf32>
    %88 = vector.broadcast %87 : vector<1x128xf32> to vector<208x128xf32>
    %89 = arith.addf %86, %88 : vector<208x128xf32>
    %90 = arith.truncf %89 : vector<208x128xf32> to vector<208x128xbf16>
    %cst_43 = arith.constant 0.000000e+00 : bf16
    %91 = vector.broadcast %cst_43 : bf16 to vector<208x128xbf16>
    %92 = arith.maximumf %90, %91 : vector<208x128xbf16>
    %93 = math.absf %90 : vector<208x128xbf16>
    %cst_44 = arith.constant 0.000000e+00 : bf16
    %94 = vector.broadcast %cst_44 : bf16 to vector<208x128xbf16>
    %95 = arith.subf %94, %93 : vector<208x128xbf16>
    %96 = math.exp %95 : vector<208x128xbf16>
    %97 = math.log1p %96 : vector<208x128xbf16>
    %98 = arith.addf %92, %97 : vector<208x128xbf16>
    %c0_45 = arith.constant 0 : index
    %c0_46 = arith.constant 0 : index
    %99 = vector.load %arg14[%c0_45, %c0_46] : memref<128x128xbf16, #tpu.memory_space<vmem>>, vector<128x128xbf16>
    %cst_47 = arith.constant dense<0.000000e+00> : vector<208x128xf32>
    %100 = tpu.matmul %98, %99, %cst_47 {dimension_numbers = #tpu.dot_dimension_numbers<[1], [0], [0], [1], [0, 0, 1, 1], [], []>} : vector<208x128xbf16>, vector<128x128xbf16>, vector<208x128xf32> -> vector<208x128xf32>
    %c0_48 = arith.constant 0 : index
    %c0_49 = arith.constant 0 : index
    %101 = vector.load %arg15[%c0_48, %c0_49] : memref<1x128xf32, #tpu.memory_space<vmem>>, vector<1x128xf32>
    %102 = vector.broadcast %101 : vector<1x128xf32> to vector<208x128xf32>
    %103 = arith.addf %100, %102 : vector<208x128xf32>
    %104 = vector.extract_strided_slice %103 {offsets = [0, 0], sizes = [208, 2], strides = [1, 1]} : vector<208x128xf32> to vector<208x2xf32>
    %c0_50 = arith.constant 0 : index
    %c0_51 = arith.constant 0 : index
    %105 = vector.load %arg16[%c0_50, %c0_51] : memref<208x2xf32, #tpu.memory_space<vmem>>, vector<208x2xf32>
    tpu.vector_store %arg16[%c0_50, %c0_51], %104 {strides = array<i32>} : memref<208x2xf32, #tpu.memory_space<vmem>>, vector<208x2xf32>,
    return
  }
  func.func @transform_0(%arg0: i32) -> (i32, i32) {
    %c0_i32 = arith.constant 0 : i32
    %c0_i32_0 = arith.constant 0 : i32
    return %arg0, %c0_i32 : i32, i32
  }
  func.func @transform_1(%arg0: i32) -> (i32, i32) {
    %c0_i32 = arith.constant 0 : i32
    %c0_i32_0 = arith.constant 0 : i32
    %c0_i32_1 = arith.constant 0 : i32
    return %c0_i32, %c0_i32_0 : i32, i32
  }
  func.func @transform_2(%arg0: i32) -> (i32, i32) {
    %c0_i32 = arith.constant 0 : i32
    %c0_i32_0 = arith.constant 0 : i32
    %c0_i32_1 = arith.constant 0 : i32
    return %c0_i32, %c0_i32_0 : i32, i32
  }
  func.func @transform_3(%arg0: i32) -> (i32, i32) {
    %c0_i32 = arith.constant 0 : i32
    %c0_i32_0 = arith.constant 0 : i32
    %c0_i32_1 = arith.constant 0 : i32
    return %c0_i32, %c0_i32_0 : i32, i32
  }
  func.func @transform_4(%arg0: i32) -> (i32, i32) {
    %c0_i32 = arith.constant 0 : i32
    %c0_i32_0 = arith.constant 0 : i32
    %c0_i32_1 = arith.constant 0 : i32
    return %c0_i32, %c0_i32_0 : i32, i32
  }
  func.func @transform_5(%arg0: i32) -> (i32, i32) {
    %c0_i32 = arith.constant 0 : i32
    %c0_i32_0 = arith.constant 0 : i32
    %c0_i32_1 = arith.constant 0 : i32
    return %c0_i32, %c0_i32_0 : i32, i32
  }
  func.func @transform_6(%arg0: i32) -> (i32, i32) {
    %c0_i32 = arith.constant 0 : i32
    %c0_i32_0 = arith.constant 0 : i32
    %c0_i32_1 = arith.constant 0 : i32
    return %c0_i32, %c0_i32_0 : i32, i32
  }
  func.func @transform_7(%arg0: i32) -> (i32, i32) {
    %c0_i32 = arith.constant 0 : i32
    %c0_i32_0 = arith.constant 0 : i32
    %c0_i32_1 = arith.constant 0 : i32
    return %c0_i32, %c0_i32_0 : i32, i32
  }
  func.func @transform_8(%arg0: i32) -> (i32, i32) {
    %c0_i32 = arith.constant 0 : i32
    %c0_i32_0 = arith.constant 0 : i32
    %c0_i32_1 = arith.constant 0 : i32
    return %c0_i32, %c0_i32_0 : i32, i32
  }
  func.func @transform_9(%arg0: i32) -> (i32, i32) {
    %c0_i32 = arith.constant 0 : i32
    %c0_i32_0 = arith.constant 0 : i32
    %c0_i32_1 = arith.constant 0 : i32
    return %c0_i32, %c0_i32_0 : i32, i32
  }
  func.func @transform_10(%arg0: i32) -> (i32, i32) {
    %c0_i32 = arith.constant 0 : i32
    %c0_i32_0 = arith.constant 0 : i32
    %c0_i32_1 = arith.constant 0 : i32
    return %c0_i32, %c0_i32_0 : i32, i32
  }
  func.func @transform_11(%arg0: i32) -> (i32, i32) {
    %c0_i32 = arith.constant 0 : i32
    %c0_i32_0 = arith.constant 0 : i32
    %c0_i32_1 = arith.constant 0 : i32
    return %c0_i32, %c0_i32_0 : i32, i32
  }
  func.func @transform_12(%arg0: i32) -> (i32, i32) {
    %c0_i32 = arith.constant 0 : i32
    %c0_i32_0 = arith.constant 0 : i32
    %c0_i32_1 = arith.constant 0 : i32
    return %c0_i32, %c0_i32_0 : i32, i32
  }
  func.func @transform_13(%arg0: i32) -> (i32, i32) {
    %c0_i32 = arith.constant 0 : i32
    %c0_i32_0 = arith.constant 0 : i32
    %c0_i32_1 = arith.constant 0 : i32
    return %c0_i32, %c0_i32_0 : i32, i32
  }
  func.func @transform_14(%arg0: i32) -> (i32, i32) {
    %c0_i32 = arith.constant 0 : i32
    %c0_i32_0 = arith.constant 0 : i32
    %c0_i32_1 = arith.constant 0 : i32
    return %c0_i32, %c0_i32_0 : i32, i32
  }
  func.func @transform_15(%arg0: i32) -> (i32, i32) {
    %c0_i32 = arith.constant 0 : i32
    %c0_i32_0 = arith.constant 0 : i32
    return %arg0, %c0_i32 : i32, i32
  }
}

module attributes {stable_mosaic.version = 11 : i64} {
  func.func @_output_layer_kernel(%arg0: i32, %arg1: memref<208x32xbf16, #tpu.memory_space<vmem>>, %arg2: memref<128x128xbf16, #tpu.memory_space<vmem>>, %arg3: memref<1x128xf32, #tpu.memory_space<vmem>>, %arg4: memref<128x128xbf16, #tpu.memory_space<vmem>>, %arg5: memref<1x128xf32, #tpu.memory_space<vmem>>, %arg6: memref<128x128xbf16, #tpu.memory_space<vmem>>, %arg7: memref<1x128xf32, #tpu.memory_space<vmem>>, %arg8: memref<128x128xbf16, #tpu.memory_space<vmem>>, %arg9: memref<1x128xf32, #tpu.memory_space<vmem>>, %arg10: memref<128x128xbf16, #tpu.memory_space<vmem>>, %arg11: memref<1x128xf32, #tpu.memory_space<vmem>>, %arg12: memref<128x128xbf16, #tpu.memory_space<vmem>>, %arg13: memref<1x128xf32, #tpu.memory_space<vmem>>, %arg14: memref<128x128xbf16, #tpu.memory_space<vmem>>, %arg15: memref<1x128xf32, #tpu.memory_space<vmem>>, %arg16: memref<208x2xf32, #tpu.memory_space<vmem>>) attributes {dimension_semantics = [#tpu.dimension_semantics<parallel>], iteration_bounds = array<i64: 1>, scalar_prefetch = 0 : i64, scratch_operands = 0 : i64, tpu.core_type = #tpu.core_type<tc>, window_params = [{transform_indices = @transform_0, window_bounds = array<i64: 208, 32>}, {pipeline_mode = #tpu.pipeline_mode<synchronous>, transform_indices = @transform_1, window_bounds = array<i64: 128, 128>}, {pipeline_mode = #tpu.pipeline_mode<synchronous>, transform_indices = @transform_2, window_bounds = array<i64: 1, 128>}, {pipeline_mode = #tpu.pipeline_mode<synchronous>, transform_indices = @transform_3, window_bounds = array<i64: 128, 128>}, {pipeline_mode = #tpu.pipeline_mode<synchronous>, transform_indices = @transform_4, window_bounds = array<i64: 1, 128>}, {pipeline_mode = #tpu.pipeline_mode<synchronous>, transform_indices = @transform_5, window_bounds = array<i64: 128, 128>}, {pipeline_mode = #tpu.pipeline_mode<synchronous>, transform_indices = @transform_6, window_bounds = array<i64: 1, 128>}, {pipeline_mode = #tpu.pipeline_mode<synchronous>, transform_indices = @transform_7, window_bounds = array<i64: 128, 128>}, {pipeline_mode = #tpu.pipeline_mode<synchronous>, transform_indices = @transform_8, window_bounds = array<i64: 1, 128>}, {pipeline_mode = #tpu.pipeline_mode<synchronous>, transform_indices = @transform_9, window_bounds = array<i64: 128, 128>}, {pipeline_mode = #tpu.pipeline_mode<synchronous>, transform_indices = @transform_10, window_bounds = array<i64: 1, 128>}, {pipeline_mode = #tpu.pipeline_mode<synchronous>, transform_indices = @transform_11, window_bounds = array<i64: 128, 128>}, {pipeline_mode = #tpu.pipeline_mode<synchronous>, transform_indices = @transform_12, window_bounds = array<i64: 1, 128>}, {pipeline_mode = #tpu.pipeline_mode<synchronous>, transform_indices = @transform_13, window_bounds = array<i64: 128, 128>}, {pipeline_mode = #tpu.pipeline_mode<synchronous>, transform_indices = @transform_14, window_bounds = array<i64: 1, 128>}, {transform_indices = @transform_15, window_bounds = array<i64: 208, 2>}]} {
    %c0 = arith.constant 0 : index
    %c0_0 = arith.constant 0 : index
    %0 = vector.load %arg1[%c0, %c0_0] : memref<208x32xbf16, #tpu.memory_space<vmem>>, vector<208x32xbf16>
    %1 = arith.extf %0 : vector<208x32xbf16> to vector<208x32xf32>
    %cst = arith.constant 0.000000e+00 : f32
    %2 = vector.broadcast %cst : f32 to vector<208x96xf32>
    %3 = tpu.concatenate %1, %2 in 1 : vector<208x32xf32>, vector<208x96xf32> -> vector<208x128xf32>
    %cst_1 = arith.constant 0.000000e+00 : f32
    %4 = vector.broadcast %cst_1 : f32 to vector<208x128xf32>
    %5 = arith.maximumf %3, %4 : vector<208x128xf32>
    %6 = math.absf %3 : vector<208x128xf32>
    %cst_2 = arith.constant 0.000000e+00 : f32
    %7 = vector.broadcast %cst_2 : f32 to vector<208x128xf32>
    %8 = arith.subf %7, %6 : vector<208x128xf32>
    %9 = math.exp %8 : vector<208x128xf32>
    %10 = math.log1p %9 : vector<208x128xf32>
    %11 = arith.addf %5, %10 : vector<208x128xf32>
    %12 = arith.truncf %11 : vector<208x128xf32> to vector<208x128xbf16>
    %c0_3 = arith.constant 0 : index
    %c0_4 = arith.constant 0 : index
    %13 = vector.load %arg2[%c0_3, %c0_4] : memref<128x128xbf16, #tpu.memory_space<vmem>>, vector<128x128xbf16>
    %cst_5 = arith.constant dense<0.000000e+00> : vector<208x128xf32>
    %14 = tpu.matmul %12, %13, %cst_5 {dimension_numbers = #tpu.dot_dimension_numbers<[1], [0], [0], [1], [0, 0, 1, 1], [], []>} : vector<208x128xbf16>, vector<128x128xbf16>, vector<208x128xf32> -> vector<208x128xf32>
    %c0_6 = arith.constant 0 : index
    %c0_7 = arith.constant 0 : index
    %15 = vector.load %arg3[%c0_6, %c0_7] : memref<1x128xf32, #tpu.memory_space<vmem>>, vector<1x128xf32>
    %16 = vector.broadcast %15 : vector<1x128xf32> to vector<208x128xf32>
    %17 = arith.addf %14, %16 : vector<208x128xf32>
    %cst_8 = arith.constant 0.000000e+00 : f32
    %18 = vector.broadcast %cst_8 : f32 to vector<208x128xf32>
    %19 = arith.maximumf %17, %18 : vector<208x128xf32>
    %20 = math.absf %17 : vector<208x128xf32>
    %cst_9 = arith.constant 0.000000e+00 : f32
    %21 = vector.broadcast %cst_9 : f32 to vector<208x128xf32>
    %22 = arith.subf %21, %20 : vector<208x128xf32>
    %23 = math.exp %22 : vector<208x128xf32>
    %24 = math.log1p %23 : vector<208x128xf32>
    %25 = arith.addf %19, %24 : vector<208x128xf32>
    %26 = arith.truncf %25 : vector<208x128xf32> to vector<208x128xbf16>
    %c0_10 = arith.constant 0 : index
    %c0_11 = arith.constant 0 : index
    %27 = vector.load %arg4[%c0_10, %c0_11] : memref<128x128xbf16, #tpu.memory_space<vmem>>, vector<128x128xbf16>
    %cst_12 = arith.constant dense<0.000000e+00> : vector<208x128xf32>
    %28 = tpu.matmul %26, %27, %cst_12 {dimension_numbers = #tpu.dot_dimension_numbers<[1], [0], [0], [1], [0, 0, 1, 1], [], []>} : vector<208x128xbf16>, vector<128x128xbf16>, vector<208x128xf32> -> vector<208x128xf32>
    %c0_13 = arith.constant 0 : index
    %c0_14 = arith.constant 0 : index
    %29 = vector.load %arg5[%c0_13, %c0_14] : memref<1x128xf32, #tpu.memory_space<vmem>>, vector<1x128xf32>
    %30 = vector.broadcast %29 : vector<1x128xf32> to vector<208x128xf32>
    %31 = arith.addf %28, %30 : vector<208x128xf32>
    %32 = arith.addf %3, %31 : vector<208x128xf32>
    %cst_15 = arith.constant 0.000000e+00 : f32
    %33 = vector.broadcast %cst_15 : f32 to vector<208x128xf32>
    %34 = arith.maximumf %32, %33 : vector<208x128xf32>
    %35 = math.absf %32 : vector<208x128xf32>
    %cst_16 = arith.constant 0.000000e+00 : f32
    %36 = vector.broadcast %cst_16 : f32 to vector<208x128xf32>
    %37 = arith.subf %36, %35 : vector<208x128xf32>
    %38 = math.exp %37 : vector<208x128xf32>
    %39 = math.log1p %38 : vector<208x128xf32>
    %40 = arith.addf %34, %39 : vector<208x128xf32>
    %41 = arith.truncf %40 : vector<208x128xf32> to vector<208x128xbf16>
    %c0_17 = arith.constant 0 : index
    %c0_18 = arith.constant 0 : index
    %42 = vector.load %arg6[%c0_17, %c0_18] : memref<128x128xbf16, #tpu.memory_space<vmem>>, vector<128x128xbf16>
    %cst_19 = arith.constant dense<0.000000e+00> : vector<208x128xf32>
    %43 = tpu.matmul %41, %42, %cst_19 {dimension_numbers = #tpu.dot_dimension_numbers<[1], [0], [0], [1], [0, 0, 1, 1], [], []>} : vector<208x128xbf16>, vector<128x128xbf16>, vector<208x128xf32> -> vector<208x128xf32>
    %c0_20 = arith.constant 0 : index
    %c0_21 = arith.constant 0 : index
    %44 = vector.load %arg7[%c0_20, %c0_21] : memref<1x128xf32, #tpu.memory_space<vmem>>, vector<1x128xf32>
    %45 = vector.broadcast %44 : vector<1x128xf32> to vector<208x128xf32>
    %46 = arith.addf %43, %45 : vector<208x128xf32>
    %cst_22 = arith.constant 0.000000e+00 : f32
    %47 = vector.broadcast %cst_22 : f32 to vector<208x128xf32>
    %48 = arith.maximumf %46, %47 : vector<208x128xf32>
    %49 = math.absf %46 : vector<208x128xf32>
    %cst_23 = arith.constant 0.000000e+00 : f32
    %50 = vector.broadcast %cst_23 : f32 to vector<208x128xf32>
    %51 = arith.subf %50, %49 : vector<208x128xf32>
    %52 = math.exp %51 : vector<208x128xf32>
    %53 = math.log1p %52 : vector<208x128xf32>
    %54 = arith.addf %48, %53 : vector<208x128xf32>
    %55 = arith.truncf %54 : vector<208x128xf32> to vector<208x128xbf16>
    %c0_24 = arith.constant 0 : index
    %c0_25 = arith.constant 0 : index
    %56 = vector.load %arg8[%c0_24, %c0_25] : memref<128x128xbf16, #tpu.memory_space<vmem>>, vector<128x128xbf16>
    %cst_26 = arith.constant dense<0.000000e+00> : vector<208x128xf32>
    %57 = tpu.matmul %55, %56, %cst_26 {dimension_numbers = #tpu.dot_dimension_numbers<[1], [0], [0], [1], [0, 0, 1, 1], [], []>} : vector<208x128xbf16>, vector<128x128xbf16>, vector<208x128xf32> -> vector<208x128xf32>
    %c0_27 = arith.constant 0 : index
    %c0_28 = arith.constant 0 : index
    %58 = vector.load %arg9[%c0_27, %c0_28] : memref<1x128xf32, #tpu.memory_space<vmem>>, vector<1x128xf32>
    %59 = vector.broadcast %58 : vector<1x128xf32> to vector<208x128xf32>
    %60 = arith.addf %57, %59 : vector<208x128xf32>
    %61 = arith.addf %32, %60 : vector<208x128xf32>
    %cst_29 = arith.constant 0.000000e+00 : f32
    %62 = vector.broadcast %cst_29 : f32 to vector<208x128xf32>
    %63 = arith.maximumf %61, %62 : vector<208x128xf32>
    %64 = math.absf %61 : vector<208x128xf32>
    %cst_30 = arith.constant 0.000000e+00 : f32
    %65 = vector.broadcast %cst_30 : f32 to vector<208x128xf32>
    %66 = arith.subf %65, %64 : vector<208x128xf32>
    %67 = math.exp %66 : vector<208x128xf32>
    %68 = math.log1p %67 : vector<208x128xf32>
    %69 = arith.addf %63, %68 : vector<208x128xf32>
    %70 = arith.truncf %69 : vector<208x128xf32> to vector<208x128xbf16>
    %c0_31 = arith.constant 0 : index
    %c0_32 = arith.constant 0 : index
    %71 = vector.load %arg10[%c0_31, %c0_32] : memref<128x128xbf16, #tpu.memory_space<vmem>>, vector<128x128xbf16>
    %cst_33 = arith.constant dense<0.000000e+00> : vector<208x128xf32>
    %72 = tpu.matmul %70, %71, %cst_33 {dimension_numbers = #tpu.dot_dimension_numbers<[1], [0], [0], [1], [0, 0, 1, 1], [], []>} : vector<208x128xbf16>, vector<128x128xbf16>, vector<208x128xf32> -> vector<208x128xf32>
    %c0_34 = arith.constant 0 : index
    %c0_35 = arith.constant 0 : index
    %73 = vector.load %arg11[%c0_34, %c0_35] : memref<1x128xf32, #tpu.memory_space<vmem>>, vector<1x128xf32>
    %74 = vector.broadcast %73 : vector<1x128xf32> to vector<208x128xf32>
    %75 = arith.addf %72, %74 : vector<208x128xf32>
    %cst_36 = arith.constant 0.000000e+00 : f32
    %76 = vector.broadcast %cst_36 : f32 to vector<208x128xf32>
    %77 = arith.maximumf %75, %76 : vector<208x128xf32>
    %78 = math.absf %75 : vector<208x128xf32>
    %cst_37 = arith.constant 0.000000e+00 : f32
    %79 = vector.broadcast %cst_37 : f32 to vector<208x128xf32>
    %80 = arith.subf %79, %78 : vector<208x128xf32>
    %81 = math.exp %80 : vector<208x128xf32>
    %82 = math.log1p %81 : vector<208x128xf32>
    %83 = arith.addf %77, %82 : vector<208x128xf32>
    %84 = arith.truncf %83 : vector<208x128xf32> to vector<208x128xbf16>
    %c0_38 = arith.constant 0 : index
    %c0_39 = arith.constant 0 : index
    %85 = vector.load %arg12[%c0_38, %c0_39] : memref<128x128xbf16, #tpu.memory_space<vmem>>, vector<128x128xbf16>
    %cst_40 = arith.constant dense<0.000000e+00> : vector<208x128xf32>
    %86 = tpu.matmul %84, %85, %cst_40 {dimension_numbers = #tpu.dot_dimension_numbers<[1], [0], [0], [1], [0, 0, 1, 1], [], []>} : vector<208x128xbf16>, vector<128x128xbf16>, vector<208x128xf32> -> vector<208x128xf32>
    %c0_41 = arith.constant 0 : index
    %c0_42 = arith.constant 0 : index
    %87 = vector.load %arg13[%c0_41, %c0_42] : memref<1x128xf32, #tpu.memory_space<vmem>>, vector<1x128xf32>
    %88 = vector.broadcast %87 : vector<1x128xf32> to vector<208x128xf32>
    %89 = arith.addf %86, %88 : vector<208x128xf32>
    %cst_43 = arith.constant 0.000000e+00 : f32
    %90 = vector.broadcast %cst_43 : f32 to vector<208x128xf32>
    %91 = arith.maximumf %89, %90 : vector<208x128xf32>
    %92 = math.absf %89 : vector<208x128xf32>
    %cst_44 = arith.constant 0.000000e+00 : f32
    %93 = vector.broadcast %cst_44 : f32 to vector<208x128xf32>
    %94 = arith.subf %93, %92 : vector<208x128xf32>
    %95 = math.exp %94 : vector<208x128xf32>
    %96 = math.log1p %95 : vector<208x128xf32>
    %97 = arith.addf %91, %96 : vector<208x128xf32>
    %98 = arith.truncf %97 : vector<208x128xf32> to vector<208x128xbf16>
    %c0_45 = arith.constant 0 : index
    %c0_46 = arith.constant 0 : index
    %99 = vector.load %arg14[%c0_45, %c0_46] : memref<128x128xbf16, #tpu.memory_space<vmem>>, vector<128x128xbf16>
    %cst_47 = arith.constant dense<0.000000e+00> : vector<208x128xf32>
    %100 = tpu.matmul %98, %99, %cst_47 {dimension_numbers = #tpu.dot_dimension_numbers<[1], [0], [0], [1], [0, 0, 1, 1], [], []>} : vector<208x128xbf16>, vector<128x128xbf16>, vector<208x128xf32> -> vector<208x128xf32>
    %c0_48 = arith.constant 0 : index
    %c0_49 = arith.constant 0 : index
    %101 = vector.load %arg15[%c0_48, %c0_49] : memref<1x128xf32, #tpu.memory_space<vmem>>, vector<1x128xf32>
    %102 = vector.broadcast %101 : vector<1x128xf32> to vector<208x128xf32>
    %103 = arith.addf %100, %102 : vector<208x128xf32>
    %104 = vector.extract_strided_slice %103 {offsets = [0, 0], sizes = [208, 2], strides = [1, 1]} : vector<208x128xf32> to vector<208x2xf32>
    %c0_50 = arith.constant 0 : index
    %c0_51 = arith.constant 0 : index
    %105 = vector.load %arg16[%c0_50, %c0_51] : memref<208x2xf32, #tpu.memory_space<vmem>>, vector<208x2xf32>
    tpu.vector_store %arg16[%c0_50, %c0_51], %104 {strides = array<i32>} : memref<208x2xf32, #tpu.memory_space<vmem>>, vector<208x2xf32>,
    return
  }
  func.func @transform_0(%arg0: i32) -> (i32, i32) {
    %c0_i32 = arith.constant 0 : i32
    %c0_i32_0 = arith.constant 0 : i32
    return %arg0, %c0_i32 : i32, i32
  }
  func.func @transform_1(%arg0: i32) -> (i32, i32) {
    %c0_i32 = arith.constant 0 : i32
    %c0_i32_0 = arith.constant 0 : i32
    %c0_i32_1 = arith.constant 0 : i32
    return %c0_i32, %c0_i32_0 : i32, i32
  }
  func.func @transform_2(%arg0: i32) -> (i32, i32) {
    %c0_i32 = arith.constant 0 : i32
    %c0_i32_0 = arith.constant 0 : i32
    %c0_i32_1 = arith.constant 0 : i32
    return %c0_i32, %c0_i32_0 : i32, i32
  }
  func.func @transform_3(%arg0: i32) -> (i32, i32) {
    %c0_i32 = arith.constant 0 : i32
    %c0_i32_0 = arith.constant 0 : i32
    %c0_i32_1 = arith.constant 0 : i32
    return %c0_i32, %c0_i32_0 : i32, i32
  }
  func.func @transform_4(%arg0: i32) -> (i32, i32) {
    %c0_i32 = arith.constant 0 : i32
    %c0_i32_0 = arith.constant 0 : i32
    %c0_i32_1 = arith.constant 0 : i32
    return %c0_i32, %c0_i32_0 : i32, i32
  }
  func.func @transform_5(%arg0: i32) -> (i32, i32) {
    %c0_i32 = arith.constant 0 : i32
    %c0_i32_0 = arith.constant 0 : i32
    %c0_i32_1 = arith.constant 0 : i32
    return %c0_i32, %c0_i32_0 : i32, i32
  }
  func.func @transform_6(%arg0: i32) -> (i32, i32) {
    %c0_i32 = arith.constant 0 : i32
    %c0_i32_0 = arith.constant 0 : i32
    %c0_i32_1 = arith.constant 0 : i32
    return %c0_i32, %c0_i32_0 : i32, i32
  }
  func.func @transform_7(%arg0: i32) -> (i32, i32) {
    %c0_i32 = arith.constant 0 : i32
    %c0_i32_0 = arith.constant 0 : i32
    %c0_i32_1 = arith.constant 0 : i32
    return %c0_i32, %c0_i32_0 : i32, i32
  }
  func.func @transform_8(%arg0: i32) -> (i32, i32) {
    %c0_i32 = arith.constant 0 : i32
    %c0_i32_0 = arith.constant 0 : i32
    %c0_i32_1 = arith.constant 0 : i32
    return %c0_i32, %c0_i32_0 : i32, i32
  }
  func.func @transform_9(%arg0: i32) -> (i32, i32) {
    %c0_i32 = arith.constant 0 : i32
    %c0_i32_0 = arith.constant 0 : i32
    %c0_i32_1 = arith.constant 0 : i32
    return %c0_i32, %c0_i32_0 : i32, i32
  }
  func.func @transform_10(%arg0: i32) -> (i32, i32) {
    %c0_i32 = arith.constant 0 : i32
    %c0_i32_0 = arith.constant 0 : i32
    %c0_i32_1 = arith.constant 0 : i32
    return %c0_i32, %c0_i32_0 : i32, i32
  }
  func.func @transform_11(%arg0: i32) -> (i32, i32) {
    %c0_i32 = arith.constant 0 : i32
    %c0_i32_0 = arith.constant 0 : i32
    %c0_i32_1 = arith.constant 0 : i32
    return %c0_i32, %c0_i32_0 : i32, i32
  }
  func.func @transform_12(%arg0: i32) -> (i32, i32) {
    %c0_i32 = arith.constant 0 : i32
    %c0_i32_0 = arith.constant 0 : i32
    %c0_i32_1 = arith.constant 0 : i32
    return %c0_i32, %c0_i32_0 : i32, i32
  }
  func.func @transform_13(%arg0: i32) -> (i32, i32) {
    %c0_i32 = arith.constant 0 : i32
    %c0_i32_0 = arith.constant 0 : i32
    %c0_i32_1 = arith.constant 0 : i32
    return %c0_i32, %c0_i32_0 : i32, i32
  }
  func.func @transform_14(%arg0: i32) -> (i32, i32) {
    %c0_i32 = arith.constant 0 : i32
    %c0_i32_0 = arith.constant 0 : i32
    %c0_i32_1 = arith.constant 0 : i32
    return %c0_i32, %c0_i32_0 : i32, i32
  }
  func.func @transform_15(%arg0: i32) -> (i32, i32) {
    %c0_i32 = arith.constant 0 : i32
    %c0_i32_0 = arith.constant 0 : i32
    return %arg0, %c0_i32 : i32, i32
  }
}

</mosaic_0001>

<bundles_post_ra>
// kernel: tpu_custom_call.1
= control target key start
LH: loop header
LB: loop body
LE: loop exit
PB: predicated region body
PF: predicated region fallthrough
CT: control target
= control target key end

     0   :  { %20 = vsyncpa [#allocation3], 0  ;;  %s7372_s0 = inlined_call_operand.vmem [shape: bf16[200,32], index: 0, kind: input, shape index: {}]   ;;  %s7373_s1 = inlined_call_operand.vmem [shape: bf16[128,128], index: 1, kind: input, shape index: {}]   ;;  %s7374_s2 = inlined_call_operand.vmem [shape: f32[1,128], index: 2, kind: input, shape index: {}]   ;;  %s7375_s3 = inlined_call_operand.vmem [shape: bf16[128,128], index: 3, kind: input, shape index: {}]   ;;  %s7376_s4 = inlined_call_operand.vmem [shape: f32[1,128], index: 4, kind: input, shape index: {}]   ;;  %s7377_s5 = inlined_call_operand.hbm [shape: bf16[128,128], index: 5, kind: input, shape index: {}]   ;;  %s7378_s6 = inlined_call_operand.vmem [shape: f32[1,128], index: 6, kind: input, shape index: {}]   ;;  %s7379_s7 = inlined_call_operand.hbm [shape: bf16[128,128], index: 7, kind: input, shape index: {}]   ;;  %s7380_s8 = inlined_call_operand.vmem [shape: f32[1,128], index: 8, kind: input, shape index: {}]   ;;  %s7381_s9 = inlined_call_operand.hbm [shape: bf16[128,128], index: 9, kind: input, shape index: {}]   ;;  %s7382_s10 = inlined_call_operand.vmem [shape: f32[1,128], index: 10, kind: input, shape index: {}]   ;;  %s7383_s11 = inlined_call_operand.hbm [shape: bf16[128,128], index: 11, kind: input, shape index: {}]   ;;  %s7384_s12 = inlined_call_operand.vmem [shape: f32[1,128], index: 12, kind: input, shape index: {}]   ;;  %s7385_s13 = inlined_call_operand.hbm [shape: bf16[128,128], index: 13, kind: input, shape index: {}]   ;;  %s7386_s14 = inlined_call_operand.vmem [shape: f32[1,128], index: 14, kind: input, shape index: {}]   ;;  %s7387_s15 = inlined_call_operand.vmem [shape: f32[200,2], index: 15, kind: output, shape index: {}]  }
   0x1   :  { %21 = vsyncpa [#allocation5], 0 }
   0x2   :  { %22 = vsyncpa [#allocation8], 0  ;;  %s52_s20 = sshll.u32 %s7379_s7, 4  ;;  %s5481_s21 = smov [#allocation4]   ;;  %s53_s20 = int_to_ptr.hbm [resolvable:$true] %s52_s20 }
   0x3   :  { %s54_s22 = sshll.u32 %s5481_s21, 4  ;;  %s82_s25 = sshll.u32 %s7383_s11, 4  ;;  %s55_s22 = int_to_ptr.vmem [resolvable:$true] %s54_s22  ;;  %s83_s25 = int_to_ptr.hbm [resolvable:$true] %s82_s25 }
   0x4   :  { %s5482_s26 = smov 64   ;;  %s5483_s27 = smov 4  }
   0x5   :  { %60 = dma.hbm_to_vmem [thread:$0]  %s53_s20, 1024, %s55_s22, [#allocation5], %s5482_s26, %s5482_s26, %s5483_s27  }
   0x6   :  { %s5484_s28 = smov [#allocation7]   ;;  %s37_s17 = sshll.u32 %s7377_s5, 4  ;;  %s38_s17 = int_to_ptr.hbm [resolvable:$true] %s37_s17 }
   0x7   :  { %s84_s29 = sshll.u32 %s5484_s28, 4  ;;  %s67_s19 = sshll.u32 %s7381_s9, 4  ;;  %s85_s29 = int_to_ptr.vmem [resolvable:$true] %s84_s29  ;;  %s68_s19 = int_to_ptr.hbm [resolvable:$true] %s67_s19 }
   0x8   :  { %90 = dma.hbm_to_vmem [thread:$0]  %s83_s25, 1024, %s85_s29, [#allocation8], %s5482_s26, %s5482_s26, %s5483_s27  }
   0x9   :  { %s5485_s21 = smov [#allocation2]   ;;  %s5486_s11 = smov [#allocation6]  }
   0xa   :  { %s39_s23 = sshll.u32 %s5485_s21, 4  ;;  %s69_s20 = sshll.u32 %s5486_s11, 4  ;;  %s40_s23 = int_to_ptr.vmem [resolvable:$true] %s39_s23  ;;  %s70_s20 = int_to_ptr.vmem [resolvable:$true] %s69_s20 }
   0xb   :  { %45 = dma.hbm_to_vmem [thread:$0]  %s38_s17, 1024, %s40_s23, [#allocation3], %s5482_s26, %s5482_s26, %s5483_s27  }
   0xc   :  { %s97_s28 = sshll.u32 %s7385_s13, 4  ;;  %s5487_s5 = smov [#allocation9]   ;;  %s98_s28 = int_to_ptr.hbm [resolvable:$true] %s97_s28 }
   0xd   :  { %75 = dma.hbm_to_vmem [thread:$0]  %s68_s19, 1024, %s70_s20, [#allocation5], %s5482_s26, %s5482_s26, %s5483_s27  }
   0xe   :  { %s99_s25 = sshll.u32 %s5487_s5, 4  ;;  %s100_s25 = int_to_ptr.vmem [resolvable:$true] %s99_s25 }
   0xf   :  { %105 = dma.hbm_to_vmem [thread:$0]  %s98_s28, 1024, %s100_s25, [#allocation8], %s5482_s26, %s5482_s26, %s5483_s27  }
  0x10   :  { %5475 = dma.done.wait [#allocation3], 1024  }
  0x11   :  { %5476 = vsyncadd [#allocation3], 4294966272 }
  0x12   :  { %5477 = dma.done.wait [#allocation5], 2048  }
  0x13   :  { %5478 = vsyncadd [#allocation5], 4294965248 }
  0x14   :  { %5479 = dma.done.wait [#allocation8], 2048  }
  0x15   :  { %5480 = vsyncadd [#allocation8], 4294965248  ;;  %v4472_v0 = vld [vmem:[%s7373_s1 + $0x38] sm:$0xff]  ;;  %v4471_v1 = vld [vmem:[%s7373_s1 + $0x30] sm:$0xff]  ;;  %vm180_vm0 = vcmask 261120  }
  0x16   :  { %678 = vmatpush.bf16.msra.mxu0 %v4472_v0  ;;  %4585 = vmatpush.bf16.msra.mxu3 %v4472_v0  ;;  %v4522_v2 = vld [vmem:[%s7372_s0] sm:$0xff]   ;;  %v4573_v5 = vld [vmem:[%s7372_s0 + $0x8] sm:$0xff]   ;;  %v4582_v6 = vld [vmem:[%s7372_s0 + $0x50] sm:$0xff]  }
  0x17   :  { %v4523_v3 = vunpack.c.l.bf16 %v4522_v2  ;;  %v4524_v4 = vunpack.c.h.bf16 %v4522_v2  ;;  %v4574_v7 = vld [vmem:[%s7372_s0 + $0x10] sm:$0xff]   ;;  %v4527_v8 = vunpack.c.l.bf16 %v4573_v5  ;;  %v4528_v9 = vunpack.c.h.bf16 %v4573_v5  ;;  %v4470_v14 = vld [vmem:[%s7373_s1 + $0x28] sm:$0xff]  ;;  %v4469_v22 = vld [vmem:[%s7373_s1 + $0x20] sm:$0xff] }
  0x18   :  { %v4563_v10 = vunpack.c.l.bf16 %v4582_v6  ;;  %v4564_v11 = vunpack.c.h.bf16 %v4582_v6  ;;  %v4531_v17 = vunpack.c.l.bf16 %v4574_v7  ;;  %v4532_v25 = vunpack.c.h.bf16 %v4574_v7  ;;  %v4583_v29 = vld [vmem:[%s7372_s0 + $0x58] sm:$0xff]   ;;  %v4467_v51 = vld [vmem:[%s7373_s1 + $0x10] sm:$0xff]  ;;  %v4466_v5 = vld [vmem:[%s7373_s1 + $0x8] sm:$0xff] }
  0x19   :  { %v5602_v12 = vsel %vm180_vm0, %v4523_v3, 0.0  ;;  %v5605_v13 = vsel %vm180_vm0, %v4524_v4, 0.0  ;;  %v5613_v18 = vsel %vm180_vm0, %v4527_v8, 0.0  ;;  %v5616_v19 = vsel %vm180_vm0, %v4528_v9, 0.0  ;;  %v4468_v43 = vld [vmem:[%s7373_s1 + $0x18] sm:$0xff] }
  0x1a   :  { %679 = vmatpush.bf16.msra.mxu0 %v4471_v1  ;;  %4586 = vmatpush.bf16.msra.mxu3 %v4471_v1  ;;  %v233_v15 = vand.u32 2147483647, %v5602_v12  ;;  %v234_v16 = vand.u32 2147483647, %v5605_v13  ;;  %v5619_v20 = vsel %vm180_vm0, %v4563_v10, 0.0  ;;  %v5622_v21 = vsel %vm180_vm0, %v4564_v11, 0.0 }
  0x1b   :  { %v235_v26 = vand.u32 2147483647, %v5613_v18  ;;  %v236_v27 = vand.u32 2147483647, %v5616_v19  ;;  %v253_v28 = vand.u32 2147483647, %v5619_v20  ;;  %v4567_v45 = vunpack.c.l.bf16 %v4583_v29 }
  0x1c   :  { %v259_v23 = vsub.f32 0.0, %v233_v15  ;;  %v260_v24 = vsub.f32 0.0, %v234_v16  ;;  %v254_v32 = vand.u32 2147483647, %v5622_v21  ;;  %v5635_v36 = vsel %vm180_vm0, %v4531_v17, 0.0 }
  0x1d   :  { %v261_v33 = vsub.f32 0.0, %v235_v26  ;;  %v262_v34 = vsub.f32 0.0, %v236_v27  ;;  %v279_v35 = vsub.f32 0.0, %v253_v28  ;;  %v5638_v38 = vsel %vm180_vm0, %v4532_v25, 0.0  ;;  %v4465_v26 = vld [vmem:[%s7373_s1] sm:$0xff] }
  0x1e   :  { %680 = vmatpush.bf16.msra.mxu0 %v4470_v14  ;;  %4587 = vmatpush.bf16.msra.mxu3 %v4470_v14  ;;  %v285_v30 = vmul.f32 1.442695, %v259_v23  ;;  %v287_v31 = vmul.f32 1.442695, %v260_v24  ;;  %v280_v37 = vsub.f32 0.0, %v254_v32  ;;  %v4568_v46 = vunpack.c.h.bf16 %v4583_v29 }
  0x1f   :  { %v237_v39 = vand.u32 2147483647, %v5635_v36  ;;  %v289_v40 = vmul.f32 1.442695, %v261_v33  ;;  %v291_v41 = vmul.f32 1.442695, %v262_v34 }
  0x20   :  { %4623 = vpow2.f32 %v285_v30  ;;  %v325_v42 = vmul.f32 1.442695, %v279_v35  ;;  %v327_v44 = vmul.f32 1.442695, %v280_v37  ;;  %v238_v47 = vand.u32 2147483647, %v5638_v38 }
  0x21   :  { %4625 = vpow2.f32 %v287_v31  ;;  %v263_v48 = vsub.f32 0.0, %v237_v39  ;;  %v207_v49 = vmax.f32 %v5602_v12, 0.0  ;;  %v208_v52 = vmax.f32 %v5605_v13, 0.0 }
  0x22   :  { %681 = vmatpush.bf16.msra.mxu0 %v4469_v22  ;;  %4588 = vmatpush.bf16.msra.mxu3 %v4469_v22  ;;  %4627 = vpow2.f32 %v289_v40  ;;  %v5651_v53 = vsel %vm180_vm0, %v4567_v45, 0.0  ;;  %v5654_v54 = vsel %vm180_vm0, %v4568_v46, 0.0  ;;  %v264_v58 = vsub.f32 0.0, %v238_v47 }
  0x23   :  { %4629 = vpow2.f32 %v291_v41  ;;  %v293_v59 = vmul.f32 1.442695, %v263_v48  ;;  %v209_v63 = vmax.f32 %v5613_v18, 0.0  ;;  %v255_v2 = vand.u32 2147483647, %v5651_v53 }
  0x24   :  { %4631 = vpow2.f32 %v325_v42  ;;  %v256_v3 = vand.u32 2147483647, %v5654_v54  ;;  %v295_v14 = vmul.f32 1.442695, %v264_v58 }
  0x25   :  { %4633 = vpow2.f32 %v327_v44  ;;  %v281_v41 = vsub.f32 0.0, %v255_v2  ;;  %v227_v2 = vmax.f32 %v5619_v20, 0.0 }
  0x26   :  { %v4624_v50 = vpop.eup %4623  ;;  %682 = vmatpush.bf16.msra.mxu0 %v4468_v43  ;;  %4589 = vmatpush.bf16.msra.mxu3 %v4468_v43 }
  0x27   :  { %v4626_v55 = vpop.eup %4625  ;;  %v337_v56 = vadd.f32 1.0, %v4624_v50  ;;  %v340_v57 = vmul.f32 -0.5, %v4624_v50  ;;  %v343_v60 = vand.u32 2147483647, %v4624_v50  ;;  %v329_v23 = vmul.f32 1.442695, %v281_v41 }
  0x28   :  { %v346_v61 = vadd.f32 1.0, %v4626_v55  ;;  %v349_v62 = vmul.f32 -0.5, %v4626_v55  ;;  %v4628_v0 = vpop.eup %4627  ;;  %v352_v1 = vand.u32 2147483647, %v4626_v55 }
  0x29   :  { %4635 = vlog2.f32 %v337_v56  ;;  %v4630_v4 = vpop.eup %4629  ;;  %v341_v6 = vadd.f32 1.0, %v340_v57  ;;  %v355_v8 = vadd.f32 1.0, %v4628_v0  ;;  %v358_v10 = vmul.f32 -0.5, %v4628_v0 }
  0x2a   :  { %683 = vmatpush.bf16.msra.mxu0 %v4467_v51  ;;  %4637 = vlog2.f32 %v346_v61  ;;  %v350_v7 = vadd.f32 1.0, %v349_v62  ;;  %4590 = vmatpush.bf16.msra.mxu3 %v4467_v51  ;;  %v4632_v9 = vpop.eup %4631  ;;  %v364_v11 = vadd.f32 1.0, %v4630_v4  ;;  %vm5662_vm1 = vcmp.lt.f32.partialorder %v343_v60, 0.0004427343 }
  0x2b   :  { %4639 = vpow2.f32 %v293_v59  ;;  %v4634_v15 = vpop.eup %4633  ;;  %v361_v17 = vand.u32 2147483647, %v4628_v0  ;;  %v367_v22 = vmul.f32 -0.5, %v4630_v4  ;;  %vm5666_vm2 = vcmp.lt.f32.partialorder %v352_v1, 0.0004427343 }
  0x2c   :  { %4641 = vlog2.f32 %v355_v8  ;;  %v359_v24 = vadd.f32 1.0, %v358_v10  ;;  %v517_v25 = vadd.f32 1.0, %v4632_v9  ;;  %v342_v27 = vmul.f32 %v4624_v50, %v341_v6 }
  0x2d   :  { %4643 = vlog2.f32 %v364_v11  ;;  %v351_v28 = vmul.f32 %v4626_v55, %v350_v7  ;;  %v368_v29 = vadd.f32 1.0, %v367_v22  ;;  %v520_v30 = vmul.f32 -0.5, %v4632_v9 }
  0x2e   :  { %684 = vmatpush.bf16.msra.mxu0 %v4466_v5  ;;  %4591 = vmatpush.bf16.msra.mxu3 %v4466_v5  ;;  %v370_v32 = vand.u32 2147483647, %v4630_v4  ;;  %4645 = vlog2.f32 %v517_v25  ;;  %v526_v33 = vadd.f32 1.0, %v4634_v15  ;;  %v529_v34 = vmul.f32 -0.5, %v4634_v15 }
  0x2f   :  { %v4636_v31 = vpop.eup %4635  ;;  %vm5673_vm3 = vcmp.lt.f32.partialorder %v361_v17, 0.0004427343  ;;  %v521_v40 = vadd.f32 1.0, %v520_v30  ;;  %v360_v44 = vmul.f32 %v4628_v0, %v359_v24  ;;  %v523_v45 = vand.u32 2147483647, %v4632_v9 }
  0x30   :  { %v4638_v35 = vpop.eup %4637  ;;  %v339_v37 = vmul.f32 0.6931472, %v4636_v31  ;;  %4647 = vlog2.f32 %v526_v33  ;;  %v369_v48 = vmul.f32 %v4630_v4, %v368_v29  ;;  %v530_v50 = vadd.f32 1.0, %v529_v34  ;;  %v4584_v29 = vld [vmem:[%s7372_s0 + $0x60] sm:$0xff]  }
  0x31   :  { %v5677_v42 = vpop.eup %4639  ;;  %v348_v43 = vmul.f32 0.6931472, %v4638_v35  ;;  %4649 = vpow2.f32 %v295_v14  ;;  %v532_v58 = vand.u32 2147483647, %v4634_v15  ;;  %vm5687_vm4 = vcmp.lt.f32.partialorder %v370_v32, 0.0004427343 }
  0x32   :  { %v4642_v46 = vpop.eup %4641  ;;  %685 = vmatpush.bf16.msra.mxu0 %v4465_v26  ;;  %v345_v47 = vsel %vm5662_vm1, %v342_v27, %v339_v37  ;;  %4592 = vmatpush.bf16.msra.mxu3 %v4465_v26  ;;  %v522_v62 = vmul.f32 %v4632_v9, %v521_v40  ;;  %v210_v1 = vmax.f32 %v5616_v19, 0.0  ;;  %vm5693_vm5 = vcmp.lt.f32.partialorder %v523_v45, 0.0004427343  ;;  %v4575_v26 = vld [vmem:[%s7372_s0 + $0x18] sm:$0xff]  }
  0x33   :  { %v4644_v51 = vpop.eup %4643  ;;  %v354_v55 = vsel %vm5666_vm2, %v351_v28, %v348_v43  ;;  %v571_v56 = vadd.f32 %v345_v47, %v207_v49  ;;  %v357_v57 = vmul.f32 0.6931472, %v4642_v46  ;;  %v373_v49 = vadd.f32 1.0, %v5677_v42 }
  0x34   :  { %v572_v59 = vadd.f32 %v354_v55, %v208_v52  ;;  %v366_v60 = vmul.f32 0.6931472, %v4644_v51  ;;  %v4646_v0 = vpop.eup %4645  ;;  %v228_v52 = vmax.f32 %v5622_v21, 0.0  ;;  %v531_v7 = vmul.f32 %v4634_v15, %v530_v50 }
  0x35   :  { %v519_v6 = vmul.f32 0.6931472, %v4646_v0  ;;  %v363_v9 = vsel %vm5673_vm3, %v360_v44, %v357_v57  ;;  %vm5703_vm6 = vcmp.lt.f32.partialorder %v532_v58, 0.0004427343  ;;  %v376_v14 = vmul.f32 -0.5, %v5677_v42 }
  0x36   :  { %v597_v5 = vpack.c.bf16 %v572_v59, %v571_v56  ;;  %v4648_v8 = vpop.eup %4647  ;;  %v372_v10 = vsel %vm5687_vm4, %v369_v48, %v366_v60  ;;  %v282_v22 = vsub.f32 0.0, %v256_v3  ;;  %4651 = vlog2.f32 %v373_v49  ;;  %v4576_v48 = vld [vmem:[%s7372_s0 + $0x20] sm:$0xff]  }
  0x37   :  { %v5708_v16 = vpop.eup %4649  ;;  %v525_v17 = vsel %vm5693_vm5, %v522_v62, %v519_v6  ;;  %v528_v15 = vmul.f32 0.6931472, %v4648_v8  ;;  %v379_v28 = vand.u32 2147483647, %v5677_v42  ;;  %4653 = vpow2.f32 %v329_v23 }
  0x38   :  { %686 = vmatmul.bf16.vlgmr.msra.gmra.mxu0 %v597_v5  ;;  %v591_v24 = vadd.f32 %v525_v17, %v227_v2  ;;  %v382_v25 = vadd.f32 1.0, %v5708_v16  ;;  %v573_v3 = vadd.f32 %v363_v9, %v209_v63  ;;  %v574_v30 = vadd.f32 %v372_v10, %v210_v1 }
  0x39   :  { %v534_v27 = vsel %vm5703_vm6, %v531_v7, %v528_v15  ;;  %v331_v32 = vmul.f32 1.442695, %v282_v22  ;;  %v377_v33 = vadd.f32 1.0, %v376_v14  ;;  %v4535_v34 = vunpack.c.l.bf16 %v4575_v26 }
  0x3a   :  { %v592_v31 = vadd.f32 %v534_v27, %v228_v52  ;;  %4655 = vlog2.f32 %v382_v25  ;;  %v4536_v35 = vunpack.c.h.bf16 %v4575_v26  ;;  %v4571_v39 = vunpack.c.l.bf16 %v4584_v29 }
  0x3b   :  { %4657 = vpow2.f32 %v331_v32  ;;  %v211_v40 = vmax.f32 %v5635_v36, 0.0  ;;  %v385_v41 = vmul.f32 -0.5, %v5708_v16  ;;  %v5729_v43 = vsel %vm180_vm0, %v4535_v34, 0.0 }
  0x3c   :  { %v607_v37 = vpack.c.bf16 %v592_v31, %v591_v24  ;;  %v5732_v44 = vsel %vm180_vm0, %v4536_v35, 0.0  ;;  %v4652_v63 = vpop.eup %4651  ;;  %v212_v45 = vmax.f32 %v5638_v38, 0.0  ;;  %v239_v46 = vand.u32 2147483647, %v5729_v43 }
  0x3d   :  { %v240_v47 = vand.u32 2147483647, %v5732_v44  ;;  %v4654_v50 = vpop.eup %4653  ;;  %v598_v51 = vpack.c.bf16 %v574_v30, %v573_v3  ;;  %v378_v55 = vmul.f32 %v5677_v42, %v377_v33  ;;  %vm5741_vm7 = vcmp.lt.f32.partialorder %v379_v28, 0.0004427343 }
  0x3e   :  { %736 = vmatmul.bf16.vlgmr.msra.gmra.mxu3 %v607_v37  ;;  %v4572_v57 = vunpack.c.h.bf16 %v4584_v29  ;;  %v535_v58 = vadd.f32 1.0, %v4654_v50  ;;  %v538_v59 = vmul.f32 -0.5, %v4654_v50  ;;  %v265_v60 = vsub.f32 0.0, %v239_v46 }
  0x3f   :  { %v5746_v61 = vsel %vm180_vm0, %v4571_v39, 0.0  ;;  %v386_v0 = vadd.f32 1.0, %v385_v41  ;;  %v388_v1 = vand.u32 2147483647, %v5708_v16  ;;  %v266_v2 = vsub.f32 0.0, %v240_v47 }
  0x40   :  { %v4656_v62 = vpop.eup %4655  ;;  %v4539_v4 = vunpack.c.l.bf16 %v4576_v48  ;;  %4659 = vlog2.f32 %v535_v58  ;;  %v297_v42 = vmul.f32 1.442695, %v265_v60  ;;  %v5750_v5 = vsel %vm180_vm0, %v4572_v57, 0.0  ;;  %v4577_v57 = vld [vmem:[%s7372_s0 + $0x28] sm:$0xff]  }
  0x41   :  { %v4658_v49 = vpop.eup %4657  ;;  %v4540_v52 = vunpack.c.h.bf16 %v4576_v48  ;;  %v539_v6 = vadd.f32 1.0, %v538_v59  ;;  %v257_v9 = vand.u32 2147483647, %v5746_v61  ;;  %v375_v10 = vmul.f32 0.6931472, %v4652_v63 }
  0x42   :  { %v544_v7 = vadd.f32 1.0, %v4658_v49  ;;  %v547_v8 = vmul.f32 -0.5, %v4658_v49  ;;  %v541_v11 = vand.u32 2147483647, %v4654_v50  ;;  %4661 = vpow2.f32 %v297_v42 }
  0x43   :  { %v299_v14 = vmul.f32 1.442695, %v266_v2  ;;  %v384_v17 = vmul.f32 0.6931472, %v4656_v62  ;;  %v387_v15 = vmul.f32 %v5708_v16, %v386_v0  ;;  %vm5754_vm8 = vcmp.lt.f32.partialorder %v388_v1, 0.0004427343 }
  0x44   :  { %4663 = vlog2.f32 %v544_v7  ;;  %v548_v23 = vadd.f32 1.0, %v547_v8  ;;  %v550_v24 = vand.u32 2147483647, %v4658_v49  ;;  %v258_v25 = vand.u32 2147483647, %v5750_v5 }
  0x45   :  { %4665 = vpow2.f32 %v299_v14  ;;  %v540_v26 = vmul.f32 %v4654_v50, %v539_v6  ;;  %v283_v27 = vsub.f32 0.0, %v257_v9  ;;  %v5760_v28 = vsel %vm180_vm0, %v4539_v4, 0.0 }
  0x46   :  { %v5763_v29 = vsel %vm180_vm0, %v4540_v52, 0.0  ;;  %v4660_v16 = vpop.eup %4659  ;;  %v229_v3 = vmax.f32 %v5651_v53, 0.0  ;;  %vm5766_vm9 = vcmp.lt.f32.partialorder %v541_v11, 0.0004427343  ;;  %v284_v31 = vsub.f32 0.0, %v258_v25 }
  0x47   :  { %v241_v32 = vand.u32 2147483647, %v5760_v28  ;;  %v381_v33 = vsel %vm5741_vm7, %v378_v55, %v375_v10  ;;  %v537_v34 = vmul.f32 0.6931472, %v4660_v16  ;;  %v333_v35 = vmul.f32 1.442695, %v283_v27 }
  0x48   :  { %691 = vmatmul.bf16.gmra.mxu0 %v598_v51  ;;  %v242_v37 = vand.u32 2147483647, %v5763_v29  ;;  %v4662_v39 = vpop.eup %4661  ;;  %v390_v41 = vsel %vm5754_vm8, %v387_v15, %v384_v17  ;;  %v230_v63 = vmax.f32 %v5654_v54, 0.0  ;;  %v549_v46 = vmul.f32 %v4658_v49, %v548_v23 }
  0x49   :  { %v335_v47 = vmul.f32 1.442695, %v284_v31  ;;  %v543_v50 = vsel %vm5766_vm9, %v540_v26, %v537_v34  ;;  %vm5779_vm10 = vcmp.lt.f32.partialorder %v550_v24, 0.0004427343  ;;  %v391_v55 = vadd.f32 1.0, %v4662_v39 }
  0x4a   :  { %v4664_v48 = vpop.eup %4663  ;;  %v267_v56 = vsub.f32 0.0, %v241_v32  ;;  %v575_v59 = vadd.f32 %v381_v33, %v211_v40  ;;  %4667 = vpow2.f32 %v333_v35  ;;  %v268_v62 = vsub.f32 0.0, %v242_v37 }
  0x4b   :  { %v4666_v58 = vpop.eup %4665  ;;  %v546_v60 = vmul.f32 0.6931472, %v4664_v48  ;;  %v593_v0 = vadd.f32 %v543_v50, %v229_v3  ;;  %4669 = vlog2.f32 %v391_v55  ;;  %v394_v1 = vmul.f32 -0.5, %v4662_v39 }
  0x4c   :  { %v400_v2 = vadd.f32 1.0, %v4666_v58  ;;  %v576_v4 = vadd.f32 %v390_v41, %v212_v45  ;;  %4671 = vpow2.f32 %v335_v47  ;;  %v4543_v42 = vunpack.c.l.bf16 %v4577_v57 }
  0x4d   :  { %v552_v49 = vsel %vm5779_vm10, %v549_v46, %v546_v60  ;;  %v301_v6 = vmul.f32 1.442695, %v267_v56  ;;  %v4544_v7 = vunpack.c.h.bf16 %v4577_v57  ;;  %v403_v40 = vmul.f32 -0.5, %v4666_v58 }
  0x4e   :  { %v594_v52 = vadd.f32 %v552_v49, %v230_v63  ;;  %4673 = vlog2.f32 %v400_v2  ;;  %v303_v8 = vmul.f32 1.442695, %v268_v62  ;;  %v395_v10 = vadd.f32 1.0, %v394_v1  ;;  %v4578_v49 = vld [vmem:[%s7372_s0 + $0x30] sm:$0xff]  }
  0x4f   :  { %4675 = vpow2.f32 %v301_v6  ;;  %v599_v14 = vpack.c.bf16 %v576_v4, %v575_v59  ;;  %v5793_v17 = vsel %vm180_vm0, %v4543_v42, 0.0  ;;  %v397_v15 = vand.u32 2147483647, %v4662_v39 }
  0x50   :  { %v608_v9 = vpack.c.bf16 %v594_v52, %v593_v0  ;;  %v4668_v11 = vpop.eup %4667  ;;  %4677 = vpow2.f32 %v303_v8  ;;  %v5796_v24 = vsel %vm180_vm0, %v4544_v7, 0.0  ;;  %v404_v26 = vadd.f32 1.0, %v403_v40 }
  0x51   :  { %v4670_v45 = vpop.eup %4669  ;;  %v553_v22 = vadd.f32 1.0, %v4668_v11  ;;  %v556_v23 = vmul.f32 -0.5, %v4668_v11  ;;  %v406_v27 = vand.u32 2147483647, %v4666_v58  ;;  %v396_v3 = vmul.f32 %v4662_v39, %v395_v10 }
  0x52   :  { %741 = vmatmul.bf16.gmra.mxu3 %v608_v9  ;;  %v4672_v25 = vpop.eup %4671  ;;  %v243_v31 = vand.u32 2147483647, %v5793_v17  ;;  %v393_v32 = vmul.f32 0.6931472, %v4670_v45  ;;  %v244_v35 = vand.u32 2147483647, %v5796_v24  ;;  %v405_v48 = vmul.f32 %v4666_v58, %v404_v26 }
  0x53   :  { %4679 = vlog2.f32 %v553_v22  ;;  %v562_v30 = vadd.f32 1.0, %v4672_v25  ;;  %v557_v33 = vadd.f32 1.0, %v556_v23  ;;  %v565_v34 = vmul.f32 -0.5, %v4672_v25 }
  0x54   :  { %v4674_v16 = vpop.eup %4673  ;;  %vm5802_vm11 = vcmp.lt.f32.partialorder %v397_v15, 0.0004427343  ;;  %v559_v63 = vand.u32 2147483647, %v4668_v11  ;;  %v213_v39 = vmax.f32 %v5729_v43, 0.0  ;;  %v269_v57 = vsub.f32 0.0, %v243_v31 }
  0x55   :  { %v5800_v37 = vpop.eup %4675  ;;  %4681 = vlog2.f32 %v562_v30  ;;  %v402_v47 = vmul.f32 0.6931472, %v4674_v16  ;;  %v566_v50 = vadd.f32 1.0, %v565_v34  ;;  %vm5807_vm12 = vcmp.lt.f32.partialorder %v406_v27, 0.0004427343 }
  0x56   :  { %v4678_v46 = vpop.eup %4677  ;;  %v568_v55 = vand.u32 2147483647, %v4672_v25  ;;  %v409_v56 = vadd.f32 1.0, %v5800_v37  ;;  %v399_v59 = vsel %vm5802_vm11, %v396_v3, %v393_v32  ;;  %v558_v60 = vmul.f32 %v4668_v11, %v557_v33 }
  0x57   :  { %v270_v62 = vsub.f32 0.0, %v244_v35  ;;  %v214_v1 = vmax.f32 %v5732_v44, 0.0  ;;  %v231_v2 = vmax.f32 %v5746_v61, 0.0  ;;  %vm5816_vm13 = vcmp.lt.f32.partialorder %v559_v63, 0.0004427343 }
  0x58   :  { %696 = vmatmul.bf16.gmra.mxu0 %v599_v14  ;;  %v418_v4 = vadd.f32 1.0, %v4678_v46  ;;  %v408_v42 = vsel %vm5807_vm12, %v405_v48, %v402_v47  ;;  %v232_v52 = vmax.f32 %v5750_v5, 0.0  ;;  %v567_v7 = vmul.f32 %v4672_v25, %v566_v50 }
  0x59   :  { %v4680_v0 = vpop.eup %4679  ;;  %v577_v8 = vadd.f32 %v399_v59, %v213_v39  ;;  %vm569_vm14 = vcmp.lt.f32.partialorder %v568_v55, 0.0004427343  ;;  %4683 = vlog2.f32 %v409_v56  ;;  %v305_v9 = vmul.f32 1.442695, %v269_v57 }
  0x5a   :  { %v555_v6 = vmul.f32 0.6931472, %v4680_v0  ;;  %v307_v14 = vmul.f32 1.442695, %v270_v62  ;;  %v4547_v45 = vunpack.c.l.bf16 %v4578_v49  ;;  %v578_v15 = vadd.f32 %v408_v42, %v214_v1 }
  0x5b   :  { %v4682_v40 = vpop.eup %4681  ;;  %4685 = vlog2.f32 %v418_v4  ;;  %v4548_v23 = vunpack.c.h.bf16 %v4578_v49  ;;  %v412_v27 = vmul.f32 -0.5, %v5800_v37  ;;  %v421_v16 = vmul.f32 -0.5, %v4678_v46  ;;  %v4579_v4 = vld [vmem:[%s7372_s0 + $0x38] sm:$0xff]  }
  0x5c   :  { %v561_v10 = vsel %vm5816_vm13, %v558_v60, %v555_v6  ;;  %v564_v11 = vmul.f32 0.6931472, %v4682_v40  ;;  %4687 = vpow2.f32 %v305_v9  ;;  %v5830_v3 = vsel %vm180_vm0, %v4547_v45, 0.0 }
  0x5d   :  { %v595_v22 = vadd.f32 %v561_v10, %v231_v2  ;;  %4689 = vpow2.f32 %v307_v14  ;;  %v600_v31 = vpack.c.bf16 %v578_v15, %v577_v8  ;;  %v5833_v33 = vsel %vm180_vm0, %v4548_v23, 0.0 }
  0x5e   :  { %v570_v26 = vsel %vm569_vm14, %v567_v7, %v564_v11  ;;  %v413_v34 = vadd.f32 1.0, %v412_v27  ;;  %v422_v35 = vadd.f32 1.0, %v421_v16  ;;  %v415_v63 = vand.u32 2147483647, %v5800_v37 }
  0x5f   :  { %v596_v25 = vadd.f32 %v570_v26, %v232_v52  ;;  %v4684_v30 = vpop.eup %4683  ;;  %v424_v39 = vand.u32 2147483647, %v4678_v46  ;;  %v245_v47 = vand.u32 2147483647, %v5830_v3  ;;  %v246_v48 = vand.u32 2147483647, %v5833_v33 }
  0x60   :  { %v411_v55 = vmul.f32 0.6931472, %v4684_v30  ;;  %v414_v56 = vmul.f32 %v5800_v37, %v413_v34  ;;  %v423_v59 = vmul.f32 %v4678_v46, %v422_v35  ;;  %vm416_vm15 = vcmp.lt.f32.partialorder %v415_v63, 0.0004427343 }
  0x61   :  { %v609_v32 = vpack.c.bf16 %v596_v25, %v595_v22  ;;  %v4686_v41 = vpop.eup %4685  ;;  %vm425_vm1 = vcmp.lt.f32.partialorder %v424_v39, 0.0004427343  ;;  %v271_v60 = vsub.f32 0.0, %v245_v47  ;;  %v272_v0 = vsub.f32 0.0, %v246_v48 }
  0x62   :  { %v4688_v50 = vpop.eup %4687  ;;  %v420_v57 = vmul.f32 0.6931472, %v4686_v41  ;;  %v215_v1 = vmax.f32 %v5760_v28, 0.0  ;;  %v216_v2 = vmax.f32 %v5763_v29, 0.0  ;;  %v417_v49 = vsel %vm416_vm15, %v414_v56, %v411_v55 }
  0x63   :  { %746 = vmatmul.bf16.gmra.mxu3 %v609_v32  ;;  %v4690_v51 = vpop.eup %4689  ;;  %v427_v62 = vadd.f32 1.0, %v4688_v50  ;;  %v309_v52 = vmul.f32 1.442695, %v271_v60  ;;  %v311_v37 = vmul.f32 1.442695, %v272_v0  ;;  %v4551_v46 = vunpack.c.l.bf16 %v4579_v4 }
  0x64   :  { %v436_v58 = vadd.f32 1.0, %v4690_v51  ;;  %v426_v42 = vsel %vm425_vm1, %v423_v59, %v420_v57  ;;  %v579_v6 = vadd.f32 %v417_v49, %v215_v1  ;;  %v4552_v40 = vunpack.c.h.bf16 %v4579_v4  ;;  %v4580_v57 = vld [vmem:[%s7372_s0 + $0x40] sm:$0xff]  }
  0x65   :  { %4691 = vlog2.f32 %v427_v62  ;;  %v580_v7 = vadd.f32 %v426_v42, %v216_v2  ;;  %v430_v8 = vmul.f32 -0.5, %v4688_v50  ;;  %v439_v9 = vmul.f32 -0.5, %v4690_v51 }
  0x66   :  { %4693 = vlog2.f32 %v436_v58  ;;  %v5845_v10 = vsel %vm180_vm0, %v4551_v46, 0.0  ;;  %v5848_v14 = vsel %vm180_vm0, %v4552_v40, 0.0  ;;  %v433_v26 = vand.u32 2147483647, %v4688_v50 }
  0x67   :  { %4695 = vpow2.f32 %v309_v52  ;;  %v601_v11 = vpack.c.bf16 %v580_v7, %v579_v6  ;;  %v431_v15 = vadd.f32 1.0, %v430_v8  ;;  %v440_v22 = vadd.f32 1.0, %v439_v9 }
  0x68   :  { %701 = vmatmul.bf16.gmra.mxu0 %v600_v31  ;;  %4697 = vpow2.f32 %v311_v37  ;;  %v442_v27 = vand.u32 2147483647, %v4690_v51  ;;  %v247_v16 = vand.u32 2147483647, %v5845_v10  ;;  %v248_v25 = vand.u32 2147483647, %v5848_v14 }
  0x69   :  { %v432_v34 = vmul.f32 %v4688_v50, %v431_v15  ;;  %v441_v41 = vmul.f32 %v4690_v51, %v440_v22  ;;  %vm434_vm2 = vcmp.lt.f32.partialorder %v433_v26, 0.0004427343  ;;  %v217_v48 = vmax.f32 %v5793_v17, 0.0 }
  0x6a   :  { %vm443_vm3 = vcmp.lt.f32.partialorder %v442_v27, 0.0004427343  ;;  %v273_v63 = vsub.f32 0.0, %v247_v16  ;;  %v274_v47 = vsub.f32 0.0, %v248_v25  ;;  %v218_v55 = vmax.f32 %v5796_v24, 0.0 }
  0x6b   :  { %v4692_v45 = vpop.eup %4691  ;;  %v4555_v51 = vunpack.c.l.bf16 %v4580_v57  ;;  %v4556_v2 = vunpack.c.h.bf16 %v4580_v57 }
  0x6c   :  { %v4694_v23 = vpop.eup %4693  ;;  %v429_v32 = vmul.f32 0.6931472, %v4692_v45  ;;  %v313_v62 = vmul.f32 1.442695, %v273_v63  ;;  %v315_v50 = vmul.f32 1.442695, %v274_v47 }
  0x6d   :  { %v4696_v30 = vpop.eup %4695  ;;  %v438_v35 = vmul.f32 0.6931472, %v4694_v23  ;;  %v5858_v49 = vsel %vm180_vm0, %v4555_v51, 0.0  ;;  %v5861_v52 = vsel %vm180_vm0, %v4556_v2, 0.0  ;;  %v4581_v63 = vld [vmem:[%s7372_s0 + $0x48] sm:$0xff]  }
  0x6e   :  { %v4698_v31 = vpop.eup %4697  ;;  %v445_v39 = vadd.f32 1.0, %v4696_v30  ;;  %v435_v59 = vsel %vm434_vm2, %v432_v34, %v429_v32  ;;  %v448_v58 = vmul.f32 -0.5, %v4696_v30  ;;  %v451_v40 = vand.u32 2147483647, %v4696_v30 }
  0x6f   :  { %v454_v56 = vadd.f32 1.0, %v4698_v31  ;;  %v444_v60 = vsel %vm443_vm3, %v441_v41, %v438_v35  ;;  %v581_v0 = vadd.f32 %v435_v59, %v217_v48  ;;  %v457_v4 = vmul.f32 -0.5, %v4698_v31 }
  0x70   :  { %4699 = vlog2.f32 %v445_v39  ;;  %v582_v1 = vadd.f32 %v444_v60, %v218_v55  ;;  %v449_v46 = vadd.f32 1.0, %v448_v58  ;;  %v460_v8 = vand.u32 2147483647, %v4698_v31 }
  0x71   :  { %4701 = vlog2.f32 %v454_v56  ;;  %v458_v6 = vadd.f32 1.0, %v457_v4  ;;  %v249_v9 = vand.u32 2147483647, %v5858_v49  ;;  %vm452_vm4 = vcmp.lt.f32.partialorder %v451_v40, 0.0004427343 }
  0x72   :  { %4703 = vpow2.f32 %v313_v62  ;;  %v602_v42 = vpack.c.bf16 %v582_v1, %v581_v0  ;;  %v450_v23 = vmul.f32 %v4696_v30, %v449_v46  ;;  %vm461_vm5 = vcmp.lt.f32.partialorder %v460_v8, 0.0004427343 }
  0x73   :  { %4705 = vpow2.f32 %v315_v50  ;;  %v459_v27 = vmul.f32 %v4698_v31, %v458_v6  ;;  %v275_v16 = vsub.f32 0.0, %v249_v9  ;;  %v219_v34 = vmax.f32 %v5830_v3, 0.0 }
  0x74   :  { %v220_v35 = vmax.f32 %v5833_v33, 0.0  ;;  %v4559_v31 = vunpack.c.l.bf16 %v4581_v63  ;;  %v4560_v57 = vunpack.c.h.bf16 %v4581_v63 }
  0x75   :  { %v317_v48 = vmul.f32 1.442695, %v275_v16 }
  0x76   :  { %v4700_v37 = vpop.eup %4699  ;;  %v5871_v62 = vsel %vm180_vm0, %v4559_v31, 0.0  ;;  %v5874_v51 = vsel %vm180_vm0, %v4560_v57, 0.0 }
  0x77   :  { %v4702_v7 = vpop.eup %4701  ;;  %v447_v22 = vmul.f32 0.6931472, %v4700_v37  ;;  %v251_v37 = vand.u32 2147483647, %v5871_v62  ;;  %v252_v46 = vand.u32 2147483647, %v5874_v51 }
  0x78   :  { %706 = vmatmul.bf16.gmra.mxu0 %v601_v11  ;;  %v250_v11 = vand.u32 2147483647, %v5861_v52  ;;  %v4704_v45 = vpop.eup %4703  ;;  %v456_v26 = vmul.f32 0.6931472, %v4702_v7 }
  0x79   :  { %v4706_v15 = vpop.eup %4705  ;;  %v463_v25 = vadd.f32 1.0, %v4704_v45  ;;  %v453_v39 = vsel %vm452_vm4, %v450_v23, %v447_v22  ;;  %v466_v59 = vmul.f32 -0.5, %v4704_v45  ;;  %v469_v4 = vand.u32 2147483647, %v4704_v45  ;;  %v4476_v23 = vld [vmem:[%s7375_s3 + $0x18] sm:$0xff] }
  0x7a   :  { %v276_v32 = vsub.f32 0.0, %v250_v11  ;;  %v472_v41 = vadd.f32 1.0, %v4706_v15  ;;  %v462_v47 = vsel %vm461_vm5, %v459_v27, %v456_v26  ;;  %v583_v55 = vadd.f32 %v453_v39, %v219_v34 }
  0x7b   :  { %4707 = vlog2.f32 %v463_v25  ;;  %v584_v56 = vadd.f32 %v462_v47, %v220_v35  ;;  %v475_v60 = vmul.f32 -0.5, %v4706_v15  ;;  %v467_v1 = vadd.f32 1.0, %v466_v59 }
  0x7c   :  { %v319_v30 = vmul.f32 1.442695, %v276_v32  ;;  %4709 = vlog2.f32 %v472_v41  ;;  %vm5878_vm6 = vcmp.lt.f32.partialorder %v469_v4, 0.0004427343  ;;  %v277_v26 = vsub.f32 0.0, %v251_v37 }
  0x7d   :  { %4711 = vpow2.f32 %v317_v48  ;;  %v603_v50 = vpack.c.bf16 %v584_v56, %v583_v55  ;;  %v476_v2 = vadd.f32 1.0, %v475_v60  ;;  %v468_v8 = vmul.f32 %v4704_v45, %v467_v1  ;;  %v4480_v45 = vld [vmem:[%s7375_s3 + $0x38] sm:$0xff]  ;;  %v4479_v48 = vld [vmem:[%s7375_s3 + $0x30] sm:$0xff]  ;;  %v4478_v56 = vld [vmem:[%s7375_s3 + $0x28] sm:$0xff] }
  0x7e   :  { %4713 = vpow2.f32 %v319_v30  ;;  %v278_v16 = vsub.f32 0.0, %v252_v46  ;;  %v221_v25 = vmax.f32 %v5845_v10, 0.0  ;;  %v222_v32 = vmax.f32 %v5848_v14, 0.0  ;;  %1223 = vmatpush.bf16.msra.mxu1 %v4480_v45  ;;  %4593 = vmatpush.bf16.msrb.mxu3 %v4480_v45 }
  0x7f   :  { %v477_v11 = vmul.f32 %v4706_v15, %v476_v2  ;;  %v321_v41 = vmul.f32 1.442695, %v277_v26 }
  0x80   :  { %v323_v63 = vmul.f32 1.442695, %v278_v16  ;;  %v4475_v16 = vld [vmem:[%s7375_s3 + $0x10] sm:$0xff] }
  0x81   :  { %v4708_v0 = vpop.eup %4707 }
  0x82   :  { %v4710_v58 = vpop.eup %4709  ;;  %v465_v40 = vmul.f32 0.6931472, %v4708_v0  ;;  %1224 = vmatpush.bf16.msra.mxu1 %v4479_v48  ;;  %4594 = vmatpush.bf16.msrb.mxu3 %v4479_v48 }
  0x83   :  { %v4712_v6 = vpop.eup %4711  ;;  %v474_v9 = vmul.f32 0.6931472, %v4710_v58  ;;  %v4477_v58 = vld [vmem:[%s7375_s3 + $0x20] sm:$0xff] }
  0x84   :  { %v4714_v7 = vpop.eup %4713  ;;  %v481_v27 = vadd.f32 1.0, %v4712_v6  ;;  %v484_v30 = vmul.f32 -0.5, %v4712_v6  ;;  %v487_v0 = vand.u32 2147483647, %v4712_v6 }
  0x85   :  { %v490_v34 = vadd.f32 1.0, %v4714_v7  ;;  %v493_v31 = vmul.f32 -0.5, %v4714_v7  ;;  %v496_v1 = vand.u32 2147483647, %v4714_v7 }
  0x86   :  { %4715 = vlog2.f32 %v481_v27  ;;  %v485_v59 = vadd.f32 1.0, %v484_v30  ;;  %1225 = vmatpush.bf16.msra.mxu1 %v4478_v56  ;;  %4595 = vmatpush.bf16.msrb.mxu3 %v4478_v56  ;;  %vm488_vm7 = vcmp.lt.f32.partialorder %v487_v0, 0.0004427343  ;;  %v4473_v56 = vld [vmem:[%s7375_s3] sm:$0xff] }
  0x87   :  { %4717 = vlog2.f32 %v490_v34  ;;  %v494_v60 = vadd.f32 1.0, %v493_v31  ;;  %vm497_vm8 = vcmp.lt.f32.partialorder %v496_v1, 0.0004427343  ;;  %v5915_v34 = vld [vmem:[%s7374_s2] ss:$0 sm:$0xff] }
  0x88   :  { %711 = vmatmul.bf16.gmra.mxu0 %v602_v42  ;;  %v478_v42 = vand.u32 2147483647, %v4706_v15  ;;  %v471_v15 = vsel %vm5878_vm6, %v468_v8, %v465_v40  ;;  %4719 = vpow2.f32 %v321_v41  ;;  %v486_v37 = vmul.f32 %v4712_v6, %v485_v59 }
  0x89   :  { %v585_v39 = vadd.f32 %v471_v15, %v221_v25  ;;  %4721 = vpow2.f32 %v323_v63  ;;  %v495_v40 = vmul.f32 %v4714_v7, %v494_v60  ;;  %v4474_v15 = vld [vmem:[%s7375_s3 + $0x8] sm:$0xff] }
  0x8a   :  { %vm5882_vm0 = vcmp.lt.f32.partialorder %v478_v42, 0.0004427343  ;;  %1226 = vmatpush.bf16.msra.mxu1 %v4477_v58  ;;  %4596 = vmatpush.bf16.msrb.mxu3 %v4477_v58  ;;  %v225_v58 = vmax.f32 %v5871_v62, 0.0 }
  0x8b   :  { %v480_v35 = vsel %vm5882_vm0, %v477_v11, %v474_v9  ;;  %v223_v9 = vmax.f32 %v5858_v49, 0.0  ;;  %v224_v11 = vmax.f32 %v5861_v52, 0.0 }
  0x8c   :  { %v586_v47 = vadd.f32 %v480_v35, %v222_v32  ;;  %v4716_v57 = vpop.eup %4715 }
  0x8d   :  { %v483_v42 = vmul.f32 0.6931472, %v4716_v57 }
  0x8e   :  { %v604_v55 = vpack.c.bf16 %v586_v47, %v585_v39  ;;  %1227 = vmatpush.bf16.msra.mxu1 %v4476_v23  ;;  %4597 = vmatpush.bf16.msrb.mxu3 %v4476_v23 }
  0x8f   :  { %v489_v26 = vsel %vm488_vm7, %v486_v37, %v483_v42  ;;  %v226_v42 = vmax.f32 %v5874_v51, 0.0 }
  0x90   :  { %v587_v6 = vadd.f32 %v489_v26, %v223_v9 }
  0x92   :  { %1228 = vmatpush.bf16.msra.mxu1 %v4475_v16  ;;  %4598 = vmatpush.bf16.msrb.mxu3 %v4475_v16 }
  0x96   :  { %1229 = vmatpush.bf16.msra.mxu1 %v4474_v15  ;;  %4599 = vmatpush.bf16.msrb.mxu3 %v4474_v15 }
  0x98   :  { %716 = vmatmul.bf16.gmra.mxu0 %v603_v50  ;;  %v4718_v50 = vpop.eup %4717 }
  0x99   :  { %v4720_v2 = vpop.eup %4719  ;;  %v492_v46 = vmul.f32 0.6931472, %v4718_v50 }
  0x9a   :  { %v4722_v4 = vpop.eup %4721  ;;  %v499_v8 = vadd.f32 1.0, %v4720_v2  ;;  %v502_v25 = vmul.f32 -0.5, %v4720_v2  ;;  %v505_v30 = vand.u32 2147483647, %v4720_v2  ;;  %1230 = vmatpush.bf16.msra.mxu1 %v4473_v56  ;;  %4600 = vmatpush.bf16.msrb.mxu3 %v4473_v56 }
  0x9b   :  { %v508_v22 = vadd.f32 1.0, %v4722_v4  ;;  %v498_v27 = vsel %vm497_vm8, %v495_v40, %v492_v46  ;;  %v511_v32 = vmul.f32 -0.5, %v4722_v4  ;;  %v514_v31 = vand.u32 2147483647, %v4722_v4 }
  0x9c   :  { %4723 = vlog2.f32 %v499_v8  ;;  %v588_v7 = vadd.f32 %v498_v27, %v224_v11  ;;  %v503_v63 = vadd.f32 1.0, %v502_v25  ;;  %vm506_vm9 = vcmp.lt.f32.partialorder %v505_v30, 0.0004427343 }
  0x9d   :  { %4725 = vlog2.f32 %v508_v22  ;;  %v512_v39 = vadd.f32 1.0, %v511_v32  ;;  %vm515_vm10 = vcmp.lt.f32.partialorder %v514_v31, 0.0004427343 }
  0x9e   :  { %v605_v45 = vpack.c.bf16 %v588_v7, %v587_v6  ;;  %v504_v59 = vmul.f32 %v4720_v2, %v503_v63 }
  0x9f   :  { %v513_v50 = vmul.f32 %v4722_v4, %v512_v39 }
  0xa2   :  { %v4724_v35 = vpop.eup %4723 }
  0xa3   :  { %v4726_v47 = vpop.eup %4725  ;;  %v501_v57 = vmul.f32 0.6931472, %v4724_v35 }
  0xa4   :  { %v510_v60 = vmul.f32 0.6931472, %v4726_v47 }
  0xa5   :  { %v507_v46 = vsel %vm506_vm9, %v504_v59, %v501_v57 }
  0xa6   :  { %v516_v40 = vsel %vm515_vm10, %v513_v50, %v510_v60  ;;  %v589_v4 = vadd.f32 %v507_v46, %v225_v58 }
  0xa7   :  { %v590_v9 = vadd.f32 %v516_v40, %v226_v42 }
  0xa8   :  { %721 = vmatmul.bf16.gmra.mxu0 %v604_v55 }
  0xa9   :  { %v606_v6 = vpack.c.bf16 %v590_v9, %v589_v4 }
  0xb5   :  { %v687_v41 = vpop.f32.mrf.mxu0 }
  0xb6   :  { %v5921_v48 = vadd.f32 %v5915_v34, %v687_v41 }
  0xb8   :  { %v778_v55 = vand.u32 2147483647, %v5921_v48  ;;  %726 = vmatmul.bf16.gmra.mxu0 %v605_v45 }
  0xba   :  { %v804_v0 = vsub.f32 0.0, %v778_v55 }
  0xbc   :  { %v830_v1 = vmul.f32 1.442695, %v804_v0 }
  0xbd   :  { %v689_v37 = vpop.f32.mrf.mxu0 }
  0xbe   :  { %4727 = vpow2.f32 %v830_v1  ;;  %v5930_v8 = vadd.f32 %v5915_v34, %v689_v37 }
  0xc0   :  { %v779_v2 = vand.u32 2147483647, %v5930_v8 }
  0xc1   :  { %v737_v22 = vpop.f32.mrf.mxu3 }
  0xc2   :  { %v805_v11 = vsub.f32 0.0, %v779_v2  ;;  %v5934_v23 = vadd.f32 %v5915_v34, %v737_v22 }
  0xc4   :  { %v4728_v26 = vpop.eup %4727  ;;  %v832_v27 = vmul.f32 1.442695, %v805_v11  ;;  %v798_v16 = vand.u32 2147483647, %v5934_v23 }
  0xc5   :  { %v692_v7 = vpop.f32.mrf.mxu0  ;;  %v882_v25 = vadd.f32 1.0, %v4728_v26  ;;  %v885_v47 = vmul.f32 -0.5, %v4728_v26  ;;  %v888_v42 = vand.u32 2147483647, %v4728_v26 }
  0xc6   :  { %4729 = vpow2.f32 %v832_v27  ;;  %v5938_v32 = vadd.f32 %v5915_v34, %v692_v7  ;;  %v824_v45 = vsub.f32 0.0, %v798_v16 }
  0xc7   :  { %4731 = vlog2.f32 %v882_v25  ;;  %v886_v1 = vadd.f32 1.0, %v885_v47  ;;  %vm5951_vm11 = vcmp.lt.f32.partialorder %v888_v42, 0.0004427343  ;;  %v752_v47 = vmax.f32 %v5921_v48, 0.0 }
  0xc8   :  { %v780_v15 = vand.u32 2147483647, %v5938_v32  ;;  %731 = vmatmul.bf16.gmra.mxu0 %v606_v6  ;;  %v870_v35 = vmul.f32 1.442695, %v824_v45 }
  0xc9   :  { %v739_v63 = vpop.f32.mrf.mxu3  ;;  %v887_v22 = vmul.f32 %v4728_v26, %v886_v1 }
  0xca   :  { %v806_v41 = vsub.f32 0.0, %v780_v15  ;;  %4733 = vpow2.f32 %v870_v35  ;;  %v5942_v39 = vadd.f32 %v5915_v34, %v739_v63 }
  0xcc   :  { %v4730_v30 = vpop.eup %4729  ;;  %v834_v31 = vmul.f32 1.442695, %v806_v41  ;;  %v799_v56 = vand.u32 2147483647, %v5942_v39 }
  0xcd   :  { %v694_v55 = vpop.f32.mrf.mxu0  ;;  %v891_v57 = vadd.f32 1.0, %v4730_v30  ;;  %v4732_v59 = vpop.eup %4731  ;;  %v894_v50 = vmul.f32 -0.5, %v4730_v30  ;;  %v897_v27 = vand.u32 2147483647, %v4730_v30 }
  0xce   :  { %4735 = vpow2.f32 %v834_v31  ;;  %v5946_v60 = vadd.f32 %v5915_v34, %v694_v55  ;;  %v825_v0 = vsub.f32 0.0, %v799_v56  ;;  %v884_v40 = vmul.f32 0.6931472, %v4732_v59 }
  0xcf   :  { %4737 = vlog2.f32 %v891_v57  ;;  %v895_v9 = vadd.f32 1.0, %v894_v50  ;;  %v753_v31 = vmax.f32 %v5930_v8, 0.0  ;;  %vm898_vm12 = vcmp.lt.f32.partialorder %v897_v27, 0.0004427343 }
  0xd0   :  { %v781_v58 = vand.u32 2147483647, %v5946_v60  ;;  %v4734_v37 = vpop.eup %4733  ;;  %v872_v46 = vmul.f32 1.442695, %v825_v0  ;;  %v890_v15 = vsel %vm5951_vm11, %v887_v22, %v884_v40 }
  0xd1   :  { %v1062_v4 = vadd.f32 1.0, %v4734_v37  ;;  %v1065_v11 = vmul.f32 -0.5, %v4734_v37  ;;  %v896_v63 = vmul.f32 %v4730_v30, %v895_v9  ;;  %v1116_v1 = vadd.f32 %v890_v15, %v752_v47 }
  0xd2   :  { %v807_v2 = vsub.f32 0.0, %v781_v58  ;;  %4739 = vpow2.f32 %v872_v46  ;;  %v1068_v46 = vand.u32 2147483647, %v4734_v37 }
  0xd3   :  { %4741 = vlog2.f32 %v1062_v4  ;;  %v1066_v55 = vadd.f32 1.0, %v1065_v11  ;;  %v772_v11 = vmax.f32 %v5934_v23, 0.0 }
  0xd4   :  { %v5949_v6 = vpop.eup %4735  ;;  %v836_v7 = vmul.f32 1.442695, %v807_v2  ;;  %vm5970_vm13 = vcmp.lt.f32.partialorder %v1068_v46, 0.0004427343 }
  0xd5   :  { %v4738_v25 = vpop.eup %4737  ;;  %v697_v45 = vpop.f32.mrf.mxu0  ;;  %v900_v35 = vadd.f32 1.0, %v5949_v6  ;;  %v903_v4 = vmul.f32 -0.5, %v5949_v6  ;;  %v1067_v22 = vmul.f32 %v4734_v37, %v1066_v55 }
  0xd6   :  { %4743 = vpow2.f32 %v836_v7  ;;  %v5959_v41 = vadd.f32 %v5915_v34, %v697_v45  ;;  %v893_v26 = vmul.f32 0.6931472, %v4738_v25  ;;  %v742_v56 = vpop.f32.mrf.mxu3 }
  0xd7   :  { %v5965_v59 = vadd.f32 %v5915_v34, %v742_v56  ;;  %4745 = vlog2.f32 %v900_v35  ;;  %v754_v56 = vmax.f32 %v5938_v32, 0.0 }
  0xd8   :  { %v782_v57 = vand.u32 2147483647, %v5959_v41  ;;  %v899_v50 = vsel %vm898_vm12, %v896_v63, %v893_v26  ;;  %v4740_v0 = vpop.eup %4739 }
  0xd9   :  { %v1117_v58 = vadd.f32 %v899_v50, %v753_v31  ;;  %v4742_v42 = vpop.eup %4741  ;;  %v1071_v40 = vadd.f32 1.0, %v4740_v0  ;;  %v1074_v48 = vmul.f32 -0.5, %v4740_v0  ;;  %v800_v8 = vand.u32 2147483647, %v5965_v59 }
  0xda   :  { %v808_v30 = vsub.f32 0.0, %v782_v57  ;;  %v1064_v7 = vmul.f32 0.6931472, %v4742_v42  ;;  %v1077_v63 = vand.u32 2147483647, %v4740_v0  ;;  %v904_v31 = vadd.f32 1.0, %v903_v4 }
  0xdb   :  { %v1142_v2 = vpack.c.bf16 %v1117_v58, %v1116_v1  ;;  %4747 = vlog2.f32 %v1071_v40  ;;  %v1075_v16 = vadd.f32 1.0, %v1074_v48  ;;  %v826_v45 = vsub.f32 0.0, %v800_v8 }
  0xdc   :  { %v4744_v9 = vpop.eup %4743  ;;  %v838_v27 = vmul.f32 1.442695, %v808_v30  ;;  %v906_v1 = vand.u32 2147483647, %v5949_v6  ;;  %v1070_v58 = vsel %vm5970_vm13, %v1067_v22, %v1064_v7  ;;  %v773_v40 = vmax.f32 %v5942_v39, 0.0 }
  0xdd   :  { %v699_v25 = vpop.f32.mrf.mxu0  ;;  %1231 = vmatmul.bf16.vlgmr.msra.gmra.mxu1 %v1142_v2  ;;  %v909_v15 = vadd.f32 1.0, %v4744_v9  ;;  %v4746_v35 = vpop.eup %4745  ;;  %v874_v23 = vmul.f32 1.442695, %v826_v45  ;;  %v912_v55 = vmul.f32 -0.5, %v4744_v9  ;;  %v1076_v42 = vmul.f32 %v4740_v0, %v1075_v16 }
  0xde   :  { %4749 = vpow2.f32 %v838_v27  ;;  %v5975_v47 = vadd.f32 %v5915_v34, %v699_v25  ;;  %v744_v37 = vpop.f32.mrf.mxu3  ;;  %v902_v46 = vmul.f32 0.6931472, %v4746_v35  ;;  %vm5986_vm14 = vcmp.lt.f32.partialorder %v1077_v63, 0.0004427343 }
  0xdf   :  { %4751 = vlog2.f32 %v909_v15  ;;  %v5980_v50 = vadd.f32 %v5915_v34, %v744_v37  ;;  %v905_v4 = vmul.f32 %v5949_v6, %v904_v31  ;;  %v913_v27 = vadd.f32 1.0, %v912_v55 }
  0xe0   :  { %v783_v57 = vand.u32 2147483647, %v5975_v47  ;;  %4753 = vpow2.f32 %v874_v23  ;;  %v915_v25 = vand.u32 2147483647, %v4744_v9  ;;  %v1136_v22 = vadd.f32 %v1070_v58, %v772_v11 }
  0xe1   :  { %v4748_v30 = vpop.eup %4747  ;;  %v801_v8 = vand.u32 2147483647, %v5980_v50  ;;  %vm5992_vm15 = vcmp.lt.f32.partialorder %v906_v1, 0.0004427343  ;;  %v755_v15 = vmax.f32 %v5946_v60, 0.0  ;;  %v756_v16 = vmax.f32 %v5959_v41, 0.0 }
  0xe2   :  { %v809_v32 = vsub.f32 0.0, %v783_v57  ;;  %v1073_v2 = vmul.f32 0.6931472, %v4748_v30  ;;  %v908_v6 = vsel %vm5992_vm15, %v905_v4, %v902_v46  ;;  %v914_v57 = vmul.f32 %v4744_v9, %v913_v27 }
  0xe3   :  { %v827_v7 = vsub.f32 0.0, %v801_v8  ;;  %vm916_vm1 = vcmp.lt.f32.partialorder %v915_v25, 0.0004427343 }
  0xe4   :  { %v4750_v45 = vpop.eup %4749  ;;  %v840_v0 = vmul.f32 1.442695, %v809_v32  ;;  %v1079_v35 = vsel %vm5986_vm14, %v1076_v42, %v1073_v2  ;;  %v1118_v32 = vadd.f32 %v908_v6, %v754_v56  ;;  %v774_v56 = vmax.f32 %v5965_v59, 0.0 }
  0xe5   :  { %v4752_v39 = vpop.eup %4751  ;;  %v702_v26 = vpop.f32.mrf.mxu0  ;;  %v918_v63 = vadd.f32 1.0, %v4750_v45  ;;  %v1137_v23 = vadd.f32 %v1079_v35, %v773_v40  ;;  %v876_v37 = vmul.f32 1.442695, %v827_v7  ;;  %v921_v58 = vmul.f32 -0.5, %v4750_v45 }
  0xe6   :  { %4755 = vpow2.f32 %v840_v0  ;;  %v6002_v11 = vadd.f32 %v5915_v34, %v702_v26  ;;  %v4754_v31 = vpop.eup %4753  ;;  %v911_v55 = vmul.f32 0.6931472, %v4752_v39  ;;  %v747_v42 = vpop.f32.mrf.mxu3  ;;  %v924_v2 = vand.u32 2147483647, %v4750_v45 }
  0xe7   :  { %4757 = vlog2.f32 %v918_v63  ;;  %v1152_v1 = vpack.c.bf16 %v1137_v23, %v1136_v22  ;;  %v1080_v46 = vadd.f32 1.0, %v4754_v31  ;;  %v6006_v40 = vadd.f32 %v5915_v34, %v747_v42 }
  0xe8   :  { %v784_v60 = vand.u32 2147483647, %v6002_v11  ;;  %4759 = vpow2.f32 %v876_v37  ;;  %v917_v30 = vsel %vm916_vm1, %v914_v57, %v911_v55  ;;  %v1083_v9 = vmul.f32 -0.5, %v4754_v31 }
  0xe9   :  { %v1119_v8 = vadd.f32 %v917_v30, %v755_v15  ;;  %1281 = vmatmul.bf16.vlgmr.msrb.gmra.mxu3 %v1152_v1  ;;  %4761 = vlog2.f32 %v1080_v46  ;;  %v802_v25 = vand.u32 2147483647, %v6006_v40  ;;  %v922_v22 = vadd.f32 1.0, %v921_v58 }
  0xea   :  { %v810_v48 = vsub.f32 0.0, %v784_v60  ;;  %v757_v23 = vmax.f32 %v5975_v47, 0.0  ;;  %vm6015_vm2 = vcmp.lt.f32.partialorder %v924_v2, 0.0004427343  ;;  %v1084_v41 = vadd.f32 1.0, %v1083_v9 }
  0xeb   :  { %v1143_v0 = vpack.c.bf16 %v1119_v8, %v1118_v32  ;;  %v828_v6 = vsub.f32 0.0, %v802_v25  ;;  %v923_v60 = vmul.f32 %v4750_v45, %v922_v22  ;;  %v1086_v1 = vand.u32 2147483647, %v4754_v31 }
  0xec   :  { %v4756_v4 = vpop.eup %4755  ;;  %v842_v27 = vmul.f32 1.442695, %v810_v48 }
  0xed   :  { %v4758_v7 = vpop.eup %4757  ;;  %v704_v39 = vpop.f32.mrf.mxu0  ;;  %v927_v35 = vadd.f32 1.0, %v4756_v4  ;;  %v930_v26 = vmul.f32 -0.5, %v4756_v4  ;;  %1236 = vmatmul.bf16.gmra.mxu1 %v1143_v0  ;;  %v878_v57 = vmul.f32 1.442695, %v828_v6  ;;  %v933_v8 = vand.u32 2147483647, %v4756_v4 }
  0xee   :  { %v4760_v63 = vpop.eup %4759  ;;  %4763 = vpow2.f32 %v842_v27  ;;  %v6012_v15 = vadd.f32 %v5915_v34, %v704_v39  ;;  %v749_v58 = vpop.f32.mrf.mxu3  ;;  %v920_v42 = vmul.f32 0.6931472, %v4758_v7  ;;  %v1085_v27 = vmul.f32 %v4754_v31, %v1084_v41 }
  0xef   :  { %4765 = vlog2.f32 %v927_v35  ;;  %v4762_v59 = vpop.eup %4761  ;;  %v931_v30 = vadd.f32 1.0, %v930_v26  ;;  %v1089_v46 = vadd.f32 1.0, %v4760_v63  ;;  %v1092_v48 = vmul.f32 -0.5, %v4760_v63 }
  0xf0   :  { %v785_v55 = vand.u32 2147483647, %v6012_v15  ;;  %4767 = vpow2.f32 %v878_v57  ;;  %v6021_v47 = vadd.f32 %v5915_v34, %v749_v58  ;;  %v1082_v2 = vmul.f32 0.6931472, %v4762_v59 }
  0xf1   :  { %4769 = vlog2.f32 %v1089_v46  ;;  %v1093_v9 = vadd.f32 1.0, %v1092_v48  ;;  %vm6024_vm3 = vcmp.lt.f32.partialorder %v1086_v1, 0.0004427343  ;;  %v926_v35 = vsel %vm6015_vm2, %v923_v60, %v920_v42 }
  0xf2   :  { %v811_v32 = vsub.f32 0.0, %v785_v55  ;;  %v803_v45 = vand.u32 2147483647, %v6021_v47  ;;  %v932_v26 = vmul.f32 %v4756_v4, %v931_v30  ;;  %v1095_v6 = vand.u32 2147483647, %v4760_v63 }
  0xf3   :  { %v775_v59 = vmax.f32 %v5980_v50, 0.0  ;;  %vm934_vm4 = vcmp.lt.f32.partialorder %v933_v8, 0.0004427343  ;;  %v1088_v1 = vsel %vm6024_vm3, %v1085_v27, %v1082_v2  ;;  %v1094_v58 = vmul.f32 %v4760_v63, %v1093_v9 }
  0xf4   :  { %v4764_v25 = vpop.eup %4763  ;;  %v844_v0 = vmul.f32 1.442695, %v811_v32  ;;  %v829_v41 = vsub.f32 0.0, %v803_v45  ;;  %v1120_v30 = vadd.f32 %v926_v35, %v756_v16  ;;  %vm1096_vm5 = vcmp.lt.f32.partialorder %v1095_v6, 0.0004427343 }
  0xf5   :  { %v4766_v7 = vpop.eup %4765  ;;  %v707_v39 = vpop.f32.mrf.mxu0  ;;  %v936_v55 = vadd.f32 1.0, %v4764_v25  ;;  %v939_v50 = vmul.f32 -0.5, %v4764_v25 }
  0xf6   :  { %4771 = vpow2.f32 %v844_v0  ;;  %v6031_v31 = vadd.f32 %v5915_v34, %v707_v39  ;;  %v929_v57 = vmul.f32 0.6931472, %v4766_v7  ;;  %v4768_v46 = vpop.eup %4767  ;;  %v880_v60 = vmul.f32 1.442695, %v829_v41 }
  0xf7   :  { %4773 = vlog2.f32 %v936_v55  ;;  %v4770_v42 = vpop.eup %4769  ;;  %v1098_v32 = vadd.f32 1.0, %v4768_v46  ;;  %v1138_v7 = vadd.f32 %v1088_v1, %v774_v56  ;;  %v1101_v2 = vmul.f32 -0.5, %v4768_v46 }
  0xf8   :  { %v786_v37 = vand.u32 2147483647, %v6031_v31  ;;  %v935_v4 = vsel %vm934_vm4, %v932_v26, %v929_v57  ;;  %4775 = vpow2.f32 %v880_v60  ;;  %v1091_v45 = vmul.f32 0.6931472, %v4770_v42 }
  0xf9   :  { %v1121_v48 = vadd.f32 %v935_v4, %v757_v23  ;;  %4777 = vlog2.f32 %v1098_v32  ;;  %v942_v26 = vand.u32 2147483647, %v4764_v25  ;;  %v940_v23 = vadd.f32 1.0, %v939_v50 }
  0xfa   :  { %v812_v0 = vsub.f32 0.0, %v786_v37  ;;  %v1097_v9 = vsel %vm1096_vm5, %v1094_v58, %v1091_v45  ;;  %v1102_v56 = vadd.f32 1.0, %v1101_v2  ;;  %v1104_v37 = vand.u32 2147483647, %v4768_v46 }
  0xfb   :  { %v1144_v8 = vpack.c.bf16 %v1121_v48, %v1120_v30  ;;  %v1139_v39 = vadd.f32 %v1097_v9, %v775_v59  ;;  %v941_v30 = vmul.f32 %v4764_v25, %v940_v23  ;;  %vm6041_vm6 = vcmp.lt.f32.partialorder %v942_v26, 0.0004427343 }
  0xfc   :  { %v4772_v63 = vpop.eup %4771  ;;  %v846_v27 = vmul.f32 1.442695, %v812_v0  ;;  %v1103_v50 = vmul.f32 %v4768_v46, %v1102_v56  ;;  %vm6045_vm0 = vcmp.lt.f32.partialorder %v1104_v37, 0.0004427343 }
  0xfd   :  { %v709_v22 = vpop.f32.mrf.mxu0  ;;  %v945_v55 = vadd.f32 1.0, %v4772_v63  ;;  %v4774_v41 = vpop.eup %4773  ;;  %1241 = vmatmul.bf16.gmra.mxu1 %v1144_v8  ;;  %v948_v35 = vmul.f32 -0.5, %v4772_v63  ;;  %v1153_v6 = vpack.c.bf16 %v1139_v39, %v1138_v7  ;;  %v951_v0 = vand.u32 2147483647, %v4772_v63 }
  0xfe   :  { %4779 = vpow2.f32 %v846_v27  ;;  %v6038_v16 = vadd.f32 %v5915_v34, %v709_v22  ;;  %v4776_v57 = vpop.eup %4775  ;;  %v938_v59 = vmul.f32 0.6931472, %v4774_v41  ;;  %v758_v22 = vmax.f32 %v6002_v11, 0.0 }
  0xff   :  { %4781 = vlog2.f32 %v945_v55  ;;  %v4778_v58 = vpop.eup %4777  ;;  %1286 = vmatmul.bf16.gmra.mxu3 %v1153_v6  ;;  %v1107_v60 = vadd.f32 1.0, %v4776_v57  ;;  %v1110_v4 = vmul.f32 -0.5, %v4776_v57  ;;  %v949_v32 = vadd.f32 1.0, %v948_v35 }
 0x100   :  { %v787_v1 = vand.u32 2147483647, %v6038_v16  ;;  %v1100_v45 = vmul.f32 0.6931472, %v4778_v58  ;;  %v944_v39 = vsel %vm6041_vm6, %v941_v30, %v938_v59  ;;  %v1113_v26 = vand.u32 2147483647, %v4776_v57 }
 0x101   :  { %4783 = vlog2.f32 %v1107_v60  ;;  %v1111_v27 = vadd.f32 1.0, %v1110_v4  ;;  %v950_v23 = vmul.f32 %v4772_v63, %v949_v32  ;;  %v759_v35 = vmax.f32 %v6012_v15, 0.0 }
 0x102   :  { %v813_v42 = vsub.f32 0.0, %v787_v1  ;;  %v776_v6 = vmax.f32 %v6006_v40, 0.0  ;;  %vm952_vm7 = vcmp.lt.f32.partialorder %v951_v0, 0.0004427343  ;;  %v1106_v11 = vsel %vm6045_vm0, %v1103_v50, %v1100_v45 }
 0x103   :  { %v1112_v37 = vmul.f32 %v4776_v57, %v1111_v27  ;;  %v777_v59 = vmax.f32 %v6021_v47, 0.0  ;;  %v1122_v60 = vadd.f32 %v944_v39, %v758_v22  ;;  %vm1114_vm8 = vcmp.lt.f32.partialorder %v1113_v26, 0.0004427343 }
 0x104   :  { %v4780_v8 = vpop.eup %4779  ;;  %v848_v7 = vmul.f32 1.442695, %v813_v42  ;;  %v1140_v30 = vadd.f32 %v1106_v11, %v776_v6 }
 0x105   :  { %v4782_v9 = vpop.eup %4781  ;;  %v712_v25 = vpop.f32.mrf.mxu0  ;;  %v954_v55 = vadd.f32 1.0, %v4780_v8  ;;  %v957_v40 = vmul.f32 -0.5, %v4780_v8 }
 0x106   :  { %4785 = vpow2.f32 %v848_v7  ;;  %v6053_v46 = vadd.f32 %v5915_v34, %v712_v25  ;;  %v947_v41 = vmul.f32 0.6931472, %v4782_v9  ;;  %v960_v25 = vand.u32 2147483647, %v4780_v8 }
 0x107   :  { %4787 = vlog2.f32 %v954_v55  ;;  %v4784_v58 = vpop.eup %4783  ;;  %v958_v9 = vadd.f32 1.0, %v957_v40 }
 0x108   :  { %v788_v56 = vand.u32 2147483647, %v6053_v46  ;;  %v953_v1 = vsel %vm952_vm7, %v950_v23, %v947_v41  ;;  %v1109_v42 = vmul.f32 0.6931472, %v4784_v58  ;;  %vm961_vm9 = vcmp.lt.f32.partialorder %v960_v25, 0.0004427343 }
 0x109   :  { %v1123_v4 = vadd.f32 %v953_v1, %v759_v35  ;;  %v959_v41 = vmul.f32 %v4780_v8, %v958_v9 }
 0x10a   :  { %v814_v63 = vsub.f32 0.0, %v788_v56  ;;  %v1115_v0 = vsel %vm1114_vm8, %v1112_v37, %v1109_v42 }
 0x10b   :  { %v1145_v15 = vpack.c.bf16 %v1123_v4, %v1122_v60  ;;  %v1141_v50 = vadd.f32 %v1115_v0, %v777_v59  ;;  %v760_v4 = vmax.f32 %v6031_v31, 0.0 }
 0x10c   :  { %v4786_v48 = vpop.eup %4785  ;;  %v850_v32 = vmul.f32 1.442695, %v814_v63  ;;  %v761_v63 = vmax.f32 %v6038_v16, 0.0 }
 0x10d   :  { %v714_v45 = vpop.f32.mrf.mxu0  ;;  %v963_v7 = vadd.f32 1.0, %v4786_v48  ;;  %v4788_v2 = vpop.eup %4787  ;;  %1246 = vmatmul.bf16.gmra.mxu1 %v1145_v15  ;;  %v966_v47 = vmul.f32 -0.5, %v4786_v48  ;;  %v1154_v27 = vpack.c.bf16 %v1141_v50, %v1140_v30  ;;  %v969_v23 = vand.u32 2147483647, %v4786_v48 }
 0x10e   :  { %4789 = vpow2.f32 %v850_v32  ;;  %v6062_v57 = vadd.f32 %v5915_v34, %v714_v45  ;;  %v956_v39 = vmul.f32 0.6931472, %v4788_v2 }
 0x10f   :  { %4791 = vlog2.f32 %v963_v7  ;;  %1291 = vmatmul.bf16.gmra.mxu3 %v1154_v27  ;;  %v967_v55 = vadd.f32 1.0, %v966_v47  ;;  %vm970_vm10 = vcmp.lt.f32.partialorder %v969_v23, 0.0004427343 }
 0x110   :  { %v789_v22 = vand.u32 2147483647, %v6062_v57  ;;  %v962_v1 = vsel %vm961_vm9, %v959_v41, %v956_v39 }
 0x111   :  { %v968_v60 = vmul.f32 %v4786_v48, %v967_v55  ;;  %v1124_v15 = vadd.f32 %v962_v1, %v760_v4  ;;  %v762_v4 = vmax.f32 %v6053_v46, 0.0 }
 0x112   :  { %v815_v26 = vsub.f32 0.0, %v789_v22 }
 0x114   :  { %v4790_v35 = vpop.eup %4789  ;;  %v852_v6 = vmul.f32 1.442695, %v815_v26 }
 0x115   :  { %v4792_v11 = vpop.eup %4791  ;;  %v717_v56 = vpop.f32.mrf.mxu0  ;;  %v972_v37 = vadd.f32 1.0, %v4790_v35  ;;  %v975_v0 = vmul.f32 -0.5, %v4790_v35  ;;  %v978_v9 = vand.u32 2147483647, %v4790_v35 }
 0x116   :  { %4793 = vpow2.f32 %v852_v6  ;;  %v6066_v58 = vadd.f32 %v5915_v34, %v717_v56  ;;  %v965_v59 = vmul.f32 0.6931472, %v4792_v11 }
 0x117   :  { %4795 = vlog2.f32 %v972_v37  ;;  %v976_v48 = vadd.f32 1.0, %v975_v0  ;;  %vm979_vm11 = vcmp.lt.f32.partialorder %v978_v9, 0.0004427343 }
 0x118   :  { %v790_v8 = vand.u32 2147483647, %v6066_v58  ;;  %v971_v42 = vsel %vm970_vm10, %v968_v60, %v965_v59 }
 0x119   :  { %v1125_v30 = vadd.f32 %v971_v42, %v761_v63  ;;  %v977_v26 = vmul.f32 %v4790_v35, %v976_v48  ;;  %v763_v63 = vmax.f32 %v6062_v57, 0.0 }
 0x11a   :  { %v816_v40 = vsub.f32 0.0, %v790_v8 }
 0x11b   :  { %v1146_v32 = vpack.c.bf16 %v1125_v30, %v1124_v15 }
 0x11c   :  { %v4794_v45 = vpop.eup %4793  ;;  %v854_v50 = vmul.f32 1.442695, %v816_v40 }
 0x11d   :  { %v719_v7 = vpop.f32.mrf.mxu0  ;;  %v981_v2 = vadd.f32 1.0, %v4794_v45  ;;  %v4796_v47 = vpop.eup %4795  ;;  %1251 = vmatmul.bf16.gmra.mxu1 %v1146_v32  ;;  %v984_v16 = vmul.f32 -0.5, %v4794_v45  ;;  %v987_v55 = vand.u32 2147483647, %v4794_v45 }
 0x11e   :  { %4797 = vpow2.f32 %v854_v50  ;;  %v6072_v31 = vadd.f32 %v5915_v34, %v719_v7  ;;  %v974_v22 = vmul.f32 0.6931472, %v4796_v47 }
 0x11f   :  { %4799 = vlog2.f32 %v981_v2  ;;  %v985_v39 = vadd.f32 1.0, %v984_v16  ;;  %vm988_vm12 = vcmp.lt.f32.partialorder %v987_v55, 0.0004427343 }
 0x120   :  { %v791_v27 = vand.u32 2147483647, %v6072_v31  ;;  %v980_v56 = vsel %vm979_vm11, %v977_v26, %v974_v22 }
 0x121   :  { %v986_v60 = vmul.f32 %v4794_v45, %v985_v39  ;;  %v1126_v42 = vadd.f32 %v980_v56, %v762_v4  ;;  %v764_v4 = vmax.f32 %v6066_v58, 0.0 }
 0x122   :  { %v817_v25 = vsub.f32 0.0, %v791_v27 }
 0x124   :  { %v4798_v41 = vpop.eup %4797  ;;  %v856_v23 = vmul.f32 1.442695, %v817_v25 }
 0x125   :  { %v4800_v6 = vpop.eup %4799  ;;  %v722_v11 = vpop.f32.mrf.mxu0  ;;  %v990_v1 = vadd.f32 1.0, %v4798_v41  ;;  %v993_v32 = vmul.f32 -0.5, %v4798_v41  ;;  %v996_v48 = vand.u32 2147483647, %v4798_v41 }
 0x126   :  { %4801 = vpow2.f32 %v856_v23  ;;  %v6076_v37 = vadd.f32 %v5915_v34, %v722_v11  ;;  %v983_v59 = vmul.f32 0.6931472, %v4800_v6 }
 0x127   :  { %4803 = vlog2.f32 %v990_v1  ;;  %v994_v45 = vadd.f32 1.0, %v993_v32  ;;  %vm997_vm13 = vcmp.lt.f32.partialorder %v996_v48, 0.0004427343 }
 0x128   :  { %v792_v35 = vand.u32 2147483647, %v6076_v37  ;;  %v989_v8 = vsel %vm988_vm12, %v986_v60, %v983_v59 }
 0x129   :  { %v1127_v15 = vadd.f32 %v989_v8, %v763_v63  ;;  %v995_v25 = vmul.f32 %v4798_v41, %v994_v45  ;;  %v765_v63 = vmax.f32 %v6072_v31, 0.0 }
 0x12a   :  { %v818_v30 = vsub.f32 0.0, %v792_v35 }
 0x12b   :  { %v1147_v40 = vpack.c.bf16 %v1127_v15, %v1126_v42 }
 0x12c   :  { %v4802_v0 = vpop.eup %4801  ;;  %v858_v50 = vmul.f32 1.442695, %v818_v30 }
 0x12d   :  { %v724_v7 = vpop.f32.mrf.mxu0  ;;  %v999_v2 = vadd.f32 1.0, %v4802_v0  ;;  %v4804_v47 = vpop.eup %4803  ;;  %1256 = vmatmul.bf16.gmra.mxu1 %v1147_v40  ;;  %v1002_v57 = vmul.f32 -0.5, %v4802_v0  ;;  %v1005_v39 = vand.u32 2147483647, %v4802_v0 }
 0x12e   :  { %4805 = vpow2.f32 %v858_v50  ;;  %v6082_v46 = vadd.f32 %v5915_v34, %v724_v7  ;;  %v992_v27 = vmul.f32 0.6931472, %v4804_v47 }
 0x12f   :  { %4807 = vlog2.f32 %v999_v2  ;;  %v1003_v22 = vadd.f32 1.0, %v1002_v57  ;;  %vm1006_vm14 = vcmp.lt.f32.partialorder %v1005_v39, 0.0004427343 }
 0x130   :  { %v793_v16 = vand.u32 2147483647, %v6082_v46  ;;  %v998_v11 = vsel %vm997_vm13, %v995_v25, %v992_v27 }
 0x131   :  { %v1004_v60 = vmul.f32 %v4802_v0, %v1003_v22  ;;  %v1128_v8 = vadd.f32 %v998_v11, %v764_v4 }
 0x132   :  { %v819_v9 = vsub.f32 0.0, %v793_v16 }
 0x134   :  { %v4806_v26 = vpop.eup %4805  ;;  %v860_v55 = vmul.f32 1.442695, %v819_v9 }
 0x135   :  { %v4808_v23 = vpop.eup %4807  ;;  %v727_v6 = vpop.f32.mrf.mxu0  ;;  %v1008_v56 = vadd.f32 1.0, %v4806_v26  ;;  %v1011_v40 = vmul.f32 -0.5, %v4806_v26  ;;  %v1014_v45 = vand.u32 2147483647, %v4806_v26 }
 0x136   :  { %4809 = vpow2.f32 %v860_v55  ;;  %v6086_v1 = vadd.f32 %v5915_v34, %v727_v6  ;;  %v1001_v59 = vmul.f32 0.6931472, %v4808_v23 }
 0x137   :  { %4811 = vlog2.f32 %v1008_v56  ;;  %v1012_v0 = vadd.f32 1.0, %v1011_v40  ;;  %vm6095_vm15 = vcmp.lt.f32.partialorder %v1014_v45, 0.0004427343  ;;  %v4487_v40 = vld [vmem:[#allocation2 + $0x30] sm:$0xff] }
 0x138   :  { %v794_v41 = vand.u32 2147483647, %v6086_v1  ;;  %v1007_v35 = vsel %vm1006_vm14, %v1004_v60, %v1001_v59 }
 0x139   :  { %v1129_v42 = vadd.f32 %v1007_v35, %v765_v63  ;;  %v1013_v9 = vmul.f32 %v4806_v26, %v1012_v0  ;;  %v4488_v26 = vld [vmem:[#allocation2 + $0x38] sm:$0xff]  ;;  %v766_v63 = vmax.f32 %v6076_v37, 0.0  ;;  %v4486_v0 = vld [vmem:[#allocation2 + $0x28] sm:$0xff] }
 0x13a   :  { %v820_v15 = vsub.f32 0.0, %v794_v41  ;;  %v767_v41 = vmax.f32 %v6082_v46, 0.0  ;;  %1794 = vmatpush.bf16.msra.mxu2 %v4488_v26  ;;  %4601 = vmatpush.bf16.msra.mxu3 %v4488_v26 }
 0x13b   :  { %v1148_v30 = vpack.c.bf16 %v1129_v42, %v1128_v8 }
 0x13c   :  { %v4810_v32 = vpop.eup %4809  ;;  %v862_v50 = vmul.f32 1.442695, %v820_v15 }
 0x13d   :  { %v729_v7 = vpop.f32.mrf.mxu0  ;;  %v1017_v2 = vadd.f32 1.0, %v4810_v32  ;;  %v4812_v47 = vpop.eup %4811  ;;  %1261 = vmatmul.bf16.gmra.mxu1 %v1148_v30  ;;  %v1020_v31 = vmul.f32 -0.5, %v4810_v32  ;;  %v1023_v22 = vand.u32 2147483647, %v4810_v32 }
 0x13e   :  { %4813 = vpow2.f32 %v862_v50  ;;  %v6092_v58 = vadd.f32 %v5915_v34, %v729_v7  ;;  %v1010_v16 = vmul.f32 0.6931472, %v4812_v47  ;;  %1795 = vmatpush.bf16.msra.mxu2 %v4487_v40  ;;  %4602 = vmatpush.bf16.msra.mxu3 %v4487_v40  ;;  %v4483_v40 = vld [vmem:[#allocation2 + $0x10] sm:$0xff] }
 0x13f   :  { %4815 = vlog2.f32 %v1017_v2  ;;  %v1021_v27 = vadd.f32 1.0, %v1020_v31  ;;  %vm1024_vm1 = vcmp.lt.f32.partialorder %v1023_v22, 0.0004427343 }
 0x140   :  { %v795_v57 = vand.u32 2147483647, %v6092_v58  ;;  %v1016_v11 = vsel %vm6095_vm15, %v1013_v9, %v1010_v16 }
 0x141   :  { %v1022_v4 = vmul.f32 %v4810_v32, %v1021_v27  ;;  %v1130_v42 = vadd.f32 %v1016_v11, %v766_v63  ;;  %v4484_v63 = vld [vmem:[#allocation2 + $0x18] sm:$0xff] }
 0x142   :  { %v821_v48 = vsub.f32 0.0, %v795_v57  ;;  %1796 = vmatpush.bf16.msra.mxu2 %v4486_v0  ;;  %4603 = vmatpush.bf16.msra.mxu3 %v4486_v0 }
 0x144   :  { %v4814_v25 = vpop.eup %4813  ;;  %v864_v39 = vmul.f32 1.442695, %v821_v48 }
 0x145   :  { %v4816_v23 = vpop.eup %4815  ;;  %v732_v6 = vpop.f32.mrf.mxu0  ;;  %v1026_v56 = vadd.f32 1.0, %v4814_v25  ;;  %v1029_v32 = vmul.f32 -0.5, %v4814_v25  ;;  %v1032_v48 = vand.u32 2147483647, %v4814_v25 }
 0x146   :  { %4817 = vpow2.f32 %v864_v39  ;;  %v6102_v59 = vadd.f32 %v5915_v34, %v732_v6  ;;  %v1019_v60 = vmul.f32 0.6931472, %v4816_v23  ;;  %v4485_v39 = vld [vmem:[#allocation2 + $0x20] sm:$0xff] }
 0x147   :  { %4819 = vlog2.f32 %v1026_v56  ;;  %v1030_v16 = vadd.f32 1.0, %v1029_v32  ;;  %1797 = vmatpush.bf16.msra.mxu2 %v4485_v39  ;;  %4604 = vmatpush.bf16.msra.mxu3 %v4485_v39  ;;  %vm1033_vm2 = vcmp.lt.f32.partialorder %v1032_v48, 0.0004427343 }
 0x148   :  { %v796_v35 = vand.u32 2147483647, %v6102_v59  ;;  %v1025_v8 = vsel %vm1024_vm1, %v1022_v4, %v1019_v60 }
 0x149   :  { %v1131_v15 = vadd.f32 %v1025_v8, %v767_v41  ;;  %v768_v41 = vmax.f32 %v6086_v1, 0.0  ;;  %v6116_v8 = vld [vmem:[%s7376_s4] ss:$0 sm:$0xff] }
 0x14a   :  { %v822_v30 = vsub.f32 0.0, %v796_v35  ;;  %v769_v35 = vmax.f32 %v6092_v58, 0.0 }
 0x14b   :  { %v1149_v50 = vpack.c.bf16 %v1131_v15, %v1130_v42  ;;  %1798 = vmatpush.bf16.msra.mxu2 %v4484_v63  ;;  %4605 = vmatpush.bf16.msra.mxu3 %v4484_v63 }
 0x14c   :  { %v4818_v7 = vpop.eup %4817  ;;  %v866_v2 = vmul.f32 1.442695, %v822_v30 }
 0x14d   :  { %v734_v37 = vpop.f32.mrf.mxu0  ;;  %v1035_v47 = vadd.f32 1.0, %v4818_v7  ;;  %1266 = vmatmul.bf16.gmra.mxu1 %v1149_v50  ;;  %v1038_v31 = vmul.f32 -0.5, %v4818_v7  ;;  %v4820_v57 = vpop.eup %4819  ;;  %v1041_v55 = vand.u32 2147483647, %v4818_v7 }
 0x14e   :  { %4821 = vpow2.f32 %v866_v2  ;;  %v6108_v46 = vadd.f32 %v5915_v34, %v734_v37  ;;  %v1028_v9 = vmul.f32 0.6931472, %v4820_v57  ;;  %v1031_v34 = vmul.f32 %v4814_v25, %v1030_v16 }
 0x14f   :  { %4823 = vlog2.f32 %v1035_v47  ;;  %v1039_v22 = vadd.f32 1.0, %v1038_v31  ;;  %vm1042_vm3 = vcmp.lt.f32.partialorder %v1041_v55, 0.0004427343  ;;  %1799 = vmatpush.bf16.msra.mxu2 %v4483_v40  ;;  %4606 = vmatpush.bf16.msra.mxu3 %v4483_v40  ;;  %v4482_v47 = vld [vmem:[#allocation2 + $0x8] sm:$0xff] }
 0x150   :  { %v797_v45 = vand.u32 2147483647, %v6108_v46  ;;  %v1034_v60 = vsel %vm1033_vm2, %v1031_v34, %v1028_v9  ;;  %v771_v63 = vmax.f32 %v6108_v46, 0.0 }
 0x151   :  { %v1040_v26 = vmul.f32 %v4818_v7, %v1039_v22  ;;  %v1132_v42 = vadd.f32 %v1034_v60, %v768_v41  ;;  %v4481_v22 = vld [vmem:[#allocation2] sm:$0xff] }
 0x152   :  { %v823_v27 = vsub.f32 0.0, %v797_v45 }
 0x153   :  { %1800 = vmatpush.bf16.msra.mxu2 %v4482_v47  ;;  %4607 = vmatpush.bf16.msra.mxu3 %v4482_v47 }
 0x154   :  { %v4822_v23 = vpop.eup %4821  ;;  %v868_v6 = vmul.f32 1.442695, %v823_v27 }
 0x155   :  { %v4824_v11 = vpop.eup %4823  ;;  %v1044_v56 = vadd.f32 1.0, %v4822_v23  ;;  %v1047_v2 = vmul.f32 -0.5, %v4822_v23  ;;  %v1050_v16 = vand.u32 2147483647, %v4822_v23 }
 0x156   :  { %4825 = vpow2.f32 %v868_v6  ;;  %v1037_v4 = vmul.f32 0.6931472, %v4824_v11 }
 0x157   :  { %4827 = vlog2.f32 %v1044_v56  ;;  %v1048_v57 = vadd.f32 1.0, %v1047_v2  ;;  %1801 = vmatpush.bf16.msra.mxu2 %v4481_v22  ;;  %4608 = vmatpush.bf16.msra.mxu3 %v4481_v22  ;;  %vm1051_vm4 = vcmp.lt.f32.partialorder %v1050_v16, 0.0004427343 }
 0x158   :  { %v1043_v25 = vsel %vm1042_vm3, %v1040_v26, %v1037_v4  ;;  %v770_v26 = vmax.f32 %v6102_v59, 0.0 }
 0x159   :  { %v1133_v15 = vadd.f32 %v1043_v25, %v769_v35  ;;  %v1049_v6 = vmul.f32 %v4822_v23, %v1048_v57 }
 0x15a   :  { %v1232_v30 = vpop.f32.mrf.mxu1 }
 0x15b   :  { %v1233_v50 = vadd.f32 %v6116_v8, %v1232_v30  ;;  %v1150_v7 = vpack.c.bf16 %v1133_v15, %v1132_v42 }
 0x15c   :  { %v4826_v1 = vpop.eup %4825 }
 0x15d   :  { %v6120_v58 = vadd.f32 %v1233_v50, %v5602_v12  ;;  %v1053_v32 = vadd.f32 1.0, %v4826_v1  ;;  %1271 = vmatmul.bf16.gmra.mxu1 %v1150_v7  ;;  %v1056_v37 = vmul.f32 -0.5, %v4826_v1  ;;  %v4828_v31 = vpop.eup %4827  ;;  %v1059_v55 = vand.u32 2147483647, %v4826_v1 }
 0x15e   :  { %v1046_v27 = vmul.f32 0.6931472, %v4828_v31 }
 0x15f   :  { %v1349_v0 = vand.u32 2147483647, %v6120_v58  ;;  %4829 = vlog2.f32 %v1053_v32  ;;  %v1057_v9 = vadd.f32 1.0, %v1056_v37  ;;  %vm1060_vm5 = vcmp.lt.f32.partialorder %v1059_v55, 0.0004427343 }
 0x160   :  { %v1052_v56 = vsel %vm1051_vm4, %v1049_v6, %v1046_v27 }
 0x161   :  { %v1375_v45 = vsub.f32 0.0, %v1349_v0  ;;  %v1058_v4 = vmul.f32 %v4826_v1, %v1057_v9  ;;  %v1134_v25 = vadd.f32 %v1052_v56, %v770_v26 }
 0x162   :  { %v1234_v48 = vpop.f32.mrf.mxu1 }
 0x163   :  { %v1401_v39 = vmul.f32 1.442695, %v1375_v45  ;;  %v1235_v12 = vadd.f32 %v6116_v8, %v1234_v48 }
 0x165   :  { %v4830_v34 = vpop.eup %4829  ;;  %4831 = vpow2.f32 %v1401_v39  ;;  %v6125_v11 = vadd.f32 %v1235_v12, %v5605_v13 }
 0x166   :  { %v1055_v60 = vmul.f32 0.6931472, %v4830_v34 }
 0x167   :  { %v1350_v41 = vand.u32 2147483647, %v6125_v11 }
 0x168   :  { %v1061_v35 = vsel %vm1060_vm5, %v1058_v4, %v1055_v60 }
 0x169   :  { %v1376_v23 = vsub.f32 0.0, %v1350_v41  ;;  %v1135_v42 = vadd.f32 %v1061_v35, %v771_v63 }
 0x16a   :  { %v1237_v40 = vpop.f32.mrf.mxu1 }
 0x16b   :  { %v4832_v15 = vpop.eup %4831  ;;  %v1403_v30 = vmul.f32 1.442695, %v1376_v23  ;;  %v1151_v13 = vpack.c.bf16 %v1135_v42, %v1134_v25  ;;  %v1238_v50 = vadd.f32 %v6116_v8, %v1237_v40 }
 0x16c   :  { %v1453_v7 = vadd.f32 1.0, %v4832_v15  ;;  %v1282_v1 = vpop.f32.mrf.mxu3  ;;  %v1456_v57 = vmul.f32 -0.5, %v4832_v15  ;;  %v1459_v56 = vand.u32 2147483647, %v4832_v15 }
 0x16d   :  { %4833 = vpow2.f32 %v1403_v30  ;;  %v6132_v59 = vadd.f32 %v1238_v50, %v5613_v18  ;;  %1276 = vmatmul.bf16.gmra.mxu1 %v1151_v13  ;;  %v1283_v46 = vadd.f32 %v6116_v8, %v1282_v1  ;;  %v1323_v13 = vmax.f32 %v6120_v58, 0.0 }
 0x16e   :  { %4835 = vlog2.f32 %v1453_v7  ;;  %v1457_v55 = vadd.f32 1.0, %v1456_v57  ;;  %vm6153_vm6 = vcmp.lt.f32.partialorder %v1459_v56, 0.0004427343 }
 0x16f   :  { %v1351_v2 = vand.u32 2147483647, %v6132_v59  ;;  %v6137_v32 = vadd.f32 %v1283_v46, %v5619_v20 }
 0x171   :  { %v1377_v37 = vsub.f32 0.0, %v1351_v2  ;;  %v1369_v47 = vand.u32 2147483647, %v6137_v32 }
 0x172   :  { %v1239_v0 = vpop.f32.mrf.mxu1 }
 0x173   :  { %v4834_v31 = vpop.eup %4833  ;;  %v1405_v45 = vmul.f32 1.442695, %v1377_v37  ;;  %v1240_v16 = vadd.f32 %v6116_v8, %v1239_v0  ;;  %v1395_v18 = vsub.f32 0.0, %v1369_v47  ;;  %v1324_v0 = vmax.f32 %v6125_v11, 0.0 }
 0x174   :  { %v1462_v48 = vadd.f32 1.0, %v4834_v31  ;;  %v1284_v27 = vpop.f32.mrf.mxu3  ;;  %v1465_v9 = vmul.f32 -0.5, %v4834_v31  ;;  %v4836_v22 = vpop.eup %4835  ;;  %v1468_v35 = vand.u32 2147483647, %v4834_v31 }
 0x175   :  { %4837 = vpow2.f32 %v1405_v45  ;;  %v6142_v39 = vadd.f32 %v1240_v16, %v5616_v19  ;;  %v1441_v20 = vmul.f32 1.442695, %v1395_v18  ;;  %v1285_v12 = vadd.f32 %v6116_v8, %v1284_v27 }
 0x176   :  { %4839 = vlog2.f32 %v1462_v48  ;;  %v1455_v60 = vmul.f32 0.6931472, %v4836_v22  ;;  %v1466_v4 = vadd.f32 1.0, %v1465_v9  ;;  %v1458_v19 = vmul.f32 %v4832_v15, %v1457_v55 }
 0x177   :  { %v1352_v6 = vand.u32 2147483647, %v6142_v39  ;;  %4841 = vpow2.f32 %v1441_v20  ;;  %v6147_v34 = vadd.f32 %v1285_v12, %v5622_v21  ;;  %vm1469_vm0 = vcmp.lt.f32.partialorder %v1468_v35, 0.0004427343 }
 0x178   :  { %v1461_v50 = vsel %vm6153_vm6, %v1458_v19, %v1455_v60  ;;  %v1467_v7 = vmul.f32 %v4834_v31, %v1466_v4  ;;  %v1325_v20 = vmax.f32 %v6132_v59, 0.0  ;;  %v1343_v55 = vmax.f32 %v6137_v32, 0.0 }
 0x179   :  { %v1378_v26 = vsub.f32 0.0, %v1352_v6  ;;  %v1370_v63 = vand.u32 2147483647, %v6147_v34  ;;  %v1687_v16 = vadd.f32 %v1461_v50, %v1323_v13  ;;  %v1326_v4 = vmax.f32 %v6142_v39, 0.0 }
 0x17a   :  { %v1242_v41 = vpop.f32.mrf.mxu1 }
 0x17b   :  { %v6150_v23 = vpop.eup %4837  ;;  %v1407_v25 = vmul.f32 1.442695, %v1378_v26  ;;  %v1243_v42 = vadd.f32 %v6116_v8, %v1242_v41  ;;  %v1396_v30 = vsub.f32 0.0, %v1370_v63 }
 0x17c   :  { %v4840_v21 = vpop.eup %4839  ;;  %v1471_v15 = vadd.f32 1.0, %v6150_v23  ;;  %v1474_v18 = vmul.f32 -0.5, %v6150_v23  ;;  %v1477_v40 = vand.u32 2147483647, %v6150_v23 }
 0x17d   :  { %v4842_v1 = vpop.eup %4841  ;;  %4843 = vpow2.f32 %v1407_v25  ;;  %v6162_v46 = vadd.f32 %v1243_v42, %v5635_v36  ;;  %v1443_v2 = vmul.f32 1.442695, %v1396_v30  ;;  %v1464_v37 = vmul.f32 0.6931472, %v4840_v21 }
 0x17e   :  { %v1633_v47 = vadd.f32 1.0, %v4842_v1  ;;  %4845 = vlog2.f32 %v1471_v15  ;;  %v1636_v48 = vmul.f32 -0.5, %v4842_v1  ;;  %v1639_v36 = vand.u32 2147483647, %v4842_v1 }
 0x17f   :  { %v1353_v57 = vand.u32 2147483647, %v6162_v46  ;;  %4847 = vpow2.f32 %v1443_v2  ;;  %v1470_v45 = vsel %vm1469_vm0, %v1467_v7, %v1464_v37  ;;  %v1475_v41 = vadd.f32 1.0, %v1474_v18 }
 0x180   :  { %v1688_v31 = vadd.f32 %v1470_v45, %v1324_v0  ;;  %4849 = vlog2.f32 %v1633_v47  ;;  %v1637_v42 = vadd.f32 1.0, %v1636_v48  ;;  %vm6176_vm7 = vcmp.lt.f32.partialorder %v1639_v36, 0.0004427343 }
 0x181   :  { %v1379_v27 = vsub.f32 0.0, %v1353_v57  ;;  %v1344_v15 = vmax.f32 %v6147_v34, 0.0  ;;  %v1476_v0 = vmul.f32 %v6150_v23, %v1475_v41  ;;  %vm6187_vm8 = vcmp.lt.f32.partialorder %v1477_v40, 0.0004427343 }
 0x182   :  { %v1244_v9 = vpop.f32.mrf.mxu1  ;;  %v1713_v22 = vpack.c.bf16 %v1688_v31, %v1687_v16  ;;  %v1287_v60 = vpop.f32.mrf.mxu3  ;;  %v1638_v16 = vmul.f32 %v4842_v1, %v1637_v42 }
 0x183   :  { %v4844_v12 = vpop.eup %4843  ;;  %v1409_v6 = vmul.f32 1.442695, %v1379_v27  ;;  %v1245_v56 = vadd.f32 %v6116_v8, %v1244_v9  ;;  %v1288_v63 = vadd.f32 %v6116_v8, %v1287_v60 }
 0x184   :  { %v4846_v26 = vpop.eup %4845  ;;  %1802 = vmatmul.bf16.vlgmr.msra.gmra.mxu2 %v1713_v22  ;;  %v1480_v19 = vadd.f32 1.0, %v4844_v12  ;;  %v1483_v35 = vmul.f32 -0.5, %v4844_v12  ;;  %v1486_v50 = vand.u32 2147483647, %v4844_v12 }
 0x185   :  { %v4848_v25 = vpop.eup %4847  ;;  %4851 = vpow2.f32 %v1409_v6  ;;  %v6173_v30 = vadd.f32 %v1245_v56, %v5638_v38  ;;  %v6181_v13 = vadd.f32 %v1288_v63, %v5651_v53  ;;  %v1473_v37 = vmul.f32 0.6931472, %v4846_v26 }
 0x186   :  { %4853 = vlog2.f32 %v1480_v19  ;;  %v4850_v7 = vpop.eup %4849  ;;  %v1642_v47 = vadd.f32 1.0, %v4848_v25  ;;  %v1484_v57 = vadd.f32 1.0, %v1483_v35  ;;  %v1645_v45 = vmul.f32 -0.5, %v4848_v25 }
 0x187   :  { %v1354_v2 = vand.u32 2147483647, %v6173_v30  ;;  %v1371_v38 = vand.u32 2147483647, %v6181_v13  ;;  %v1635_v18 = vmul.f32 0.6931472, %v4850_v7  ;;  %v1479_v1 = vsel %vm6187_vm8, %v1476_v0, %v1473_v37 }
 0x188   :  { %4855 = vlog2.f32 %v1642_v47  ;;  %vm6191_vm9 = vcmp.lt.f32.partialorder %v1486_v50, 0.0004427343  ;;  %v1646_v9 = vadd.f32 1.0, %v1645_v45  ;;  %v1648_v60 = vand.u32 2147483647, %v4848_v25 }
 0x189   :  { %v1380_v31 = vsub.f32 0.0, %v1354_v2  ;;  %v1397_v48 = vsub.f32 0.0, %v1371_v38  ;;  %v1485_v19 = vmul.f32 %v4844_v12, %v1484_v57  ;;  %v1641_v7 = vsel %vm6176_vm7, %v1638_v16, %v1635_v18 }
 0x18a   :  { %v1247_v27 = vpop.f32.mrf.mxu1  ;;  %v1289_v56 = vpop.f32.mrf.mxu3  ;;  %v1647_v37 = vmul.f32 %v4848_v25, %v1646_v9  ;;  %vm6210_vm10 = vcmp.lt.f32.partialorder %v1648_v60, 0.0004427343  ;;  %v1689_v21 = vadd.f32 %v1479_v1, %v1325_v20  ;;  %v1707_v25 = vadd.f32 %v1641_v7, %v1343_v55 }
 0x18b   :  { %v4852_v22 = vpop.eup %4851  ;;  %v1411_v6 = vmul.f32 1.442695, %v1380_v31  ;;  %v1248_v23 = vadd.f32 %v6116_v8, %v1247_v27  ;;  %v1445_v63 = vmul.f32 1.442695, %v1397_v48  ;;  %v1290_v41 = vadd.f32 %v6116_v8, %v1289_v56 }
 0x18c   :  { %v4854_v26 = vpop.eup %4853  ;;  %v1489_v35 = vadd.f32 1.0, %v4852_v22  ;;  %v1492_v50 = vmul.f32 -0.5, %v4852_v22  ;;  %v1495_v20 = vand.u32 2147483647, %v4852_v22 }
 0x18d   :  { %4857 = vpow2.f32 %v1411_v6  ;;  %v6200_v42 = vadd.f32 %v1248_v23, %v5729_v43  ;;  %v1482_v40 = vmul.f32 0.6931472, %v4854_v26  ;;  %v6205_v2 = vadd.f32 %v1290_v41, %v5654_v54 }
 0x18e   :  { %4859 = vpow2.f32 %v1445_v63  ;;  %v4856_v47 = vpop.eup %4855  ;;  %v1493_v16 = vadd.f32 1.0, %v1492_v50  ;;  %vm6231_vm11 = vcmp.lt.f32.partialorder %v1495_v20, 0.0004427343 }
 0x18f   :  { %v1355_v38 = vand.u32 2147483647, %v6200_v42  ;;  %v1488_v12 = vsel %vm6191_vm9, %v1485_v19, %v1482_v40  ;;  %4861 = vlog2.f32 %v1489_v35  ;;  %v1372_v43 = vand.u32 2147483647, %v6205_v2 }
 0x190   :  { %v1690_v57 = vadd.f32 %v1488_v12, %v1326_v4  ;;  %v1644_v54 = vmul.f32 0.6931472, %v4856_v47  ;;  %v1494_v19 = vmul.f32 %v4852_v22, %v1493_v16  ;;  %v1327_v12 = vmax.f32 %v6162_v46, 0.0 }
 0x191   :  { %v1381_v45 = vsub.f32 0.0, %v1355_v38  ;;  %v1398_v31 = vsub.f32 0.0, %v1372_v43 }
 0x192   :  { %v1249_v53 = vpop.f32.mrf.mxu1  ;;  %v1714_v18 = vpack.c.bf16 %v1690_v57, %v1689_v21  ;;  %v1650_v48 = vsel %vm6210_vm10, %v1647_v37, %v1644_v54  ;;  %v1292_v6 = vpop.f32.mrf.mxu3  ;;  %v1328_v21 = vmax.f32 %v6173_v30, 0.0 }
 0x193   :  { %v4858_v27 = vpop.eup %4857  ;;  %v1413_v36 = vmul.f32 1.442695, %v1381_v45  ;;  %v1250_v9 = vadd.f32 %v6116_v8, %v1249_v53  ;;  %v1708_v23 = vadd.f32 %v1650_v48, %v1344_v15  ;;  %v1447_v56 = vmul.f32 1.442695, %v1398_v31 }
 0x194   :  { %v4860_v4 = vpop.eup %4859  ;;  %1807 = vmatmul.bf16.gmra.mxu2 %v1714_v18  ;;  %v1293_v55 = vadd.f32 %v6116_v8, %v1292_v6  ;;  %v1498_v1 = vadd.f32 1.0, %v4858_v27  ;;  %v1501_v60 = vmul.f32 -0.5, %v4858_v27  ;;  %v1504_v40 = vand.u32 2147483647, %v4858_v27 }
 0x195   :  { %v4862_v26 = vpop.eup %4861  ;;  %4863 = vpow2.f32 %v1413_v36  ;;  %v6224_v63 = vadd.f32 %v1250_v9, %v5732_v44  ;;  %v1723_v41 = vpack.c.bf16 %v1708_v23, %v1707_v25  ;;  %v1651_v37 = vadd.f32 1.0, %v4860_v4 }
 0x196   :  { %4865 = vpow2.f32 %v1447_v56  ;;  %v6227_v35 = vadd.f32 %v1293_v55, %v5746_v61  ;;  %v1491_v15 = vmul.f32 0.6931472, %v4862_v26  ;;  %v1502_v7 = vadd.f32 1.0, %v1501_v60 }
 0x197   :  { %v1356_v50 = vand.u32 2147483647, %v6224_v63  ;;  %1852 = vmatmul.bf16.vlgmr.msra.gmra.mxu3 %v1723_v41  ;;  %4867 = vlog2.f32 %v1498_v1  ;;  %v1654_v44 = vmul.f32 -0.5, %v4860_v4  ;;  %vm6239_vm12 = vcmp.lt.f32.partialorder %v1504_v40, 0.0004427343 }
 0x198   :  { %v1373_v47 = vand.u32 2147483647, %v6227_v35  ;;  %v1497_v61 = vsel %vm6231_vm11, %v1494_v19, %v1491_v15  ;;  %4869 = vlog2.f32 %v1651_v37  ;;  %v1657_v54 = vand.u32 2147483647, %v4860_v4 }
 0x199   :  { %v1382_v22 = vsub.f32 0.0, %v1356_v50  ;;  %v1503_v53 = vmul.f32 %v4858_v27, %v1502_v7  ;;  %v1655_v18 = vadd.f32 1.0, %v1654_v44  ;;  %v1691_v6 = vadd.f32 %v1497_v61, %v1327_v12 }
 0x19a   :  { %v1399_v0 = vsub.f32 0.0, %v1373_v47  ;;  %v1252_v43 = vpop.f32.mrf.mxu1  ;;  %v1294_v31 = vpop.f32.mrf.mxu3  ;;  %vm6254_vm13 = vcmp.lt.f32.partialorder %v1657_v54, 0.0004427343  ;;  %v1345_v12 = vmax.f32 %v6181_v13, 0.0  ;;  %v1346_v54 = vmax.f32 %v6205_v2, 0.0 }
 0x19b   :  { %v6243_v25 = vpop.eup %4863  ;;  %v1415_v45 = vmul.f32 1.442695, %v1382_v22  ;;  %v1253_v16 = vadd.f32 %v6116_v8, %v1252_v43  ;;  %v1295_v9 = vadd.f32 %v6116_v8, %v1294_v31  ;;  %v1656_v15 = vmul.f32 %v4860_v4, %v1655_v18 }
 0x19c   :  { %v4866_v48 = vpop.eup %4865  ;;  %v1449_v36 = vmul.f32 1.442695, %v1399_v0  ;;  %v1507_v23 = vadd.f32 1.0, %v6243_v25  ;;  %v1510_v38 = vmul.f32 -0.5, %v6243_v25 }
 0x19d   :  { %v4868_v20 = vpop.eup %4867  ;;  %4871 = vpow2.f32 %v1415_v45  ;;  %v6249_v56 = vadd.f32 %v1253_v16, %v5760_v28  ;;  %v1660_v55 = vadd.f32 1.0, %v4866_v48  ;;  %v1663_v1 = vmul.f32 -0.5, %v4866_v48 }
 0x19e   :  { %4873 = vpow2.f32 %v1449_v36  ;;  %v6252_v60 = vadd.f32 %v1295_v9, %v5750_v5  ;;  %v1500_v27 = vmul.f32 0.6931472, %v4868_v20  ;;  %v4870_v41 = vpop.eup %4869  ;;  %v1666_v40 = vand.u32 2147483647, %v4866_v48 }
 0x19f   :  { %v1357_v19 = vand.u32 2147483647, %v6249_v56  ;;  %4875 = vlog2.f32 %v1660_v55  ;;  %v1653_v7 = vmul.f32 0.6931472, %v4870_v41  ;;  %v1664_v37 = vadd.f32 1.0, %v1663_v1 }
 0x1a0   :  { %v1374_v28 = vand.u32 2147483647, %v6252_v60  ;;  %v1506_v50 = vsel %vm6239_vm12, %v1503_v53, %v1500_v27  ;;  %4877 = vlog2.f32 %v1507_v23  ;;  %vm1667_vm14 = vcmp.lt.f32.partialorder %v1666_v40, 0.0004427343 }
 0x1a1   :  { %v1383_v5 = vsub.f32 0.0, %v1357_v19  ;;  %v1692_v47 = vadd.f32 %v1506_v50, %v1328_v21  ;;  %v1659_v16 = vsel %vm6254_vm13, %v1656_v15, %v1653_v7  ;;  %v1665_v21 = vmul.f32 %v4866_v48, %v1664_v37 }
 0x1a2   :  { %v1400_v44 = vsub.f32 0.0, %v1374_v28  ;;  %v1254_v22 = vpop.f32.mrf.mxu1  ;;  %v1511_v36 = vadd.f32 1.0, %v1510_v38  ;;  %v1709_v1 = vadd.f32 %v1659_v16, %v1345_v12  ;;  %v1329_v15 = vmax.f32 %v6200_v42, 0.0 }
 0x1a3   :  { %v4872_v61 = vpop.eup %4871  ;;  %v1417_v4 = vmul.f32 1.442695, %v1383_v5  ;;  %v1255_v0 = vadd.f32 %v6116_v8, %v1254_v22  ;;  %v1715_v43 = vpack.c.bf16 %v1692_v47, %v1691_v6  ;;  %v1513_v6 = vand.u32 2147483647, %v6243_v25 }
 0x1a4   :  { %v4874_v57 = vpop.eup %4873  ;;  %v1451_v45 = vmul.f32 1.442695, %v1400_v44  ;;  %v1516_v31 = vadd.f32 1.0, %v4872_v61  ;;  %v1519_v23 = vmul.f32 -0.5, %v4872_v61  ;;  %v1512_v28 = vmul.f32 %v6243_v25, %v1511_v36 }
 0x1a5   :  { %v4876_v53 = vpop.eup %4875  ;;  %4879 = vpow2.f32 %v1417_v4  ;;  %v6269_v18 = vadd.f32 %v1255_v0, %v5763_v29  ;;  %1812 = vmatmul.bf16.gmra.mxu2 %v1715_v43  ;;  %v1669_v26 = vadd.f32 1.0, %v4874_v57  ;;  %v1672_v41 = vmul.f32 -0.5, %v4874_v57 }
 0x1a6   :  { %4881 = vpow2.f32 %v1451_v45  ;;  %v1662_v9 = vmul.f32 0.6931472, %v4876_v53  ;;  %v4878_v20 = vpop.eup %4877  ;;  %vm6275_vm15 = vcmp.lt.f32.partialorder %v1513_v6, 0.0004427343  ;;  %v1520_v7 = vadd.f32 1.0, %v1519_v23 }
 0x1a7   :  { %v1358_v55 = vand.u32 2147483647, %v6269_v18  ;;  %4883 = vlog2.f32 %v1516_v31  ;;  %v1509_v27 = vmul.f32 0.6931472, %v4878_v20  ;;  %v1522_v44 = vand.u32 2147483647, %v4872_v61 }
 0x1a8   :  { %v1668_v48 = vsel %vm1667_vm14, %v1665_v21, %v1662_v9  ;;  %4885 = vlog2.f32 %v1669_v26  ;;  %v1673_v4 = vadd.f32 1.0, %v1672_v41  ;;  %v1675_v0 = vand.u32 2147483647, %v4874_v57 }
 0x1a9   :  { %v1384_v19 = vsub.f32 0.0, %v1358_v55  ;;  %v1710_v29 = vadd.f32 %v1668_v48, %v1346_v54  ;;  %v1515_v12 = vsel %vm6275_vm15, %v1512_v28, %v1509_v27  ;;  %v1330_v21 = vmax.f32 %v6224_v63, 0.0 }
 0x1aa   :  { %v1257_v40 = vpop.f32.mrf.mxu1  ;;  %v1521_v53 = vmul.f32 %v4872_v61, %v1520_v7  ;;  %vm1523_vm1 = vcmp.lt.f32.partialorder %v1522_v44, 0.0004427343  ;;  %v1693_v9 = vadd.f32 %v1515_v12, %v1329_v15  ;;  %v1674_v20 = vmul.f32 %v4874_v57, %v1673_v4 }
 0x1ab   :  { %v6279_v37 = vpop.eup %4879  ;;  %v1419_v5 = vmul.f32 1.442695, %v1384_v19  ;;  %v1258_v47 = vadd.f32 %v6116_v8, %v1257_v40  ;;  %v1724_v38 = vpack.c.bf16 %v1710_v29, %v1709_v1  ;;  %vm6290_vm2 = vcmp.lt.f32.partialorder %v1675_v0, 0.0004427343 }
 0x1ac   :  { %v4882_v22 = vpop.eup %4881  ;;  %v1525_v25 = vadd.f32 1.0, %v6279_v37  ;;  %v1528_v61 = vmul.f32 -0.5, %v6279_v37  ;;  %v1347_v28 = vmax.f32 %v6227_v35, 0.0  ;;  %v1348_v50 = vmax.f32 %v6252_v60, 0.0 }
 0x1ad   :  { %v4884_v43 = vpop.eup %4883  ;;  %4887 = vpow2.f32 %v1419_v5  ;;  %v6286_v54 = vadd.f32 %v1258_v47, %v5793_v17  ;;  %1857 = vmatmul.bf16.gmra.mxu3 %v1724_v38  ;;  %v1678_v45 = vadd.f32 1.0, %v4882_v22  ;;  %v1681_v16 = vmul.f32 -0.5, %v4882_v22 }
 0x1ae   :  { %v1518_v31 = vmul.f32 0.6931472, %v4884_v43  ;;  %4889 = vlog2.f32 %v1525_v25  ;;  %v4886_v6 = vpop.eup %4885  ;;  %v1684_v26 = vand.u32 2147483647, %v4882_v22  ;;  %v1529_v0 = vadd.f32 1.0, %v1528_v61 }
 0x1af   :  { %v1359_v36 = vand.u32 2147483647, %v6286_v54  ;;  %4891 = vlog2.f32 %v1678_v45  ;;  %v1682_v17 = vadd.f32 1.0, %v1681_v16  ;;  %v1671_v27 = vmul.f32 0.6931472, %v4886_v6 }
 0x1b0   :  { %v1524_v23 = vsel %vm1523_vm1, %v1521_v53, %v1518_v31  ;;  %vm1685_vm3 = vcmp.lt.f32.partialorder %v1684_v26, 0.0004427343  ;;  %v1531_v45 = vand.u32 2147483647, %v6279_v37  ;;  %v1331_v61 = vmax.f32 %v6249_v56, 0.0 }
 0x1b1   :  { %v1385_v1 = vsub.f32 0.0, %v1359_v36  ;;  %v1694_v48 = vadd.f32 %v1524_v23, %v1330_v21  ;;  %v1677_v7 = vsel %vm6290_vm2, %v1674_v20, %v1671_v27  ;;  %v1683_v5 = vmul.f32 %v4882_v22, %v1682_v17 }
 0x1b2   :  { %v1259_v41 = vpop.f32.mrf.mxu1  ;;  %v1711_v43 = vadd.f32 %v1677_v7, %v1347_v28  ;;  %vm1532_vm4 = vcmp.lt.f32.partialorder %v1531_v45, 0.0004427343 }
 0x1b3   :  { %v4888_v19 = vpop.eup %4887  ;;  %v1421_v29 = vmul.f32 1.442695, %v1385_v1  ;;  %v1260_v15 = vadd.f32 %v6116_v8, %v1259_v41  ;;  %v1716_v40 = vpack.c.bf16 %v1694_v48, %v1693_v9 }
 0x1b4   :  { %v4890_v57 = vpop.eup %4889  ;;  %v1534_v47 = vadd.f32 1.0, %v4888_v19  ;;  %v1537_v12 = vmul.f32 -0.5, %v4888_v19  ;;  %v1540_v9 = vand.u32 2147483647, %v4888_v19 }
 0x1b5   :  { %v4892_v38 = vpop.eup %4891  ;;  %4893 = vpow2.f32 %v1421_v29  ;;  %v6301_v44 = vadd.f32 %v1260_v15, %v5796_v24  ;;  %1817 = vmatmul.bf16.gmra.mxu2 %v1716_v40  ;;  %v1527_v21 = vmul.f32 0.6931472, %v4890_v57  ;;  %v1530_v24 = vmul.f32 %v6279_v37, %v1529_v0 }
 0x1b6   :  { %v1680_v4 = vmul.f32 0.6931472, %v4892_v38  ;;  %4895 = vlog2.f32 %v1534_v47  ;;  %v1538_v53 = vadd.f32 1.0, %v1537_v12  ;;  %v1332_v37 = vmax.f32 %v6269_v18, 0.0 }
 0x1b7   :  { %v1360_v25 = vand.u32 2147483647, %v6301_v44  ;;  %v1533_v1 = vsel %vm1532_vm4, %v1530_v24, %v1527_v21  ;;  %vm1541_vm5 = vcmp.lt.f32.partialorder %v1540_v9, 0.0004427343 }
 0x1b8   :  { %v1686_v16 = vsel %vm1685_vm3, %v1683_v5, %v1680_v4  ;;  %v1539_v41 = vmul.f32 %v4888_v19, %v1538_v53  ;;  %v1695_v40 = vadd.f32 %v1533_v1, %v1331_v61 }
 0x1b9   :  { %v1386_v22 = vsub.f32 0.0, %v1360_v25  ;;  %v1712_v31 = vadd.f32 %v1686_v16, %v1348_v50 }
 0x1ba   :  { %v1262_v36 = vpop.f32.mrf.mxu1 }
 0x1bb   :  { %v4894_v6 = vpop.eup %4893  ;;  %v1423_v23 = vmul.f32 1.442695, %v1386_v22  ;;  %v1263_v20 = vadd.f32 %v6116_v8, %v1262_v36  ;;  %v1725_v55 = vpack.c.bf16 %v1712_v31, %v1711_v43 }
 0x1bc   :  { %v4896_v17 = vpop.eup %4895  ;;  %v1543_v48 = vadd.f32 1.0, %v4894_v6  ;;  %v1546_v5 = vmul.f32 -0.5, %v4894_v6  ;;  %v1549_v45 = vand.u32 2147483647, %v4894_v6 }
 0x1bd   :  { %4897 = vpow2.f32 %v1423_v23  ;;  %v6308_v27 = vadd.f32 %v1263_v20, %v5830_v3  ;;  %1862 = vmatmul.bf16.gmra.mxu3 %v1725_v55  ;;  %v1536_v26 = vmul.f32 0.6931472, %v4896_v17 }
 0x1be   :  { %4899 = vlog2.f32 %v1543_v48  ;;  %v1547_v25 = vadd.f32 1.0, %v1546_v5  ;;  %vm1550_vm6 = vcmp.lt.f32.partialorder %v1549_v45, 0.0004427343 }
 0x1bf   :  { %v1361_v29 = vand.u32 2147483647, %v6308_v27  ;;  %v1542_v15 = vsel %vm1541_vm5, %v1539_v41, %v1536_v26  ;;  %v1333_v26 = vmax.f32 %v6286_v54, 0.0  ;;  %v1334_v41 = vmax.f32 %v6301_v44, 0.0 }
 0x1c0   :  { %v1696_v28 = vadd.f32 %v1542_v15, %v1332_v37  ;;  %v1548_v53 = vmul.f32 %v4894_v6, %v1547_v25 }
 0x1c1   :  { %v1387_v57 = vsub.f32 0.0, %v1361_v29 }
 0x1c2   :  { %v1264_v50 = vpop.f32.mrf.mxu1  ;;  %v1717_v7 = vpack.c.bf16 %v1696_v28, %v1695_v40 }
 0x1c3   :  { %v4898_v3 = vpop.eup %4897  ;;  %v1425_v47 = vmul.f32 1.442695, %v1387_v57  ;;  %v1265_v38 = vadd.f32 %v6116_v8, %v1264_v50 }
 0x1c4   :  { %v1552_v19 = vadd.f32 1.0, %v4898_v3  ;;  %v4900_v12 = vpop.eup %4899  ;;  %v1555_v0 = vmul.f32 -0.5, %v4898_v3  ;;  %v1558_v36 = vand.u32 2147483647, %v4898_v3 }
 0x1c5   :  { %4901 = vpow2.f32 %v1425_v47  ;;  %v6315_v4 = vadd.f32 %v1265_v38, %v5833_v33  ;;  %1822 = vmatmul.bf16.gmra.mxu2 %v1717_v7  ;;  %v1545_v16 = vmul.f32 0.6931472, %v4900_v12 }
 0x1c6   :  { %4903 = vlog2.f32 %v1552_v19  ;;  %v1556_v22 = vadd.f32 1.0, %v1555_v0  ;;  %vm1559_vm0 = vcmp.lt.f32.partialorder %v1558_v36, 0.0004427343 }
 0x1c7   :  { %v1362_v43 = vand.u32 2147483647, %v6315_v4  ;;  %v1551_v20 = vsel %vm1550_vm6, %v1548_v53, %v1545_v16 }
 0x1c8   :  { %v1557_v48 = vmul.f32 %v4898_v3, %v1556_v22  ;;  %v1697_v37 = vadd.f32 %v1551_v20, %v1333_v26  ;;  %v1336_v26 = vmax.f32 %v6315_v4, 0.0 }
 0x1c9   :  { %v1388_v21 = vsub.f32 0.0, %v1362_v43 }
 0x1ca   :  { %v1267_v31 = vpop.f32.mrf.mxu1 }
 0x1cb   :  { %v4902_v24 = vpop.eup %4901  ;;  %v1427_v9 = vmul.f32 1.442695, %v1388_v21  ;;  %v1268_v23 = vadd.f32 %v6116_v8, %v1267_v31 }
 0x1cc   :  { %v4904_v33 = vpop.eup %4903  ;;  %v1561_v55 = vadd.f32 1.0, %v4902_v24  ;;  %v1564_v57 = vmul.f32 -0.5, %v4902_v24  ;;  %v1567_v0 = vand.u32 2147483647, %v4902_v24 }
 0x1cd   :  { %4905 = vpow2.f32 %v1427_v9  ;;  %v6320_v17 = vadd.f32 %v1268_v23, %v5845_v10  ;;  %v1554_v1 = vmul.f32 0.6931472, %v4904_v33 }
 0x1ce   :  { %4907 = vlog2.f32 %v1561_v55  ;;  %v1565_v19 = vadd.f32 1.0, %v1564_v57  ;;  %vm6331_vm7 = vcmp.lt.f32.partialorder %v1567_v0, 0.0004427343 }
 0x1cf   :  { %v1363_v6 = vand.u32 2147483647, %v6320_v17  ;;  %v1560_v61 = vsel %vm1559_vm0, %v1557_v48, %v1554_v1  ;;  %v4496_v1 = vld [vmem:[#allocation4 + $0x38] sm:$0xff]  ;;  %v1335_v48 = vmax.f32 %v6308_v27, 0.0 }
 0x1d0   :  { %v1698_v29 = vadd.f32 %v1560_v61, %v1334_v41  ;;  %v1566_v21 = vmul.f32 %v4902_v24, %v1565_v19  ;;  %2339 = vmatpush.bf16.msrb.mxu3 %v4496_v1 }
 0x1d1   :  { %v1389_v15 = vsub.f32 0.0, %v1363_v6 }
 0x1d2   :  { %v1269_v40 = vpop.f32.mrf.mxu1  ;;  %v1718_v28 = vpack.c.bf16 %v1698_v29, %v1697_v37 }
 0x1d3   :  { %v4906_v50 = vpop.eup %4905  ;;  %v1429_v10 = vmul.f32 1.442695, %v1389_v15  ;;  %v1270_v7 = vadd.f32 %v6116_v8, %v1269_v40 }
 0x1d4   :  { %v1570_v5 = vadd.f32 1.0, %v4906_v50  ;;  %v4908_v3 = vpop.eup %4907  ;;  %v1573_v38 = vmul.f32 -0.5, %v4906_v50  ;;  %v1576_v22 = vand.u32 2147483647, %v4906_v50 }
 0x1d5   :  { %4909 = vpow2.f32 %v1429_v10  ;;  %v6327_v47 = vadd.f32 %v1270_v7, %v5848_v14  ;;  %1827 = vmatmul.bf16.gmra.mxu2 %v1718_v28  ;;  %v1563_v25 = vmul.f32 0.6931472, %v4908_v3 }
 0x1d6   :  { %4911 = vlog2.f32 %v1570_v5  ;;  %v1574_v45 = vadd.f32 1.0, %v1573_v38  ;;  %vm1577_vm8 = vcmp.lt.f32.partialorder %v1576_v22, 0.0004427343  ;;  %v4495_v38 = vld [vmem:[#allocation4 + $0x30] sm:$0xff] }
 0x1d7   :  { %v1364_v12 = vand.u32 2147483647, %v6327_v47  ;;  %v1569_v23 = vsel %vm6331_vm7, %v1566_v21, %v1563_v25  ;;  %2340 = vmatpush.bf16.msrb.mxu3 %v4495_v38  ;;  %v1338_v1 = vmax.f32 %v6327_v47, 0.0 }
 0x1d8   :  { %v1575_v24 = vmul.f32 %v4906_v50, %v1574_v45  ;;  %v1699_v61 = vadd.f32 %v1569_v23, %v1335_v48 }
 0x1d9   :  { %v1390_v43 = vsub.f32 0.0, %v1364_v12 }
 0x1da   :  { %v1272_v16 = vpop.f32.mrf.mxu1 }
 0x1db   :  { %v4910_v31 = vpop.eup %4909  ;;  %v1431_v53 = vmul.f32 1.442695, %v1390_v43  ;;  %v1273_v36 = vadd.f32 %v6116_v8, %v1272_v16 }
 0x1dc   :  { %v4912_v9 = vpop.eup %4911  ;;  %v1579_v33 = vadd.f32 1.0, %v4910_v31  ;;  %v1585_v0 = vand.u32 2147483647, %v4910_v31 }
 0x1dd   :  { %4913 = vpow2.f32 %v1431_v53  ;;  %v6338_v20 = vadd.f32 %v1273_v36, %v5858_v49  ;;  %v1572_v55 = vmul.f32 0.6931472, %v4912_v9  ;;  %v1582_v49 = vmul.f32 -0.5, %v4910_v31 }
 0x1de   :  { %4915 = vlog2.f32 %v1579_v33  ;;  %vm1586_vm9 = vcmp.lt.f32.partialorder %v1585_v0, 0.0004427343 }
 0x1df   :  { %v1365_v41 = vand.u32 2147483647, %v6338_v20  ;;  %v1578_v6 = vsel %vm1577_vm8, %v1575_v24, %v1572_v55  ;;  %v1583_v19 = vadd.f32 1.0, %v1582_v49 }
 0x1e0   :  { %v1700_v37 = vadd.f32 %v1578_v6, %v1336_v26 }
 0x1e1   :  { %v1391_v29 = vsub.f32 0.0, %v1365_v41 }
 0x1e2   :  { %v1274_v15 = vpop.f32.mrf.mxu1  ;;  %v1719_v40 = vpack.c.bf16 %v1700_v37, %v1699_v61 }
 0x1e3   :  { %v4914_v28 = vpop.eup %4913  ;;  %v1433_v57 = vmul.f32 1.442695, %v1391_v29  ;;  %v1275_v50 = vadd.f32 %v6116_v8, %v1274_v15  ;;  %v1584_v8 = vmul.f32 %v4910_v31, %v1583_v19  ;;  %v1337_v31 = vmax.f32 %v6320_v17, 0.0 }
 0x1e4   :  { %v1588_v10 = vadd.f32 1.0, %v4914_v28  ;;  %v4916_v7 = vpop.eup %4915  ;;  %v1591_v3 = vmul.f32 -0.5, %v4914_v28  ;;  %v1594_v21 = vand.u32 2147483647, %v4914_v28 }
 0x1e5   :  { %4917 = vpow2.f32 %v1433_v57  ;;  %v6345_v5 = vadd.f32 %v1275_v50, %v5861_v52  ;;  %1832 = vmatmul.bf16.gmra.mxu2 %v1719_v40  ;;  %v1581_v25 = vmul.f32 0.6931472, %v4916_v7  ;;  %v5351_v52 = vld [vmem:[%s7376_s4] ss:$0 sm:$0xff] }
 0x1e6   :  { %4919 = vlog2.f32 %v1588_v10  ;;  %v1592_v45 = vadd.f32 1.0, %v1591_v3  ;;  %vm1595_vm10 = vcmp.lt.f32.partialorder %v1594_v21, 0.0004427343 }
 0x1e7   :  { %v1366_v12 = vand.u32 2147483647, %v6345_v5  ;;  %v1587_v9 = vsel %vm1586_vm9, %v1584_v8, %v1581_v25 }
 0x1e8   :  { %v1593_v24 = vmul.f32 %v4914_v28, %v1592_v45  ;;  %v1701_v41 = vadd.f32 %v1587_v9, %v1337_v31 }
 0x1e9   :  { %v1392_v43 = vsub.f32 0.0, %v1366_v12 }
 0x1ea   :  { %v1277_v16 = vpop.f32.mrf.mxu1 }
 0x1eb   :  { %v4918_v22 = vpop.eup %4917  ;;  %v1435_v53 = vmul.f32 1.442695, %v1392_v43  ;;  %v1278_v36 = vadd.f32 %v5351_v52, %v1277_v16 }
 0x1ec   :  { %v4920_v14 = vpop.eup %4919  ;;  %v1597_v23 = vadd.f32 1.0, %v4918_v22  ;;  %v1600_v49 = vmul.f32 -0.5, %v4918_v22  ;;  %v1603_v38 = vand.u32 2147483647, %v4918_v22 }
 0x1ed   :  { %4921 = vpow2.f32 %v1435_v53  ;;  %v6352_v33 = vadd.f32 %v1278_v36, %v5871_v62  ;;  %v1590_v55 = vmul.f32 0.6931472, %v4920_v14  ;;  %v1339_v36 = vmax.f32 %v6338_v20, 0.0 }
 0x1ee   :  { %4923 = vlog2.f32 %v1597_v23  ;;  %v1601_v3 = vadd.f32 1.0, %v1600_v49  ;;  %vm1604_vm11 = vcmp.lt.f32.partialorder %v1603_v38, 0.0004427343  ;;  %v1340_v14 = vmax.f32 %v6345_v5, 0.0 }
 0x1ef   :  { %v1367_v48 = vand.u32 2147483647, %v6352_v33  ;;  %v1596_v26 = vsel %vm1595_vm10, %v1593_v24, %v1590_v55  ;;  %v4494_v24 = vld [vmem:[#allocation4 + $0x28] sm:$0xff] }
 0x1f0   :  { %v1702_v6 = vadd.f32 %v1596_v26, %v1338_v1  ;;  %v1602_v16 = vmul.f32 %v4918_v22, %v1601_v3  ;;  %2341 = vmatpush.bf16.msrb.mxu3 %v4494_v24  ;;  %v4491_v3 = vld [vmem:[#allocation4 + $0x10] sm:$0xff] }
 0x1f1   :  { %v1393_v61 = vsub.f32 0.0, %v1367_v48  ;;  %v6366_v48 = vld [vmem:[%s7378_s6] ss:$0 sm:$0xff] }
 0x1f2   :  { %v1279_v37 = vpop.f32.mrf.mxu1  ;;  %v1720_v29 = vpack.c.bf16 %v1702_v6, %v1701_v41  ;;  %v4493_v41 = vld [vmem:[#allocation4 + $0x20] sm:$0xff] }
 0x1f3   :  { %v4922_v15 = vpop.eup %4921  ;;  %v1437_v40 = vmul.f32 1.442695, %v1393_v61  ;;  %v1280_v62 = vadd.f32 %v5351_v52, %v1279_v37 }
 0x1f4   :  { %v1606_v57 = vadd.f32 1.0, %v4922_v15  ;;  %v1609_v50 = vmul.f32 -0.5, %v4922_v15  ;;  %v4924_v10 = vpop.eup %4923  ;;  %v1612_v25 = vand.u32 2147483647, %v4922_v15  ;;  %2342 = vmatpush.bf16.msrb.mxu3 %v4493_v41 }
 0x1f5   :  { %4925 = vpow2.f32 %v1437_v40  ;;  %v6358_v28 = vadd.f32 %v1280_v62, %v5874_v51  ;;  %1837 = vmatmul.bf16.gmra.mxu2 %v1720_v29  ;;  %v1599_v12 = vmul.f32 0.6931472, %v4924_v10 }
 0x1f6   :  { %4927 = vlog2.f32 %v1606_v57  ;;  %v1610_v0 = vadd.f32 1.0, %v1609_v50  ;;  %vm1613_vm12 = vcmp.lt.f32.partialorder %v1612_v25, 0.0004427343  ;;  %v4492_v57 = vld [vmem:[#allocation4 + $0x18] sm:$0xff] }
 0x1f7   :  { %v1368_v7 = vand.u32 2147483647, %v6358_v28  ;;  %v1605_v51 = vsel %vm1604_vm11, %v1602_v16, %v1599_v12  ;;  %v1341_v16 = vmax.f32 %v6352_v33, 0.0 }
 0x1f8   :  { %v1611_v52 = vmul.f32 %v4922_v15, %v1610_v0  ;;  %v1703_v23 = vadd.f32 %v1605_v51, %v1339_v36  ;;  %2343 = vmatpush.bf16.msrb.mxu3 %v4492_v57 }
 0x1f9   :  { %v1394_v19 = vsub.f32 0.0, %v1368_v7 }
 0x1fb   :  { %v4926_v43 = vpop.eup %4925  ;;  %v1439_v45 = vmul.f32 1.442695, %v1394_v19 }
 0x1fc   :  { %v4928_v8 = vpop.eup %4927  ;;  %v1615_v21 = vadd.f32 1.0, %v4926_v43  ;;  %v1618_v22 = vmul.f32 -0.5, %v4926_v43  ;;  %v1621_v40 = vand.u32 2147483647, %v4926_v43  ;;  %2344 = vmatpush.bf16.msrb.mxu3 %v4491_v3 }
 0x1fd   :  { %4929 = vpow2.f32 %v1439_v45  ;;  %v1608_v53 = vmul.f32 0.6931472, %v4928_v8  ;;  %v1342_v8 = vmax.f32 %v6358_v28, 0.0 }
 0x1fe   :  { %4931 = vlog2.f32 %v1615_v21  ;;  %v1619_v29 = vadd.f32 1.0, %v1618_v22  ;;  %vm1622_vm13 = vcmp.lt.f32.partialorder %v1621_v40, 0.0004427343 }
 0x1ff   :  { %v1614_v9 = vsel %vm1613_vm12, %v1611_v52, %v1608_v53  ;;  %v4490_v53 = vld [vmem:[#allocation4 + $0x8] sm:$0xff] }
 0x200   :  { %v1704_v55 = vadd.f32 %v1614_v9, %v1340_v14  ;;  %v1620_v7 = vmul.f32 %v4926_v43, %v1619_v29  ;;  %2345 = vmatpush.bf16.msrb.mxu3 %v4490_v53 }
 0x202   :  { %v1721_v31 = vpack.c.bf16 %v1704_v55, %v1703_v23  ;;  %v4489_v55 = vld [vmem:[#allocation4] sm:$0xff] }
 0x203   :  { %v4930_v1 = vpop.eup %4929 }
 0x204   :  { %v1624_v26 = vadd.f32 1.0, %v4930_v1  ;;  %v1627_v6 = vmul.f32 -0.5, %v4930_v1  ;;  %v4932_v61 = vpop.eup %4931  ;;  %v1630_v10 = vand.u32 2147483647, %v4930_v1  ;;  %2346 = vmatpush.bf16.msrb.mxu3 %v4489_v55 }
 0x205   :  { %1842 = vmatmul.bf16.gmra.mxu2 %v1721_v31  ;;  %v1617_v62 = vmul.f32 0.6931472, %v4932_v61 }
 0x206   :  { %4933 = vlog2.f32 %v1624_v26  ;;  %v1628_v49 = vadd.f32 1.0, %v1627_v6  ;;  %vm1631_vm14 = vcmp.lt.f32.partialorder %v1630_v10, 0.0004427343 }
 0x207   :  { %v1803_v37 = vpop.f32.mrf.mxu2  ;;  %v1623_v12 = vsel %vm1622_vm13, %v1620_v7, %v1617_v62 }
 0x208   :  { %v6369_v15 = vadd.f32 %v6366_v48, %v1803_v37  ;;  %v1629_v25 = vmul.f32 %v4930_v1, %v1628_v49  ;;  %v1705_v52 = vadd.f32 %v1623_v12, %v1341_v16 }
 0x20a   :  { %v1894_v50 = vand.u32 2147483647, %v6369_v15 }
 0x20c   :  { %v4934_v38 = vpop.eup %4933  ;;  %v1920_v19 = vsub.f32 0.0, %v1894_v50 }
 0x20d   :  { %v1626_v0 = vmul.f32 0.6931472, %v4934_v38 }
 0x20e   :  { %v1946_v45 = vmul.f32 1.442695, %v1920_v19 }
 0x20f   :  { %v1805_v21 = vpop.f32.mrf.mxu2  ;;  %v1632_v51 = vsel %vm1631_vm14, %v1629_v25, %v1626_v0 }
 0x210   :  { %4935 = vpow2.f32 %v1946_v45  ;;  %v1806_v43 = vadd.f32 %v6366_v48, %v1805_v21  ;;  %v1706_v36 = vadd.f32 %v1632_v51, %v1342_v8 }
 0x212   :  { %v1895_v14 = vand.u32 2147483647, %v1806_v43  ;;  %v1722_v9 = vpack.c.bf16 %v1706_v36, %v1705_v52  ;;  %v1868_v36 = vmax.f32 %v6369_v15, 0.0 }
 0x214   :  { %v1921_v23 = vsub.f32 0.0, %v1895_v14  ;;  %v1869_v14 = vmax.f32 %v1806_v43, 0.0 }
 0x215   :  { %1847 = vmatmul.bf16.gmra.mxu2 %v1722_v9 }
 0x216   :  { %v4936_v24 = vpop.eup %4935  ;;  %v1948_v31 = vmul.f32 1.442695, %v1921_v23 }
 0x217   :  { %v1998_v1 = vadd.f32 1.0, %v4936_v24  ;;  %v1808_v22 = vpop.f32.mrf.mxu2  ;;  %v2001_v37 = vmul.f32 -0.5, %v4936_v24  ;;  %v2004_v3 = vand.u32 2147483647, %v4936_v24 }
 0x218   :  { %4937 = vpow2.f32 %v1948_v31  ;;  %v6376_v26 = vadd.f32 %v6366_v48, %v1808_v22 }
 0x219   :  { %4939 = vlog2.f32 %v1998_v1  ;;  %v2002_v10 = vadd.f32 1.0, %v2001_v37  ;;  %vm2005_vm15 = vcmp.lt.f32.partialorder %v2004_v3, 0.0004427343 }
 0x21a   :  { %v1896_v41 = vand.u32 2147483647, %v6376_v26 }
 0x21b   :  { %v2003_v25 = vmul.f32 %v4936_v24, %v2002_v10 }
 0x21c   :  { %v1922_v6 = vsub.f32 0.0, %v1896_v41 }
 0x21e   :  { %v4938_v61 = vpop.eup %4937  ;;  %v1950_v40 = vmul.f32 1.442695, %v1922_v6 }
 0x21f   :  { %v2007_v29 = vadd.f32 1.0, %v4938_v61  ;;  %v1810_v62 = vpop.f32.mrf.mxu2  ;;  %v2010_v49 = vmul.f32 -0.5, %v4938_v61  ;;  %v4940_v50 = vpop.eup %4939  ;;  %v2013_v0 = vand.u32 2147483647, %v4938_v61 }
 0x220   :  { %v6380_v57 = vadd.f32 %v6366_v48, %v1810_v62  ;;  %v2000_v38 = vmul.f32 0.6931472, %v4940_v50  ;;  %v4504_v62 = vld [vmem:[#allocation6 + $0x38] sm:$0xff] }
 0x221   :  { %4941 = vlog2.f32 %v2007_v29  ;;  %v2011_v19 = vadd.f32 1.0, %v2010_v49  ;;  %vm2014_vm1 = vcmp.lt.f32.partialorder %v2013_v0, 0.0004427343  ;;  %2910 = vmatpush.bf16.msrb.mxu0 %v4504_v62 }
 0x222   :  { %v1897_v7 = vand.u32 2147483647, %v6380_v57  ;;  %4943 = vpow2.f32 %v1950_v40  ;;  %v2006_v8 = vsel %vm2005_vm15, %v2003_v25, %v2000_v38 }
 0x223   :  { %v2012_v51 = vmul.f32 %v4938_v61, %v2011_v19  ;;  %v2232_v55 = vadd.f32 %v2006_v8, %v1868_v36 }
 0x224   :  { %v1923_v12 = vsub.f32 0.0, %v1897_v7 }
 0x226   :  { %v1952_v45 = vmul.f32 1.442695, %v1923_v12 }
 0x227   :  { %v4942_v16 = vpop.eup %4941 }
 0x228   :  { %v2009_v21 = vmul.f32 0.6931472, %v4942_v16  ;;  %4945 = vpow2.f32 %v1952_v45  ;;  %v1813_v53 = vpop.f32.mrf.mxu2  ;;  %v4944_v52 = vpop.eup %4943 }
 0x229   :  { %v6385_v9 = vadd.f32 %v6366_v48, %v1813_v53  ;;  %v2016_v1 = vadd.f32 1.0, %v4944_v52  ;;  %v2019_v40 = vmul.f32 -0.5, %v4944_v52  ;;  %v2022_v19 = vand.u32 2147483647, %v4944_v52 }
 0x22a   :  { %v2015_v23 = vsel %vm2014_vm1, %v2012_v51, %v2009_v21 }
 0x22b   :  { %v2233_v31 = vadd.f32 %v2015_v23, %v1869_v14  ;;  %v1898_v24 = vand.u32 2147483647, %v6385_v9  ;;  %4947 = vlog2.f32 %v2016_v1  ;;  %v2020_v3 = vadd.f32 1.0, %v2019_v40 }
 0x22c   :  { %vm2023_vm2 = vcmp.lt.f32.partialorder %v2022_v19, 0.0004427343  ;;  %v1871_v14 = vmax.f32 %v6380_v57, 0.0 }
 0x22d   :  { %v2258_v22 = vpack.c.bf16 %v2233_v31, %v2232_v55  ;;  %v1924_v6 = vsub.f32 0.0, %v1898_v24  ;;  %v2021_v21 = vmul.f32 %v4944_v52, %v2020_v3  ;;  %v1870_v31 = vmax.f32 %v6376_v26, 0.0 }
 0x22e   :  { %v4946_v41 = vpop.eup %4945 }
 0x22f   :  { %2347 = vmatmul.bf16.vlgmr.msrb.gmra.mxu3 %v2258_v22  ;;  %v2025_v15 = vadd.f32 1.0, %v4946_v41  ;;  %v1954_v43 = vmul.f32 1.442695, %v1924_v6  ;;  %v2028_v49 = vmul.f32 -0.5, %v4946_v41  ;;  %v2031_v45 = vand.u32 2147483647, %v4946_v41 }
 0x230   :  { %v1815_v61 = vpop.f32.mrf.mxu2 }
 0x231   :  { %v6389_v37 = vadd.f32 %v6366_v48, %v1815_v61  ;;  %4949 = vlog2.f32 %v2025_v15  ;;  %v4948_v10 = vpop.eup %4947  ;;  %v2029_v12 = vadd.f32 1.0, %v2028_v49  ;;  %vm2032_vm3 = vcmp.lt.f32.partialorder %v2031_v45, 0.0004427343 }
 0x232   :  { %4951 = vpow2.f32 %v1954_v43  ;;  %v2018_v25 = vmul.f32 0.6931472, %v4948_v10 }
 0x233   :  { %v1899_v29 = vand.u32 2147483647, %v6389_v37  ;;  %v2030_v53 = vmul.f32 %v4946_v41, %v2029_v12 }
 0x234   :  { %v2024_v55 = vsel %vm2023_vm2, %v2021_v21, %v2018_v25 }
 0x235   :  { %v1925_v50 = vsub.f32 0.0, %v1899_v29  ;;  %v2234_v61 = vadd.f32 %v2024_v55, %v1870_v31  ;;  %v4503_v31 = vld [vmem:[#allocation6 + $0x30] sm:$0xff] }
 0x236   :  { %2911 = vmatpush.bf16.msrb.mxu0 %v4503_v31  ;;  %v4502_v31 = vld [vmem:[#allocation6 + $0x28] sm:$0xff] }
 0x237   :  { %v1956_v7 = vmul.f32 1.442695, %v1925_v50  ;;  %v4950_v16 = vpop.eup %4949 }
 0x238   :  { %v1818_v38 = vpop.f32.mrf.mxu2  ;;  %v2027_v51 = vmul.f32 0.6931472, %v4950_v16  ;;  %v4952_v36 = vpop.eup %4951 }
 0x239   :  { %4953 = vpow2.f32 %v1956_v7  ;;  %v6393_v0 = vadd.f32 %v6366_v48, %v1818_v38  ;;  %v2034_v15 = vadd.f32 1.0, %v4952_v36  ;;  %v2037_v50 = vmul.f32 -0.5, %v4952_v36 }
 0x23a   :  { %v2033_v24 = vsel %vm2032_vm3, %v2030_v53, %v2027_v51  ;;  %v2040_v45 = vand.u32 2147483647, %v4952_v36  ;;  %2912 = vmatpush.bf16.msrb.mxu0 %v4502_v31 }
 0x23b   :  { %v1900_v8 = vand.u32 2147483647, %v6393_v0  ;;  %v2235_v22 = vadd.f32 %v2033_v24, %v1871_v14  ;;  %4955 = vlog2.f32 %v2034_v15  ;;  %v2038_v12 = vadd.f32 1.0, %v2037_v50 }
 0x23c   :  { %v1873_v24 = vmax.f32 %v6389_v37, 0.0  ;;  %vm2041_vm5 = vcmp.lt.f32.partialorder %v2040_v45, 0.0004427343 }
 0x23d   :  { %v1926_v23 = vsub.f32 0.0, %v1900_v8  ;;  %v2259_v29 = vpack.c.bf16 %v2235_v22, %v2234_v61  ;;  %v2039_v55 = vmul.f32 %v4952_v36, %v2038_v12  ;;  %v1872_v61 = vmax.f32 %v6385_v9, 0.0 }
 0x23f   :  { %v4954_v1 = vpop.eup %4953  ;;  %v1958_v43 = vmul.f32 1.442695, %v1926_v23  ;;  %2352 = vmatmul.bf16.gmra.mxu3 %v2259_v29 }
 0x240   :  { %v1820_v6 = vpop.f32.mrf.mxu2  ;;  %v2043_v41 = vadd.f32 1.0, %v4954_v1  ;;  %v2046_v26 = vmul.f32 -0.5, %v4954_v1  ;;  %v2049_v25 = vand.u32 2147483647, %v4954_v1 }
 0x241   :  { %v6399_v52 = vadd.f32 %v6366_v48, %v1820_v6  ;;  %4957 = vpow2.f32 %v1958_v43  ;;  %v4956_v10 = vpop.eup %4955 }
 0x242   :  { %4959 = vlog2.f32 %v2043_v41  ;;  %v2047_v38 = vadd.f32 1.0, %v2046_v26  ;;  %v2036_v21 = vmul.f32 0.6931472, %v4956_v10  ;;  %vm2050_vm4 = vcmp.lt.f32.partialorder %v2049_v25, 0.0004427343 }
 0x243   :  { %v1901_v40 = vand.u32 2147483647, %v6399_v52 }
 0x244   :  { %v2048_v53 = vmul.f32 %v4954_v1, %v2047_v38  ;;  %v2042_v15 = vsel %vm2041_vm5, %v2039_v55, %v2036_v21 }
 0x245   :  { %v1927_v57 = vsub.f32 0.0, %v1901_v40  ;;  %v2236_v36 = vadd.f32 %v2042_v15, %v1872_v61 }
 0x247   :  { %v1960_v62 = vmul.f32 1.442695, %v1927_v57  ;;  %v4958_v7 = vpop.eup %4957 }
 0x248   :  { %v1823_v49 = vpop.f32.mrf.mxu2  ;;  %v4960_v19 = vpop.eup %4959  ;;  %v2052_v16 = vadd.f32 1.0, %v4958_v7  ;;  %v2055_v57 = vmul.f32 -0.5, %v4958_v7  ;;  %v2058_v25 = vand.u32 2147483647, %v4958_v7 }
 0x249   :  { %v6403_v3 = vadd.f32 %v6366_v48, %v1823_v49  ;;  %4961 = vpow2.f32 %v1960_v62  ;;  %v2045_v51 = vmul.f32 0.6931472, %v4960_v19 }
 0x24a   :  { %4963 = vlog2.f32 %v2052_v16  ;;  %v2056_v19 = vadd.f32 1.0, %v2055_v57  ;;  %vm2059_vm0 = vcmp.lt.f32.partialorder %v2058_v25, 0.0004427343 }
 0x24b   :  { %v1902_v8 = vand.u32 2147483647, %v6403_v3  ;;  %v2051_v22 = vsel %vm2050_vm4, %v2048_v53, %v2045_v51 }
 0x24c   :  { %v2237_v1 = vadd.f32 %v2051_v22, %v1873_v24  ;;  %v1875_v24 = vmax.f32 %v6399_v52, 0.0 }
 0x24d   :  { %v1928_v14 = vsub.f32 0.0, %v1902_v8 }
 0x24e   :  { %v2260_v26 = vpack.c.bf16 %v2237_v1, %v2236_v36 }
 0x24f   :  { %v4962_v6 = vpop.eup %4961  ;;  %v1962_v29 = vmul.f32 1.442695, %v1928_v14 }
 0x250   :  { %v1825_v23 = vpop.f32.mrf.mxu2  ;;  %v2061_v43 = vadd.f32 1.0, %v4962_v6  ;;  %v2064_v40 = vmul.f32 -0.5, %v4962_v6  ;;  %v4964_v62 = vpop.eup %4963  ;;  %v2067_v50 = vand.u32 2147483647, %v4962_v6  ;;  %2357 = vmatmul.bf16.gmra.mxu3 %v2260_v26 }
 0x251   :  { %v6409_v41 = vadd.f32 %v6366_v48, %v1825_v23  ;;  %v2054_v8 = vmul.f32 0.6931472, %v4964_v62  ;;  %v2057_v23 = vmul.f32 %v4958_v7, %v2056_v19 }
 0x252   :  { %4965 = vlog2.f32 %v2061_v43  ;;  %v2065_v49 = vadd.f32 1.0, %v2064_v40  ;;  %vm2068_vm6 = vcmp.lt.f32.partialorder %v2067_v50, 0.0004427343  ;;  %v1874_v43 = vmax.f32 %v6393_v0, 0.0 }
 0x253   :  { %4967 = vpow2.f32 %v1962_v29  ;;  %v1903_v37 = vand.u32 2147483647, %v6409_v41  ;;  %v2060_v61 = vsel %vm2059_vm0, %v2057_v23, %v2054_v8  ;;  %v1877_v31 = vmax.f32 %v6409_v41, 0.0 }
 0x254   :  { %v2066_v51 = vmul.f32 %v4962_v6, %v2065_v49  ;;  %v2238_v36 = vadd.f32 %v2060_v61, %v1874_v43 }
 0x255   :  { %v1929_v10 = vsub.f32 0.0, %v1903_v37 }
 0x257   :  { %v1964_v45 = vmul.f32 1.442695, %v1929_v10 }
 0x258   :  { %v1828_v9 = vpop.f32.mrf.mxu2  ;;  %v4966_v12 = vpop.eup %4965 }
 0x259   :  { %v6413_v38 = vadd.f32 %v6366_v48, %v1828_v9  ;;  %v2063_v21 = vmul.f32 0.6931472, %v4966_v12  ;;  %v4968_v53 = vpop.eup %4967  ;;  %4969 = vpow2.f32 %v1964_v45 }
 0x25a   :  { %v2070_v22 = vadd.f32 1.0, %v4968_v53  ;;  %v2073_v26 = vmul.f32 -0.5, %v4968_v53  ;;  %v2076_v45 = vand.u32 2147483647, %v4968_v53 }
 0x25b   :  { %v1904_v16 = vand.u32 2147483647, %v6413_v38  ;;  %v2069_v55 = vsel %vm2068_vm6, %v2066_v51, %v2063_v21 }
 0x25c   :  { %v2239_v29 = vadd.f32 %v2069_v55, %v1875_v24  ;;  %4971 = vlog2.f32 %v2070_v22  ;;  %v2074_v19 = vadd.f32 1.0, %v2073_v26  ;;  %vm2077_vm8 = vcmp.lt.f32.partialorder %v2076_v45, 0.0004427343 }
 0x25d   :  { %v1930_v14 = vsub.f32 0.0, %v1904_v16 }
 0x25e   :  { %v2261_v52 = vpack.c.bf16 %v2239_v29, %v2238_v36  ;;  %v2075_v23 = vmul.f32 %v4968_v53, %v2074_v19  ;;  %v1876_v29 = vmax.f32 %v6403_v3, 0.0 }
 0x25f   :  { %v1966_v1 = vmul.f32 1.442695, %v1930_v14  ;;  %v4970_v40 = vpop.eup %4969 }
 0x260   :  { %v1830_v15 = vpop.f32.mrf.mxu2  ;;  %v2079_v7 = vadd.f32 1.0, %v4970_v40  ;;  %v2082_v57 = vmul.f32 -0.5, %v4970_v40  ;;  %2362 = vmatmul.bf16.gmra.mxu3 %v2261_v52  ;;  %v2085_v12 = vand.u32 2147483647, %v4970_v40 }
 0x261   :  { %v6419_v6 = vadd.f32 %v6366_v48, %v1830_v15  ;;  %4973 = vpow2.f32 %v1966_v1 }
 0x262   :  { %4975 = vlog2.f32 %v2079_v7  ;;  %v4972_v9 = vpop.eup %4971  ;;  %v2083_v0 = vadd.f32 1.0, %v2082_v57  ;;  %vm2086_vm7 = vcmp.lt.f32.partialorder %v2085_v12, 0.0004427343 }
 0x263   :  { %v1905_v37 = vand.u32 2147483647, %v6419_v6  ;;  %v2072_v8 = vmul.f32 0.6931472, %v4972_v9  ;;  %v6432_v9 = vpop.f32.mrf.mxu3 }
 0x264   :  { %v2084_v14 = vmul.f32 %v4970_v40, %v2083_v0 }
 0x265   :  { %v1931_v62 = vsub.f32 0.0, %v1905_v37  ;;  %v2078_v61 = vsel %vm2077_vm8, %v2075_v23, %v2072_v8 }
 0x266   :  { %v2240_v40 = vadd.f32 %v2078_v61, %v1876_v29 }
 0x267   :  { %v1968_v50 = vmul.f32 1.442695, %v1931_v62  ;;  %v4974_v25 = vpop.eup %4973  ;;  %v4501_v62 = vld [vmem:[#allocation6 + $0x20] sm:$0xff] }
 0x268   :  { %v1833_v49 = vpop.f32.mrf.mxu2  ;;  %v4976_v16 = vpop.eup %4975  ;;  %v2088_v22 = vadd.f32 1.0, %v4974_v25  ;;  %v2091_v26 = vmul.f32 -0.5, %v4974_v25  ;;  %2913 = vmatpush.bf16.msrb.mxu0 %v4501_v62  ;;  %v2094_v8 = vand.u32 2147483647, %v4974_v25 }
 0x269   :  { %v6423_v10 = vadd.f32 %v6366_v48, %v1833_v49  ;;  %4977 = vpow2.f32 %v1968_v50  ;;  %v2081_v51 = vmul.f32 0.6931472, %v4976_v16 }
 0x26a   :  { %4979 = vlog2.f32 %v2088_v22  ;;  %v2092_v45 = vadd.f32 1.0, %v2091_v26  ;;  %vm2095_vm10 = vcmp.lt.f32.partialorder %v2094_v8, 0.0004427343 }
 0x26b   :  { %v1906_v21 = vand.u32 2147483647, %v6423_v10  ;;  %v2087_v24 = vsel %vm2086_vm7, %v2084_v14, %v2081_v51 }
 0x26c   :  { %v2241_v1 = vadd.f32 %v2087_v24, %v1877_v31  ;;  %v2093_v31 = vmul.f32 %v4974_v25, %v2092_v45 }
 0x26d   :  { %v1932_v55 = vsub.f32 0.0, %v1906_v21 }
 0x26e   :  { %v2262_v52 = vpack.c.bf16 %v2241_v1, %v2240_v40  ;;  %v1878_v40 = vmax.f32 %v6413_v38, 0.0 }
 0x26f   :  { %v4978_v43 = vpop.eup %4977  ;;  %v1970_v57 = vmul.f32 1.442695, %v1932_v55 }
 0x270   :  { %v1835_v15 = vpop.f32.mrf.mxu2  ;;  %v2097_v7 = vadd.f32 1.0, %v4978_v43  ;;  %v2100_v37 = vmul.f32 -0.5, %v4978_v43  ;;  %v4980_v50 = vpop.eup %4979  ;;  %v2103_v19 = vand.u32 2147483647, %v4978_v43  ;;  %2367 = vmatmul.bf16.gmra.mxu3 %v2262_v52 }
 0x271   :  { %v6429_v36 = vadd.f32 %v6366_v48, %v1835_v15  ;;  %v2090_v14 = vmul.f32 0.6931472, %v4980_v50  ;;  %v1879_v15 = vmax.f32 %v6419_v6, 0.0  ;;  %v4500_v6 = vld [vmem:[#allocation6 + $0x18] sm:$0xff] }
 0x272   :  { %4981 = vlog2.f32 %v2097_v7  ;;  %v2101_v3 = vadd.f32 1.0, %v2100_v37  ;;  %vm2104_vm9 = vcmp.lt.f32.partialorder %v2103_v19, 0.0004427343  ;;  %2914 = vmatpush.bf16.msrb.mxu0 %v4500_v6 }
 0x273   :  { %v1907_v53 = vand.u32 2147483647, %v6429_v36  ;;  %4983 = vpow2.f32 %v1970_v57  ;;  %v2096_v1 = vsel %vm2095_vm10, %v2093_v31, %v2090_v14 }
 0x274   :  { %v2102_v23 = vmul.f32 %v4978_v43, %v2101_v3  ;;  %v6443_v43 = vpop.f32.mrf.mxu3 }
 0x275   :  { %v1933_v41 = vsub.f32 0.0, %v1907_v53 }
 0x277   :  { %v1972_v49 = vmul.f32 1.442695, %v1933_v41  ;;  %v2242_v41 = vadd.f32 %v2096_v1, %v1878_v40  ;;  %v1881_v40 = vmax.f32 %v6429_v36, 0.0 }
 0x278   :  { %v1838_v0 = vpop.f32.mrf.mxu2  ;;  %v4982_v12 = vpop.eup %4981 }
 0x279   :  { %4985 = vpow2.f32 %v1972_v49  ;;  %v6435_v16 = vadd.f32 %v6366_v48, %v1838_v0  ;;  %v2099_v21 = vmul.f32 0.6931472, %v4982_v12  ;;  %v4984_v51 = vpop.eup %4983 }
 0x27a   :  { %v2106_v29 = vadd.f32 1.0, %v4984_v51  ;;  %v2109_v3 = vmul.f32 -0.5, %v4984_v51 }
 0x27b   :  { %v1908_v55 = vand.u32 2147483647, %v6435_v16  ;;  %v2105_v24 = vsel %vm2104_vm9, %v2102_v23, %v2099_v21  ;;  %v2112_v23 = vand.u32 2147483647, %v4984_v51 }
 0x27c   :  { %v2243_v53 = vadd.f32 %v2105_v24, %v1879_v15  ;;  %v2110_v21 = vadd.f32 1.0, %v2109_v3  ;;  %v6450_v24 = vpop.f32.mrf.mxu3 }
 0x27d   :  { %v1934_v22 = vsub.f32 0.0, %v1908_v55  ;;  %vm2113_vm12 = vcmp.lt.f32.partialorder %v2112_v23, 0.0004427343 }
 0x27e   :  { %v2263_v49 = vpack.c.bf16 %v2243_v53, %v2242_v41 }
 0x27f   :  { %v4986_v61 = vpop.eup %4985  ;;  %v1974_v25 = vmul.f32 1.442695, %v1934_v22 }
 0x280   :  { %v2115_v7 = vadd.f32 1.0, %v4986_v61  ;;  %v1840_v57 = vpop.f32.mrf.mxu2  ;;  %v2118_v26 = vmul.f32 -0.5, %v4986_v61  ;;  %v2121_v45 = vand.u32 2147483647, %v4986_v61  ;;  %2372 = vmatmul.bf16.gmra.mxu3 %v2263_v49 }
 0x281   :  { %v6441_v37 = vadd.f32 %v6366_v48, %v1840_v57 }
 0x282   :  { %4987 = vlog2.f32 %v2115_v7  ;;  %v2119_v50 = vadd.f32 1.0, %v2118_v26  ;;  %vm2122_vm11 = vcmp.lt.f32.partialorder %v2121_v45, 0.0004427343  ;;  %v1880_v26 = vmax.f32 %v6423_v10, 0.0 }
 0x283   :  { %4989 = vlog2.f32 %v2106_v29  ;;  %v1909_v52 = vand.u32 2147483647, %v6441_v37  ;;  %v2111_v29 = vmul.f32 %v4984_v51, %v2110_v21 }
 0x284   :  { %4991 = vpow2.f32 %v1974_v25  ;;  %v2120_v15 = vmul.f32 %v4986_v61, %v2119_v50  ;;  %v6458_v36 = vpop.f32.mrf.mxu3 }
 0x285   :  { %v1935_v62 = vsub.f32 0.0, %v1909_v52 }
 0x287   :  { %v1976_v38 = vmul.f32 1.442695, %v1935_v62 }
 0x288   :  { %v4988_v0 = vpop.eup %4987  ;;  %v1843_v19 = vpop.f32.mrf.mxu2 }
 0x289   :  { %v4990_v12 = vpop.eup %4989  ;;  %4993 = vpow2.f32 %v1976_v38  ;;  %v6447_v8 = vadd.f32 %v6366_v48, %v1843_v19  ;;  %v2117_v14 = vmul.f32 0.6931472, %v4988_v0 }
 0x28a   :  { %v4992_v31 = vpop.eup %4991  ;;  %v2108_v22 = vmul.f32 0.6931472, %v4990_v12 }
 0x28b   :  { %v1910_v55 = vand.u32 2147483647, %v6447_v8  ;;  %v2123_v1 = vsel %vm2122_vm11, %v2120_v15, %v2117_v14  ;;  %v2124_v53 = vadd.f32 1.0, %v4992_v31  ;;  %v2127_v50 = vmul.f32 -0.5, %v4992_v31 }
 0x28c   :  { %v2114_v25 = vsel %vm2113_vm12, %v2111_v29, %v2108_v22  ;;  %v2245_v6 = vadd.f32 %v2123_v1, %v1881_v40  ;;  %v2130_v15 = vand.u32 2147483647, %v4992_v31 }
 0x28d   :  { %v1936_v7 = vsub.f32 0.0, %v1910_v55  ;;  %v2244_v49 = vadd.f32 %v2114_v25, %v1880_v26  ;;  %v2128_v55 = vadd.f32 1.0, %v2127_v50  ;;  %v4498_v26 = vld [vmem:[#allocation6 + $0x8] sm:$0xff]  ;;  %v1882_v50 = vmax.f32 %v6435_v16, 0.0 }
 0x28e   :  { %vm2131_vm14 = vcmp.lt.f32.partialorder %v2130_v15, 0.0004427343 }
 0x28f   :  { %v4994_v57 = vpop.eup %4993  ;;  %v1978_v61 = vmul.f32 1.442695, %v1936_v7  ;;  %v2264_v0 = vpack.c.bf16 %v2245_v6, %v2244_v49  ;;  %v2129_v25 = vmul.f32 %v4992_v31, %v2128_v55 }
 0x290   :  { %v2133_v41 = vadd.f32 1.0, %v4994_v57  ;;  %v1845_v52 = vpop.f32.mrf.mxu2  ;;  %v2136_v3 = vmul.f32 -0.5, %v4994_v57  ;;  %v2139_v14 = vand.u32 2147483647, %v4994_v57 }
 0x291   :  { %v6455_v62 = vadd.f32 %v6366_v48, %v1845_v52  ;;  %2377 = vmatmul.bf16.gmra.mxu3 %v2264_v0 }
 0x292   :  { %4995 = vlog2.f32 %v2133_v41  ;;  %v2137_v10 = vadd.f32 1.0, %v2136_v3  ;;  %vm2140_vm13 = vcmp.lt.f32.partialorder %v2139_v14, 0.0004427343 }
 0x293   :  { %4997 = vlog2.f32 %v2124_v53  ;;  %v1911_v51 = vand.u32 2147483647, %v6455_v62  ;;  %v4499_v53 = vld [vmem:[#allocation6 + $0x10] sm:$0xff] }
 0x294   :  { %4999 = vpow2.f32 %v1978_v61  ;;  %v2138_v40 = vmul.f32 %v4994_v57, %v2137_v10  ;;  %2915 = vmatpush.bf16.msrb.mxu0 %v4499_v53  ;;  %v1883_v61 = vmax.f32 %v6441_v37, 0.0  ;;  %v6474_v37 = vadd.f32 %v6366_v48, %v6432_v9 }
 0x295   :  { %v1937_v38 = vsub.f32 0.0, %v1911_v51  ;;  %v6465_v51 = vpop.f32.mrf.mxu3 }
 0x297   :  { %v1980_v19 = vmul.f32 1.442695, %v1937_v38 }
 0x298   :  { %v4996_v12 = vpop.eup %4995  ;;  %v1848_v45 = vpop.f32.mrf.mxu2  ;;  %2916 = vmatpush.bf16.msrb.mxu0 %v4498_v26 }
 0x299   :  { %v4998_v21 = vpop.eup %4997  ;;  %5001 = vpow2.f32 %v1980_v19  ;;  %v6461_v23 = vadd.f32 %v6366_v48, %v1848_v45  ;;  %v2135_v22 = vmul.f32 0.6931472, %v4996_v12 }
 0x29a   :  { %v5000_v1 = vpop.eup %4999  ;;  %v2126_v7 = vmul.f32 0.6931472, %v4998_v21  ;;  %v6478_v21 = vadd.f32 %v6366_v48, %v6443_v43 }
 0x29b   :  { %v1912_v29 = vand.u32 2147483647, %v6461_v23  ;;  %v2141_v41 = vsel %vm2140_vm13, %v2138_v40, %v2135_v22  ;;  %v2142_v49 = vadd.f32 1.0, %v5000_v1  ;;  %v2145_v55 = vmul.f32 -0.5, %v5000_v1 }
 0x29c   :  { %v2132_v3 = vsel %vm2131_vm14, %v2129_v25, %v2126_v7  ;;  %v2247_v57 = vadd.f32 %v2141_v41, %v1883_v61  ;;  %v1915_v53 = vand.u32 2147483647, %v6478_v21 }
 0x29d   :  { %v1938_v52 = vsub.f32 0.0, %v1912_v29  ;;  %v2246_v12 = vadd.f32 %v2132_v3, %v1882_v50  ;;  %v1914_v29 = vand.u32 2147483647, %v6474_v37  ;;  %v6482_v9 = vpop.f32.mrf.mxu3  ;;  %v2146_v41 = vadd.f32 1.0, %v2145_v55 }
 0x29f   :  { %v5002_v6 = vpop.eup %5001  ;;  %v1982_v31 = vmul.f32 1.442695, %v1938_v52  ;;  %v2265_v14 = vpack.c.bf16 %v2247_v57, %v2246_v12  ;;  %v2148_v52 = vand.u32 2147483647, %v5000_v1  ;;  %v1940_v61 = vsub.f32 0.0, %v1914_v29 }
 0x2a0   :  { %v2151_v38 = vadd.f32 1.0, %v5002_v6  ;;  %v1850_v0 = vpop.f32.mrf.mxu2  ;;  %v2154_v45 = vmul.f32 -0.5, %v5002_v6  ;;  %v2157_v25 = vand.u32 2147483647, %v5002_v6 }
 0x2a1   :  { %v6469_v19 = vadd.f32 %v6366_v48, %v1850_v0  ;;  %2382 = vmatmul.bf16.gmra.mxu3 %v2265_v14  ;;  %v2147_v0 = vmul.f32 %v5000_v1, %v2146_v41  ;;  %vm2149_vm1 = vcmp.lt.f32.partialorder %v2148_v52, 0.0004427343 }
 0x2a2   :  { %5003 = vlog2.f32 %v2151_v38  ;;  %v2155_v7 = vadd.f32 1.0, %v2154_v45  ;;  %v1941_v38 = vsub.f32 0.0, %v1915_v53  ;;  %vm2158_vm15 = vcmp.lt.f32.partialorder %v2157_v25, 0.0004427343 }
 0x2a3   :  { %5005 = vlog2.f32 %v2142_v49  ;;  %v1913_v10 = vand.u32 2147483647, %v6469_v19  ;;  %v1986_v45 = vmul.f32 1.442695, %v1940_v61 }
 0x2a4   :  { %5007 = vpow2.f32 %v1982_v31  ;;  %v2156_v3 = vmul.f32 %v5002_v6, %v2155_v7  ;;  %v1885_v31 = vmax.f32 %v6455_v62, 0.0  ;;  %v1988_v55 = vmul.f32 1.442695, %v1941_v38 }
 0x2a5   :  { %v1939_v16 = vsub.f32 0.0, %v1913_v10  ;;  %v6491_v10 = vld [vmem:[%s7380_s8] ss:$0 sm:$0xff]  ;;  %v1884_v6 = vmax.f32 %v6447_v8, 0.0  ;;  %v6497_v7 = vadd.f32 %v6366_v48, %v6450_v24  ;;  %v6504_v8 = vadd.f32 %v6366_v48, %v6458_v36 }
 0x2a7   :  { %v1984_v22 = vmul.f32 1.442695, %v1939_v16  ;;  %v1916_v61 = vand.u32 2147483647, %v6497_v7 }
 0x2a8   :  { %v5004_v15 = vpop.eup %5003 }
 0x2a9   :  { %v5006_v40 = vpop.eup %5005  ;;  %5009 = vpow2.f32 %v1984_v22  ;;  %v2153_v43 = vmul.f32 0.6931472, %v5004_v15  ;;  %v4497_v15 = vld [vmem:[#allocation6] sm:$0xff] }
 0x2aa   :  { %v6484_v26 = vpop.eup %5007  ;;  %v2144_v49 = vmul.f32 0.6931472, %v5006_v40  ;;  %2917 = vmatpush.bf16.msrb.mxu0 %v4497_v15 }
 0x2ab   :  { %v2159_v50 = vsel %vm2158_vm15, %v2156_v3, %v2153_v43  ;;  %v2160_v12 = vadd.f32 1.0, %v6484_v26  ;;  %v2163_v41 = vmul.f32 -0.5, %v6484_v26 }
 0x2ac   :  { %v2150_v16 = vsel %vm2149_vm1, %v2147_v0, %v2144_v49  ;;  %v2249_v22 = vadd.f32 %v2159_v50, %v1885_v31 }
 0x2ad   :  { %v2248_v29 = vadd.f32 %v2150_v16, %v1884_v6  ;;  %v2164_v50 = vadd.f32 1.0, %v2163_v41  ;;  %v1887_v41 = vmax.f32 %v6469_v19, 0.0  ;;  %v6523_v19 = vadd.f32 %v6366_v48, %v6465_v51 }
 0x2af   :  { %v5010_v57 = vpop.eup %5009  ;;  %v2266_v53 = vpack.c.bf16 %v2249_v22, %v2248_v29 }
 0x2b0   :  { %v2169_v14 = vadd.f32 1.0, %v5010_v57  ;;  %v2172_v40 = vmul.f32 -0.5, %v5010_v57  ;;  %v2175_v3 = vand.u32 2147483647, %v5010_v57 }
 0x2b1   :  { %2387 = vmatmul.bf16.gmra.mxu3 %v2266_v53 }
 0x2b2   :  { %5011 = vlog2.f32 %v2169_v14  ;;  %v2348_v1 = vpop.f32.mrf.mxu3  ;;  %v2173_v24 = vadd.f32 1.0, %v2172_v40  ;;  %vm2176_vm2 = vcmp.lt.f32.partialorder %v2175_v3, 0.0004427343  ;;  %v2165_v40 = vmul.f32 %v6484_v26, %v2164_v50 }
 0x2b3   :  { %5013 = vlog2.f32 %v2160_v12  ;;  %v2349_v62 = vadd.f32 %v6491_v10, %v2348_v1 }
 0x2b4   :  { %5015 = vpow2.f32 %v1986_v45  ;;  %v2166_v45 = vand.u32 2147483647, %v6484_v26  ;;  %v2174_v22 = vmul.f32 %v5010_v57, %v2173_v24  ;;  %v1886_v57 = vmax.f32 %v6461_v23, 0.0 }
 0x2b5   :  { %5017 = vpow2.f32 %v1988_v55  ;;  %v6500_v25 = vadd.f32 %v2349_v62, %v6120_v58  ;;  %v1917_v58 = vand.u32 2147483647, %v6504_v8  ;;  %v1942_v55 = vsub.f32 0.0, %v1916_v61 }
 0x2b6   :  { %vm2167_vm3 = vcmp.lt.f32.partialorder %v2166_v45, 0.0004427343  ;;  %v6528_v23 = vadd.f32 %v6366_v48, %v6482_v9 }
 0x2b7   :  { %v2465_v43 = vand.u32 2147483647, %v6500_v25  ;;  %v1943_v62 = vsub.f32 0.0, %v1917_v58 }
 0x2b8   :  { %v5012_v52 = vpop.eup %5011 }
 0x2b9   :  { %v5014_v49 = vpop.eup %5013  ;;  %v2491_v38 = vsub.f32 0.0, %v2465_v43  ;;  %v2171_v31 = vmul.f32 0.6931472, %v5012_v52  ;;  %v1990_v52 = vmul.f32 1.442695, %v1942_v55 }
 0x2ba   :  { %v5016_v0 = vpop.eup %5015  ;;  %v2350_v12 = vpop.f32.mrf.mxu3  ;;  %v2162_v6 = vmul.f32 0.6931472, %v5014_v49 }
 0x2bb   :  { %v5018_v36 = vpop.eup %5017  ;;  %v2517_v16 = vmul.f32 1.442695, %v2491_v38  ;;  %v2351_v14 = vadd.f32 %v6491_v10, %v2350_v12  ;;  %v2178_v1 = vadd.f32 1.0, %v5016_v0  ;;  %v2177_v53 = vsel %vm2176_vm2, %v2174_v22, %v2171_v31 }
 0x2bc   :  { %v2187_v29 = vadd.f32 1.0, %v5018_v36  ;;  %v2168_v61 = vsel %vm2167_vm3, %v2165_v40, %v2162_v6  ;;  %v2251_v24 = vadd.f32 %v2177_v53, %v1887_v41  ;;  %v2181_v3 = vmul.f32 -0.5, %v5016_v0 }
 0x2bd   :  { %5019 = vpow2.f32 %v2517_v16  ;;  %v6513_v15 = vadd.f32 %v2351_v14, %v6125_v11  ;;  %v1992_v11 = vmul.f32 1.442695, %v1943_v62  ;;  %v2190_v58 = vmul.f32 -0.5, %v5018_v36 }
 0x2be   :  { %5021 = vlog2.f32 %v2178_v1  ;;  %v2250_v26 = vadd.f32 %v2168_v61, %v1886_v57  ;;  %v2182_v45 = vadd.f32 1.0, %v2181_v3  ;;  %v2184_v16 = vand.u32 2147483647, %v5016_v0 }
 0x2bf   :  { %v2466_v43 = vand.u32 2147483647, %v6513_v15  ;;  %5023 = vlog2.f32 %v2187_v29  ;;  %v2191_v55 = vadd.f32 1.0, %v2190_v58  ;;  %v2193_v1 = vand.u32 2147483647, %v5018_v36 }
 0x2c0   :  { %5025 = vpow2.f32 %v1990_v52  ;;  %v2267_v12 = vpack.c.bf16 %v2251_v24, %v2250_v26  ;;  %v1918_v29 = vand.u32 2147483647, %v6523_v19  ;;  %v1919_v62 = vand.u32 2147483647, %v6528_v23 }
 0x2c1   :  { %v2492_v49 = vsub.f32 0.0, %v2466_v43  ;;  %v2183_v9 = vmul.f32 %v5016_v0, %v2182_v45  ;;  %vm6535_vm4 = vcmp.lt.f32.partialorder %v2184_v16, 0.0004427343  ;;  %v2192_v61 = vmul.f32 %v5018_v36, %v2191_v55 }
 0x2c2   :  { %v2353_v6 = vpop.f32.mrf.mxu3  ;;  %2392 = vmatmul.bf16.gmra.mxu3 %v2267_v12  ;;  %vm6545_vm5 = vcmp.lt.f32.partialorder %v2193_v1, 0.0004427343  ;;  %v1944_v0 = vsub.f32 0.0, %v1918_v29  ;;  %v1889_v36 = vmax.f32 %v6478_v21, 0.0 }
 0x2c3   :  { %v6519_v38 = vpop.eup %5019  ;;  %v2519_v50 = vmul.f32 1.442695, %v2492_v49  ;;  %v2354_v51 = vadd.f32 %v6491_v10, %v2353_v6 }
 0x2c4   :  { %v2569_v31 = vadd.f32 1.0, %v6519_v38  ;;  %v5022_v14 = vpop.eup %5021  ;;  %v2572_v57 = vmul.f32 -0.5, %v6519_v38  ;;  %v1994_v1 = vmul.f32 1.442695, %v1944_v0 }
 0x2c5   :  { %5027 = vpow2.f32 %v2519_v50  ;;  %v5024_v22 = vpop.eup %5023  ;;  %v6540_v53 = vadd.f32 %v2354_v51, %v6132_v59  ;;  %v2180_v43 = vmul.f32 0.6931472, %v5022_v14  ;;  %v1945_v59 = vsub.f32 0.0, %v1919_v62 }
 0x2c6   :  { %5029 = vpow2.f32 %v1992_v11  ;;  %v6533_v48 = vpop.eup %5025  ;;  %v2189_v52 = vmul.f32 0.6931472, %v5024_v22  ;;  %v2573_v6 = vadd.f32 1.0, %v2572_v57  ;;  %v4512_v22 = vld [vmem:[#allocation7 + $0x38] sm:$0xff] }
 0x2c7   :  { %5031 = vlog2.f32 %v2569_v31  ;;  %v2467_v3 = vand.u32 2147483647, %v6540_v53  ;;  %v2196_v58 = vadd.f32 1.0, %v6533_v48  ;;  %v1888_v31 = vmax.f32 %v6474_v37, 0.0  ;;  %3455 = vmatpush.bf16.msrb.mxu1 %v4512_v22 }
 0x2c8   :  { %v2186_v45 = vsel %vm6535_vm4, %v2183_v9, %v2180_v43  ;;  %v2195_v16 = vsel %vm6545_vm5, %v2192_v61, %v2189_v52  ;;  %v2575_v37 = vand.u32 2147483647, %v6519_v38  ;;  %v1996_v21 = vmul.f32 1.442695, %v1945_v59 }
 0x2c9   :  { %v2493_v12 = vsub.f32 0.0, %v2467_v3  ;;  %v2252_v9 = vadd.f32 %v2186_v45, %v1888_v31  ;;  %v2253_v52 = vadd.f32 %v2195_v16, %v1889_v36  ;;  %v2199_v61 = vmul.f32 -0.5, %v6533_v48 }
 0x2ca   :  { %v2355_v55 = vpop.f32.mrf.mxu3  ;;  %v2574_v57 = vmul.f32 %v6519_v38, %v2573_v6  ;;  %vm6567_vm6 = vcmp.lt.f32.partialorder %v2575_v37, 0.0004427343  ;;  %v2440_v38 = vmax.f32 %v6513_v15, 0.0  ;;  %v2202_v45 = vand.u32 2147483647, %v6533_v48 }
 0x2cb   :  { %v5028_v41 = vpop.eup %5027  ;;  %v2521_v29 = vmul.f32 1.442695, %v2493_v12  ;;  %v2356_v51 = vadd.f32 %v6491_v10, %v2355_v55  ;;  %v2200_v12 = vadd.f32 1.0, %v2199_v61  ;;  %v2268_v16 = vpack.c.bf16 %v2253_v52, %v2252_v9 }
 0x2cc   :  { %v6543_v24 = vpop.eup %5029  ;;  %v2578_v11 = vadd.f32 1.0, %v5028_v41  ;;  %v2581_v26 = vmul.f32 -0.5, %v5028_v41  ;;  %v2584_v43 = vand.u32 2147483647, %v5028_v41  ;;  %vm6582_vm7 = vcmp.lt.f32.partialorder %v2202_v45, 0.0004427343 }
 0x2cd   :  { %v5032_v50 = vpop.eup %5031  ;;  %v2205_v14 = vadd.f32 1.0, %v6543_v24  ;;  %v6561_v40 = vadd.f32 %v2356_v51, %v6142_v39  ;;  %v2208_v0 = vmul.f32 -0.5, %v6543_v24  ;;  %v2201_v9 = vmul.f32 %v6533_v48, %v2200_v12 }
 0x2ce   :  { %5033 = vlog2.f32 %v2578_v11  ;;  %v2571_v62 = vmul.f32 0.6931472, %v5032_v50  ;;  %v2582_v3 = vadd.f32 1.0, %v2581_v26  ;;  %v2439_v50 = vmax.f32 %v6500_v25, 0.0 }
 0x2cf   :  { %5035 = vlog2.f32 %v2196_v58  ;;  %v2468_v11 = vand.u32 2147483647, %v6561_v40  ;;  %vm2585_vm0 = vcmp.lt.f32.partialorder %v2584_v43, 0.0004427343  ;;  %v2209_v6 = vadd.f32 1.0, %v2208_v0 }
 0x2d0   :  { %5037 = vpow2.f32 %v2521_v29  ;;  %v2577_v39 = vsel %vm6567_vm6, %v2574_v57, %v2571_v62  ;;  %v2583_v26 = vmul.f32 %v5028_v41, %v2582_v3  ;;  %v2211_v41 = vand.u32 2147483647, %v6543_v24 }
 0x2d1   :  { %5039 = vlog2.f32 %v2205_v14  ;;  %v2494_v31 = vsub.f32 0.0, %v2468_v11  ;;  %v2210_v52 = vmul.f32 %v6543_v24, %v2209_v6  ;;  %v1890_v58 = vmax.f32 %v6497_v7, 0.0 }
 0x2d2   :  { %5041 = vpow2.f32 %v1994_v1  ;;  %v2803_v1 = vadd.f32 %v2577_v39, %v2439_v50  ;;  %2397 = vmatmul.bf16.gmra.mxu3 %v2268_v16  ;;  %vm6588_vm8 = vcmp.lt.f32.partialorder %v2211_v41, 0.0004427343  ;;  %v1891_v39 = vmax.f32 %v6504_v8, 0.0 }
 0x2d3   :  { %5043 = vpow2.f32 %v1996_v21  ;;  %v2523_v22 = vmul.f32 1.442695, %v2494_v31  ;;  %v2358_v61 = vpop.f32.mrf.mxu3 }
 0x2d4   :  { %v5034_v49 = vpop.eup %5033  ;;  %v2359_v0 = vadd.f32 %v6491_v10, %v2358_v61 }
 0x2d5   :  { %v2580_v59 = vmul.f32 0.6931472, %v5034_v49  ;;  %v5036_v36 = vpop.eup %5035  ;;  %5045 = vpow2.f32 %v2523_v22 }
 0x2d6   :  { %v6576_v55 = vpop.eup %5037  ;;  %v2198_v3 = vmul.f32 0.6931472, %v5036_v36  ;;  %v6597_v48 = vadd.f32 %v2359_v0, %v6162_v46 }
 0x2d7   :  { %v2586_v14 = vsel %vm2585_vm0, %v2583_v26, %v2580_v59  ;;  %v5040_v51 = vpop.eup %5039  ;;  %v2587_v25 = vadd.f32 1.0, %v6576_v55  ;;  %v2593_v41 = vand.u32 2147483647, %v6576_v55 }
 0x2d8   :  { %v2804_v29 = vadd.f32 %v2586_v14, %v2440_v38  ;;  %v5042_v15 = vpop.eup %5041  ;;  %v2207_v43 = vmul.f32 0.6931472, %v5040_v51  ;;  %v2204_v59 = vsel %vm6582_vm7, %v2201_v9, %v2198_v3  ;;  %v2590_v38 = vmul.f32 -0.5, %v6576_v55 }
 0x2d9   :  { %v6580_v21 = vpop.eup %5043  ;;  %v2214_v49 = vadd.f32 1.0, %v5042_v15  ;;  %5047 = vlog2.f32 %v2587_v25  ;;  %v2217_v50 = vmul.f32 -0.5, %v5042_v15  ;;  %v2469_v31 = vand.u32 2147483647, %v6597_v48 }
 0x2da   :  { %v2829_v37 = vpack.c.bf16 %v2804_v29, %v2803_v1  ;;  %v2223_v11 = vadd.f32 1.0, %v6580_v21  ;;  %v2213_v26 = vsel %vm6588_vm8, %v2210_v52, %v2207_v43  ;;  %v2254_v12 = vadd.f32 %v2204_v59, %v1890_v58  ;;  %v4511_v52 = vld [vmem:[#allocation7 + $0x30] sm:$0xff] }
 0x2db   :  { %v5046_v24 = vpop.eup %5045  ;;  %5049 = vlog2.f32 %v2214_v49  ;;  %v2255_v46 = vadd.f32 %v2213_v26, %v1891_v39  ;;  %v2495_v45 = vsub.f32 0.0, %v2469_v31  ;;  %v2218_v16 = vadd.f32 1.0, %v2217_v50  ;;  %v2360_v6 = vpop.f32.mrf.mxu3  ;;  %3456 = vmatpush.bf16.msrb.mxu1 %v4511_v52 }
 0x2dc   :  { %2918 = vmatmul.bf16.vlgmr.msrb.gmra.mxu0 %v2829_v37  ;;  %v2596_v36 = vadd.f32 1.0, %v5046_v24  ;;  %5051 = vlog2.f32 %v2223_v11  ;;  %v2599_v7 = vmul.f32 -0.5, %v5046_v24  ;;  %v2226_v14 = vmul.f32 -0.5, %v6580_v21 }
 0x2dd   :  { %v2591_v22 = vadd.f32 1.0, %v2590_v38  ;;  %v2220_v1 = vand.u32 2147483647, %v5042_v15  ;;  %v2525_v29 = vmul.f32 1.442695, %v2495_v45  ;;  %v2361_v51 = vadd.f32 %v6491_v10, %v2360_v6 }
 0x2de   :  { %5053 = vlog2.f32 %v2596_v36  ;;  %v2600_v37 = vadd.f32 1.0, %v2599_v7  ;;  %v2269_v9 = vpack.c.bf16 %v2255_v46, %v2254_v12  ;;  %v2602_v43 = vand.u32 2147483647, %v5046_v24 }
 0x2df   :  { %v5048_v8 = vpop.eup %5047  ;;  %5055 = vpow2.f32 %v2525_v29  ;;  %v6609_v3 = vadd.f32 %v2361_v51, %v6173_v30  ;;  %v2227_v57 = vadd.f32 1.0, %v2226_v14  ;;  %v2229_v49 = vand.u32 2147483647, %v6580_v21 }
 0x2e0   :  { %v2589_v25 = vmul.f32 0.6931472, %v5048_v8  ;;  %v2592_v0 = vmul.f32 %v6576_v55, %v2591_v22  ;;  %v2219_v58 = vmul.f32 %v5042_v15, %v2218_v16  ;;  %vm6613_vm9 = vcmp.lt.f32.partialorder %v2220_v1, 0.0004427343 }
 0x2e1   :  { %v5050_v62 = vpop.eup %5049  ;;  %v2470_v59 = vand.u32 2147483647, %v6609_v3  ;;  %vm6618_vm10 = vcmp.lt.f32.partialorder %v2593_v41, 0.0004427343  ;;  %v2601_v55 = vmul.f32 %v5046_v24, %v2600_v37  ;;  %v2441_v15 = vmax.f32 %v6540_v53, 0.0 }
 0x2e2   :  { %v5052_v61 = vpop.eup %5051  ;;  %2402 = vmatmul.bf16.gmra.mxu3 %v2269_v9  ;;  %v2216_v26 = vmul.f32 0.6931472, %v5050_v62  ;;  %v2595_v50 = vsel %vm6618_vm10, %v2592_v0, %v2589_v25  ;;  %v2442_v31 = vmax.f32 %v6561_v40, 0.0  ;;  %vm2603_vm11 = vcmp.lt.f32.partialorder %v2602_v43, 0.0004427343 }
 0x2e3   :  { %v2496_v36 = vsub.f32 0.0, %v2470_v59  ;;  %v2225_v7 = vmul.f32 0.6931472, %v5052_v61  ;;  %v2228_v8 = vmul.f32 %v6580_v21, %v2227_v57  ;;  %vm6627_vm12 = vcmp.lt.f32.partialorder %v2229_v49, 0.0004427343  ;;  %v2363_v46 = vpop.f32.mrf.mxu3 }
 0x2e4   :  { %v5054_v11 = vpop.eup %5053  ;;  %v2364_v6 = vadd.f32 %v6491_v10, %v2363_v46  ;;  %v2805_v24 = vadd.f32 %v2595_v50, %v2441_v15  ;;  %v1892_v53 = vmax.f32 %v6523_v19, 0.0  ;;  %v1893_v1 = vmax.f32 %v6528_v23, 0.0 }
 0x2e5   :  { %v2598_v38 = vmul.f32 0.6931472, %v5054_v11  ;;  %v5056_v16 = vpop.eup %5055  ;;  %v2527_v14 = vmul.f32 1.442695, %v2496_v36  ;;  %v2222_v51 = vsel %vm6613_vm9, %v2219_v58, %v2216_v26  ;;  %v2231_v41 = vsel %vm6627_vm12, %v2228_v8, %v2225_v7  ;;  %v4510_v58 = vld [vmem:[#allocation7 + $0x28] sm:$0xff] }
 0x2e6   :  { %v2605_v40 = vadd.f32 1.0, %v5056_v16  ;;  %v6635_v21 = vadd.f32 %v2364_v6, %v6200_v42  ;;  %v2256_v37 = vadd.f32 %v2222_v51, %v1892_v53  ;;  %v2257_v19 = vadd.f32 %v2231_v41, %v1893_v1  ;;  %3457 = vmatpush.bf16.msrb.mxu1 %v4510_v58 }
 0x2e7   :  { %v2604_v45 = vsel %vm2603_vm11, %v2601_v55, %v2598_v38  ;;  %5057 = vpow2.f32 %v2527_v14  ;;  %v2608_v23 = vmul.f32 -0.5, %v5056_v16  ;;  %v2611_v30 = vand.u32 2147483647, %v5056_v16 }
 0x2e8   :  { %v2806_v22 = vadd.f32 %v2604_v45, %v2442_v31  ;;  %v2471_v25 = vand.u32 2147483647, %v6635_v21  ;;  %5059 = vlog2.f32 %v2605_v40  ;;  %v2270_v0 = vpack.c.bf16 %v2257_v19, %v2256_v37 }
 0x2e9   :  { %v2609_v39 = vadd.f32 1.0, %v2608_v23  ;;  %vm2612_vm13 = vcmp.lt.f32.partialorder %v2611_v30, 0.0004427343 }
 0x2ea   :  { %v2830_v29 = vpack.c.bf16 %v2806_v22, %v2805_v24  ;;  %v2497_v62 = vsub.f32 0.0, %v2471_v25  ;;  %v2443_v24 = vmax.f32 %v6597_v48, 0.0  ;;  %v2444_v22 = vmax.f32 %v6609_v3, 0.0 }
 0x2eb   :  { %v2365_v9 = vpop.f32.mrf.mxu3  ;;  %v2610_v15 = vmul.f32 %v5056_v16, %v2609_v39 }
 0x2ec   :  { %2923 = vmatmul.bf16.gmra.mxu0 %v2830_v29  ;;  %v2529_v52 = vmul.f32 1.442695, %v2497_v62  ;;  %v2366_v42 = vadd.f32 %v6491_v10, %v2365_v9 }
 0x2ed   :  { %v5058_v43 = vpop.eup %5057 }
 0x2ee   :  { %v2614_v61 = vadd.f32 1.0, %v5058_v43  ;;  %v5060_v57 = vpop.eup %5059  ;;  %5061 = vpow2.f32 %v2529_v52  ;;  %v6644_v49 = vadd.f32 %v2366_v42, %v6224_v63  ;;  %v2617_v11 = vmul.f32 -0.5, %v5058_v43 }
 0x2ef   :  { %v2607_v26 = vmul.f32 0.6931472, %v5060_v57  ;;  %v2620_v31 = vand.u32 2147483647, %v5058_v43 }
 0x2f0   :  { %5063 = vlog2.f32 %v2614_v61  ;;  %v2472_v59 = vand.u32 2147483647, %v6644_v49  ;;  %v2618_v38 = vadd.f32 1.0, %v2617_v11 }
 0x2f1   :  { %v2613_v12 = vsel %vm2612_vm13, %v2610_v15, %v2607_v26  ;;  %vm2621_vm14 = vcmp.lt.f32.partialorder %v2620_v31, 0.0004427343 }
 0x2f2   :  { %2407 = vmatmul.bf16.gmra.mxu3 %v2270_v0  ;;  %v2498_v50 = vsub.f32 0.0, %v2472_v59  ;;  %v2619_v6 = vmul.f32 %v5058_v43, %v2618_v38  ;;  %v2807_v40 = vadd.f32 %v2613_v12, %v2443_v24 }
 0x2f3   :  { %v2368_v55 = vpop.f32.mrf.mxu3 }
 0x2f4   :  { %v5062_v36 = vpop.eup %5061  ;;  %v2531_v7 = vmul.f32 1.442695, %v2498_v50  ;;  %v2369_v63 = vadd.f32 %v6491_v10, %v2368_v55 }
 0x2f5   :  { %v2623_v46 = vadd.f32 1.0, %v5062_v36  ;;  %v2626_v25 = vmul.f32 -0.5, %v5062_v36  ;;  %v2629_v52 = vand.u32 2147483647, %v5062_v36 }
 0x2f6   :  { %v5064_v8 = vpop.eup %5063  ;;  %5065 = vpow2.f32 %v2531_v7  ;;  %v6649_v45 = vadd.f32 %v2369_v63, %v6249_v56  ;;  %v2445_v7 = vmax.f32 %v6635_v21, 0.0  ;;  %v2446_v63 = vmax.f32 %v6644_v49, 0.0 }
 0x2f7   :  { %v2616_v14 = vmul.f32 0.6931472, %v5064_v8  ;;  %5067 = vlog2.f32 %v2623_v46  ;;  %v2627_v23 = vadd.f32 1.0, %v2626_v25  ;;  %vm6660_vm15 = vcmp.lt.f32.partialorder %v2629_v52, 0.0004427343 }
 0x2f8   :  { %v2473_v16 = vand.u32 2147483647, %v6649_v45 }
 0x2f9   :  { %v2622_v53 = vsel %vm2621_vm14, %v2619_v6, %v2616_v14  ;;  %v2628_v11 = vmul.f32 %v5062_v36, %v2627_v23  ;;  %v4509_v36 = vld [vmem:[#allocation7 + $0x20] sm:$0xff] }
 0x2fa   :  { %v2808_v1 = vadd.f32 %v2622_v53, %v2444_v22  ;;  %v2499_v29 = vsub.f32 0.0, %v2473_v16  ;;  %3458 = vmatpush.bf16.msrb.mxu1 %v4509_v36 }
 0x2fb   :  { %v2370_v51 = vpop.f32.mrf.mxu3 }
 0x2fc   :  { %v2831_v41 = vpack.c.bf16 %v2808_v1, %v2807_v40  ;;  %v5066_v37 = vpop.eup %5065  ;;  %v2533_v56 = vmul.f32 1.442695, %v2499_v29  ;;  %v2371_v19 = vadd.f32 %v6491_v10, %v2370_v51 }
 0x2fd   :  { %v2632_v62 = vadd.f32 1.0, %v5066_v37  ;;  %v5068_v48 = vpop.eup %5067  ;;  %v2635_v9 = vmul.f32 -0.5, %v5066_v37  ;;  %v2638_v58 = vand.u32 2147483647, %v5066_v37 }
 0x2fe   :  { %2928 = vmatmul.bf16.gmra.mxu0 %v2831_v41  ;;  %5069 = vpow2.f32 %v2533_v56  ;;  %v6656_v3 = vadd.f32 %v2371_v19, %v6269_v18  ;;  %v2625_v42 = vmul.f32 0.6931472, %v5068_v48 }
 0x2ff   :  { %5071 = vlog2.f32 %v2632_v62  ;;  %v2636_v57 = vadd.f32 1.0, %v2635_v9  ;;  %vm2639_vm1 = vcmp.lt.f32.partialorder %v2638_v58, 0.0004427343 }
 0x300   :  { %v2474_v43 = vand.u32 2147483647, %v6656_v3  ;;  %v2631_v50 = vsel %vm6660_vm15, %v2628_v11, %v2625_v42 }
 0x301   :  { %v2637_v31 = vmul.f32 %v5066_v37, %v2636_v57  ;;  %v2809_v46 = vadd.f32 %v2631_v50, %v2445_v7 }
 0x302   :  { %v2500_v61 = vsub.f32 0.0, %v2474_v43 }
 0x303   :  { %v2373_v0 = vpop.f32.mrf.mxu3 }
 0x304   :  { %v5070_v39 = vpop.eup %5069  ;;  %v2535_v59 = vmul.f32 1.442695, %v2500_v61  ;;  %v2374_v30 = vadd.f32 %v6491_v10, %v2373_v0 }
 0x305   :  { %v5072_v18 = vpop.eup %5071  ;;  %v2641_v38 = vadd.f32 1.0, %v5070_v39  ;;  %v2647_v25 = vand.u32 2147483647, %v5070_v39 }
 0x306   :  { %5073 = vpow2.f32 %v2535_v59  ;;  %v6667_v55 = vadd.f32 %v2374_v30, %v6286_v54  ;;  %v2634_v15 = vmul.f32 0.6931472, %v5072_v18  ;;  %v2644_v54 = vmul.f32 -0.5, %v5070_v39 }
 0x307   :  { %5075 = vlog2.f32 %v2641_v38  ;;  %vm6678_vm2 = vcmp.lt.f32.partialorder %v2647_v25, 0.0004427343  ;;  %v2447_v59 = vmax.f32 %v6649_v45, 0.0  ;;  %v2448_v30 = vmax.f32 %v6656_v3, 0.0 }
 0x308   :  { %v2475_v8 = vand.u32 2147483647, %v6667_v55  ;;  %v2640_v12 = vsel %vm2639_vm1, %v2637_v31, %v2634_v15  ;;  %v2645_v51 = vadd.f32 1.0, %v2644_v54 }
 0x309   :  { %v2810_v14 = vadd.f32 %v2640_v12, %v2446_v63 }
 0x30a   :  { %v2501_v6 = vsub.f32 0.0, %v2475_v8  ;;  %v2646_v48 = vmul.f32 %v5070_v39, %v2645_v51  ;;  %v4508_v39 = vld [vmem:[#allocation7 + $0x18] sm:$0xff] }
 0x30b   :  { %v2375_v24 = vpop.f32.mrf.mxu3  ;;  %v2832_v22 = vpack.c.bf16 %v2810_v14, %v2809_v46  ;;  %3459 = vmatpush.bf16.msrb.mxu1 %v4508_v39 }
 0x30c   :  { %v5074_v16 = vpop.eup %5073  ;;  %v2537_v53 = vmul.f32 1.442695, %v2501_v6  ;;  %v2376_v40 = vadd.f32 %v6491_v10, %v2375_v24 }
 0x30d   :  { %v2650_v21 = vadd.f32 1.0, %v5074_v16  ;;  %v5076_v1 = vpop.eup %5075  ;;  %v2653_v29 = vmul.f32 -0.5, %v5074_v16  ;;  %v2656_v9 = vand.u32 2147483647, %v5074_v16 }
 0x30e   :  { %2933 = vmatmul.bf16.gmra.mxu0 %v2832_v22  ;;  %5077 = vpow2.f32 %v2537_v53  ;;  %v6674_v49 = vadd.f32 %v2376_v40, %v6301_v44  ;;  %v2643_v37 = vmul.f32 0.6931472, %v5076_v1 }
 0x30f   :  { %5079 = vlog2.f32 %v2650_v21  ;;  %v2654_v19 = vadd.f32 1.0, %v2653_v29  ;;  %vm2657_vm3 = vcmp.lt.f32.partialorder %v2656_v9, 0.0004427343 }
 0x310   :  { %v2476_v41 = vand.u32 2147483647, %v6674_v49  ;;  %v2649_v61 = vsel %vm6678_vm2, %v2646_v48, %v2643_v37  ;;  %v2450_v48 = vmax.f32 %v6674_v49, 0.0 }
 0x311   :  { %v2655_v58 = vmul.f32 %v5074_v16, %v2654_v19  ;;  %v2811_v50 = vadd.f32 %v2649_v61, %v2447_v59 }
 0x312   :  { %v2502_v56 = vsub.f32 0.0, %v2476_v41 }
 0x314   :  { %v2378_v62 = vpop.f32.mrf.mxu3  ;;  %v5078_v23 = vpop.eup %5077  ;;  %v2539_v43 = vmul.f32 1.442695, %v2502_v56 }
 0x315   :  { %v2379_v52 = vadd.f32 %v6491_v10, %v2378_v62  ;;  %v5080_v44 = vpop.eup %5079  ;;  %v2659_v57 = vadd.f32 1.0, %v5078_v23  ;;  %v2665_v24 = vand.u32 2147483647, %v5078_v23  ;;  %v2449_v62 = vmax.f32 %v6667_v55, 0.0 }
 0x316   :  { %5081 = vpow2.f32 %v2539_v43  ;;  %v2652_v11 = vmul.f32 0.6931472, %v5080_v44 }
 0x317   :  { %v6685_v0 = vadd.f32 %v2379_v52, %v6308_v27  ;;  %5083 = vlog2.f32 %v2659_v57  ;;  %v2662_v27 = vmul.f32 -0.5, %v5078_v23  ;;  %vm2666_vm4 = vcmp.lt.f32.partialorder %v2665_v24, 0.0004427343 }
 0x318   :  { %v2658_v18 = vsel %vm2657_vm3, %v2655_v58, %v2652_v11 }
 0x319   :  { %v2477_v26 = vand.u32 2147483647, %v6685_v0  ;;  %v2812_v38 = vadd.f32 %v2658_v18, %v2448_v30  ;;  %v2663_v14 = vadd.f32 1.0, %v2662_v27  ;;  %v4507_v30 = vld [vmem:[#allocation7 + $0x10] sm:$0xff] }
 0x31a   :  { %3460 = vmatpush.bf16.msrb.mxu1 %v4507_v30 }
 0x31b   :  { %v2503_v15 = vsub.f32 0.0, %v2477_v26  ;;  %v2833_v36 = vpack.c.bf16 %v2812_v38, %v2811_v50  ;;  %v2664_v40 = vmul.f32 %v5078_v23, %v2663_v14 }
 0x31c   :  { %v2380_v31 = vpop.f32.mrf.mxu3  ;;  %v5082_v7 = vpop.eup %5081 }
 0x31d   :  { %v2541_v63 = vmul.f32 1.442695, %v2503_v15  ;;  %v2381_v8 = vadd.f32 %v6491_v10, %v2380_v31  ;;  %v2668_v45 = vadd.f32 1.0, %v5082_v7  ;;  %v5084_v12 = vpop.eup %5083  ;;  %v2671_v46 = vmul.f32 -0.5, %v5082_v7 }
 0x31e   :  { %2938 = vmatmul.bf16.gmra.mxu0 %v2833_v36  ;;  %v2661_v22 = vmul.f32 0.6931472, %v5084_v12  ;;  %v2674_v21 = vand.u32 2147483647, %v5082_v7 }
 0x31f   :  { %5085 = vpow2.f32 %v2541_v63  ;;  %v6692_v3 = vadd.f32 %v2381_v8, %v6315_v4  ;;  %v2672_v16 = vadd.f32 1.0, %v2671_v46 }
 0x320   :  { %5087 = vlog2.f32 %v2668_v45  ;;  %v2667_v4 = vsel %vm2666_vm4, %v2664_v40, %v2661_v22  ;;  %vm2675_vm5 = vcmp.lt.f32.partialorder %v2674_v21, 0.0004427343  ;;  %v2451_v22 = vmax.f32 %v6685_v0, 0.0 }
 0x321   :  { %v2478_v6 = vand.u32 2147483647, %v6692_v3  ;;  %v2673_v19 = vmul.f32 %v5082_v7, %v2672_v16  ;;  %v2813_v43 = vadd.f32 %v2667_v4, %v2449_v62 }
 0x323   :  { %v2504_v54 = vsub.f32 0.0, %v2478_v6 }
 0x324   :  { %v2383_v53 = vpop.f32.mrf.mxu3 }
 0x325   :  { %v5086_v1 = vpop.eup %5085  ;;  %v2543_v29 = vmul.f32 1.442695, %v2504_v54  ;;  %v2384_v51 = vadd.f32 %v6491_v10, %v2383_v53  ;;  %v2452_v54 = vmax.f32 %v6692_v3, 0.0 }
 0x326   :  { %v5088_v41 = vpop.eup %5087  ;;  %v2677_v25 = vadd.f32 1.0, %v5086_v1  ;;  %v2680_v57 = vmul.f32 -0.5, %v5086_v1  ;;  %v2683_v50 = vand.u32 2147483647, %v5086_v1 }
 0x327   :  { %5089 = vpow2.f32 %v2543_v29  ;;  %v6697_v37 = vadd.f32 %v2384_v51, %v6320_v17  ;;  %v2670_v56 = vmul.f32 0.6931472, %v5088_v41 }
 0x328   :  { %5091 = vlog2.f32 %v2677_v25  ;;  %v2681_v26 = vadd.f32 1.0, %v2680_v57  ;;  %vm2684_vm6 = vcmp.lt.f32.partialorder %v2683_v50, 0.0004427343 }
 0x329   :  { %v2479_v9 = vand.u32 2147483647, %v6697_v37  ;;  %v2676_v23 = vsel %vm2675_vm5, %v2673_v19, %v2670_v56 }
 0x32a   :  { %v2814_v52 = vadd.f32 %v2676_v23, %v2450_v48  ;;  %v2682_v27 = vmul.f32 %v5086_v1, %v2681_v26  ;;  %v2453_v26 = vmax.f32 %v6697_v37, 0.0 }
 0x32b   :  { %v2505_v42 = vsub.f32 0.0, %v2479_v9 }
 0x32c   :  { %v2385_v44 = vpop.f32.mrf.mxu3  ;;  %v2834_v61 = vpack.c.bf16 %v2814_v52, %v2813_v43 }
 0x32d   :  { %v5090_v11 = vpop.eup %5089  ;;  %v2545_v17 = vmul.f32 1.442695, %v2505_v42  ;;  %v2386_v58 = vadd.f32 %v6491_v10, %v2385_v44 }
 0x32e   :  { %2943 = vmatmul.bf16.gmra.mxu0 %v2834_v61  ;;  %v2686_v39 = vadd.f32 1.0, %v5090_v11  ;;  %v5092_v55 = vpop.eup %5091  ;;  %v2689_v59 = vmul.f32 -0.5, %v5090_v11  ;;  %v2692_v7 = vand.u32 2147483647, %v5090_v11 }
 0x32f   :  { %5093 = vpow2.f32 %v2545_v17  ;;  %v6704_v49 = vadd.f32 %v2386_v58, %v6327_v47  ;;  %v2679_v38 = vmul.f32 0.6931472, %v5092_v55 }
 0x330   :  { %5095 = vlog2.f32 %v2686_v39  ;;  %v2690_v31 = vadd.f32 1.0, %v2689_v59  ;;  %vm2693_vm0 = vcmp.lt.f32.partialorder %v2692_v7, 0.0004427343 }
 0x331   :  { %v2480_v18 = vand.u32 2147483647, %v6704_v49  ;;  %v2685_v12 = vsel %vm2684_vm6, %v2682_v27, %v2679_v38 }
 0x332   :  { %v2691_v24 = vmul.f32 %v5090_v11, %v2690_v31  ;;  %v2815_v40 = vadd.f32 %v2685_v12, %v2451_v22 }
 0x333   :  { %v2506_v15 = vsub.f32 0.0, %v2480_v18  ;;  %v2454_v18 = vmax.f32 %v6704_v49, 0.0  ;;  %v4506_v49 = vld [vmem:[#allocation7 + $0x8] sm:$0xff] }
 0x334   :  { %v2388_v36 = vpop.f32.mrf.mxu3  ;;  %3461 = vmatpush.bf16.msrb.mxu1 %v4506_v49 }
 0x335   :  { %v5094_v63 = vpop.eup %5093  ;;  %v2547_v8 = vmul.f32 1.442695, %v2506_v15  ;;  %v2389_v45 = vadd.f32 %v6491_v10, %v2388_v36 }
 0x336   :  { %v5096_v47 = vpop.eup %5095  ;;  %v2695_v46 = vadd.f32 1.0, %v5094_v63  ;;  %v2698_v41 = vmul.f32 -0.5, %v5094_v63  ;;  %v2701_v9 = vand.u32 2147483647, %v5094_v63 }
 0x337   :  { %5097 = vpow2.f32 %v2547_v8  ;;  %v6709_v14 = vadd.f32 %v2389_v45, %v6338_v20  ;;  %v2688_v6 = vmul.f32 0.6931472, %v5096_v47  ;;  %v6729_v8 = vld [vmem:[%s7380_s8] ss:$0 sm:$0xff] }
 0x338   :  { %5099 = vlog2.f32 %v2695_v46  ;;  %v2699_v62 = vadd.f32 1.0, %v2698_v41  ;;  %vm2702_vm7 = vcmp.lt.f32.partialorder %v2701_v9, 0.0004427343  ;;  %v6735_v45 = vld [vmem:[%s7382_s10] ss:$0 sm:$0xff] }
 0x339   :  { %v2481_v16 = vand.u32 2147483647, %v6709_v14  ;;  %v2694_v53 = vsel %vm2693_vm0, %v2691_v24, %v2688_v6 }
 0x33a   :  { %v2816_v21 = vadd.f32 %v2694_v53, %v2452_v54  ;;  %v2700_v44 = vmul.f32 %v5094_v63, %v2699_v62 }
 0x33b   :  { %v2507_v1 = vsub.f32 0.0, %v2481_v16 }
 0x33c   :  { %v2390_v29 = vpop.f32.mrf.mxu3  ;;  %v2835_v51 = vpack.c.bf16 %v2816_v21, %v2815_v40 }
 0x33d   :  { %v5098_v4 = vpop.eup %5097  ;;  %v2549_v20 = vmul.f32 1.442695, %v2507_v1  ;;  %v2391_v25 = vadd.f32 %v6491_v10, %v2390_v29 }
 0x33e   :  { %2948 = vmatmul.bf16.gmra.mxu0 %v2835_v51  ;;  %v2704_v56 = vadd.f32 1.0, %v5098_v4  ;;  %v5100_v0 = vpop.eup %5099  ;;  %v2707_v19 = vmul.f32 -0.5, %v5098_v4  ;;  %v2710_v61 = vand.u32 2147483647, %v5098_v4 }
 0x33f   :  { %5101 = vpow2.f32 %v2549_v20  ;;  %v6716_v3 = vadd.f32 %v2391_v25, %v6345_v5  ;;  %v2697_v23 = vmul.f32 0.6931472, %v5100_v0 }
 0x340   :  { %5103 = vlog2.f32 %v2704_v56  ;;  %v2708_v52 = vadd.f32 1.0, %v2707_v19  ;;  %vm2711_vm8 = vcmp.lt.f32.partialorder %v2710_v61, 0.0004427343 }
 0x341   :  { %v2482_v48 = vand.u32 2147483647, %v6716_v3  ;;  %v2703_v5 = vsel %vm2702_vm7, %v2700_v44, %v2697_v23  ;;  %v2456_v44 = vmax.f32 %v6716_v3, 0.0 }
 0x342   :  { %v2709_v30 = vmul.f32 %v5098_v4, %v2708_v52  ;;  %v4505_v52 = vld [vmem:[#allocation7] sm:$0xff] }
 0x343   :  { %v2508_v43 = vsub.f32 0.0, %v2482_v48  ;;  %3462 = vmatpush.bf16.msrb.mxu1 %v4505_v52 }
 0x345   :  { %v2393_v42 = vpop.f32.mrf.mxu3  ;;  %v5102_v57 = vpop.eup %5101  ;;  %v2551_v11 = vmul.f32 1.442695, %v2508_v43 }
 0x346   :  { %v2394_v17 = vadd.f32 %v6491_v10, %v2393_v42  ;;  %v5104_v58 = vpop.eup %5103  ;;  %v2713_v39 = vadd.f32 1.0, %v5102_v57  ;;  %v2817_v10 = vadd.f32 %v2703_v5, %v2453_v26  ;;  %v2716_v7 = vmul.f32 -0.5, %v5102_v57 }
 0x347   :  { %5105 = vpow2.f32 %v2551_v11  ;;  %v2706_v59 = vmul.f32 0.6931472, %v5104_v58  ;;  %v2719_v16 = vand.u32 2147483647, %v5102_v57  ;;  %v2455_v42 = vmax.f32 %v6709_v14, 0.0 }
 0x348   :  { %v6721_v55 = vadd.f32 %v2394_v17, %v6352_v33  ;;  %5107 = vlog2.f32 %v2713_v39  ;;  %v2717_v24 = vadd.f32 1.0, %v2716_v7 }
 0x349   :  { %v2712_v38 = vsel %vm2711_vm8, %v2709_v30, %v2706_v59  ;;  %vm6746_vm9 = vcmp.lt.f32.partialorder %v2719_v16, 0.0004427343 }
 0x34a   :  { %v2483_v50 = vand.u32 2147483647, %v6721_v55  ;;  %v2818_v15 = vadd.f32 %v2712_v38, %v2454_v18  ;;  %v2718_v41 = vmul.f32 %v5102_v57, %v2717_v24 }
 0x34c   :  { %v2509_v31 = vsub.f32 0.0, %v2483_v50  ;;  %v2836_v27 = vpack.c.bf16 %v2818_v15, %v2817_v10 }
 0x34d   :  { %v2395_v36 = vpop.f32.mrf.mxu3  ;;  %v5106_v63 = vpop.eup %5105 }
 0x34e   :  { %v2553_v33 = vmul.f32 1.442695, %v2509_v31  ;;  %v2396_v37 = vadd.f32 %v6729_v8, %v2395_v36  ;;  %2953 = vmatmul.bf16.gmra.mxu0 %v2836_v27  ;;  %v2722_v47 = vadd.f32 1.0, %v5106_v63  ;;  %v5108_v12 = vpop.eup %5107  ;;  %v2725_v6 = vmul.f32 -0.5, %v5106_v63 }
 0x34f   :  { %v2715_v40 = vmul.f32 0.6931472, %v5108_v12 }
 0x350   :  { %5109 = vpow2.f32 %v2553_v33  ;;  %v6738_v46 = vadd.f32 %v2396_v37, %v6358_v28  ;;  %v2726_v1 = vadd.f32 1.0, %v2725_v6  ;;  %v2728_v28 = vand.u32 2147483647, %v5106_v63 }
 0x351   :  { %5111 = vlog2.f32 %v2722_v47  ;;  %v2721_v62 = vsel %vm6746_vm9, %v2718_v41, %v2715_v40 }
 0x352   :  { %v2484_v22 = vand.u32 2147483647, %v6738_v46  ;;  %v2727_v43 = vmul.f32 %v5106_v63, %v2726_v1  ;;  %vm2729_vm10 = vcmp.lt.f32.partialorder %v2728_v28, 0.0004427343  ;;  %v2819_v58 = vadd.f32 %v2721_v62, %v2455_v42 }
 0x353   :  { %v2457_v62 = vmax.f32 %v6721_v55, 0.0 }
 0x354   :  { %v2510_v21 = vsub.f32 0.0, %v2484_v22 }
 0x355   :  { %v2398_v29 = vpop.f32.mrf.mxu3 }
 0x356   :  { %v5110_v4 = vpop.eup %5109  ;;  %v2555_v20 = vmul.f32 1.442695, %v2510_v21  ;;  %v2399_v25 = vadd.f32 %v6729_v8, %v2398_v29 }
 0x357   :  { %v5112_v0 = vpop.eup %5111  ;;  %v2731_v48 = vadd.f32 1.0, %v5110_v4  ;;  %v2734_v50 = vmul.f32 -0.5, %v5110_v4  ;;  %v2737_v49 = vand.u32 2147483647, %v5110_v4 }
 0x358   :  { %5113 = vpow2.f32 %v2555_v20  ;;  %v6753_v9 = vadd.f32 %v2399_v25, %v6137_v32  ;;  %v2724_v23 = vmul.f32 0.6931472, %v5112_v0 }
 0x359   :  { %v2919_v54 = vpop.f32.mrf.mxu0  ;;  %5115 = vlog2.f32 %v2731_v48  ;;  %v2735_v33 = vadd.f32 1.0, %v2734_v50  ;;  %vm6774_vm11 = vcmp.lt.f32.partialorder %v2737_v49, 0.0004427343 }
 0x35a   :  { %v6742_v53 = vadd.f32 %v6735_v45, %v2919_v54  ;;  %v2485_v57 = vand.u32 2147483647, %v6753_v9  ;;  %v2730_v11 = vsel %vm2729_vm10, %v2727_v43, %v2724_v23 }
 0x35b   :  { %v2820_v5 = vadd.f32 %v2730_v11, %v2456_v44  ;;  %v2736_v16 = vmul.f32 %v5110_v4, %v2735_v33 }
 0x35c   :  { %v3010_v51 = vand.u32 2147483647, %v6742_v53  ;;  %v2511_v39 = vsub.f32 0.0, %v2485_v57 }
 0x35d   :  { %v2400_v59 = vpop.f32.mrf.mxu3  ;;  %v2837_v30 = vpack.c.bf16 %v2820_v5, %v2819_v58 }
 0x35e   :  { %v3036_v19 = vsub.f32 0.0, %v3010_v51  ;;  %v5114_v3 = vpop.eup %5113  ;;  %v2557_v26 = vmul.f32 1.442695, %v2511_v39  ;;  %v2401_v18 = vadd.f32 %v6729_v8, %v2400_v59 }
 0x35f   :  { %2958 = vmatmul.bf16.gmra.mxu0 %v2837_v30  ;;  %v2740_v10 = vadd.f32 1.0, %v5114_v3  ;;  %v5116_v15 = vpop.eup %5115  ;;  %v2743_v7 = vmul.f32 -0.5, %v5114_v3  ;;  %v2746_v40 = vand.u32 2147483647, %v5114_v3 }
 0x360   :  { %v3062_v61 = vmul.f32 1.442695, %v3036_v19  ;;  %v6764_v31 = vadd.f32 %v2401_v18, %v6147_v34  ;;  %v2733_v47 = vmul.f32 0.6931472, %v5116_v15 }
 0x361   :  { %v2921_v17 = vpop.f32.mrf.mxu0  ;;  %v2744_v34 = vadd.f32 1.0, %v2743_v7  ;;  %vm2747_vm12 = vcmp.lt.f32.partialorder %v2746_v40, 0.0004427343 }
 0x362   :  { %5117 = vpow2.f32 %v3062_v61  ;;  %v6759_v32 = vadd.f32 %v6735_v45, %v2921_v17  ;;  %v2486_v37 = vand.u32 2147483647, %v6764_v31  ;;  %v2739_v20 = vsel %vm6774_vm11, %v2736_v16, %v2733_v47 }
 0x363   :  { %5119 = vpow2.f32 %v2557_v26  ;;  %v2745_v0 = vmul.f32 %v5114_v3, %v2744_v34  ;;  %v2821_v57 = vadd.f32 %v2739_v20, %v2457_v62  ;;  %v2984_v34 = vmax.f32 %v6742_v53, 0.0 }
 0x364   :  { %v3011_v14 = vand.u32 2147483647, %v6759_v32  ;;  %5121 = vlog2.f32 %v2740_v10  ;;  %v2512_v6 = vsub.f32 0.0, %v2486_v37 }
 0x365   :  { %v2403_v24 = vpop.f32.mrf.mxu3 }
 0x366   :  { %v3037_v38 = vsub.f32 0.0, %v3011_v14  ;;  %v2404_v54 = vadd.f32 %v6729_v8, %v2403_v24  ;;  %v2559_v1 = vmul.f32 1.442695, %v2512_v6 }
 0x368   :  { %v6766_v36 = vpop.eup %5117  ;;  %v3064_v27 = vmul.f32 1.442695, %v3037_v38  ;;  %v6779_v41 = vadd.f32 %v2404_v54, %v6181_v13  ;;  %v2458_v13 = vmax.f32 %v6738_v46, 0.0  ;;  %v2985_v54 = vmax.f32 %v6759_v32, 0.0 }
 0x369   :  { %v3114_v63 = vadd.f32 1.0, %v6766_v36  ;;  %v3117_v12 = vmul.f32 -0.5, %v6766_v36  ;;  %v6771_v22 = vpop.eup %5119  ;;  %v2924_v29 = vpop.f32.mrf.mxu0  ;;  %v3120_v44 = vand.u32 2147483647, %v6766_v36 }
 0x36a   :  { %5123 = vpow2.f32 %v3064_v27  ;;  %v5122_v21 = vpop.eup %5121  ;;  %v6782_v28 = vadd.f32 %v6735_v45, %v2924_v29  ;;  %v2749_v19 = vadd.f32 1.0, %v6771_v22  ;;  %v2487_v52 = vand.u32 2147483647, %v6779_v41  ;;  %v4520_v27 = vld [vmem:[#allocation9 + $0x38] sm:$0xff] }
 0x36b   :  { %5125 = vlog2.f32 %v3114_v63  ;;  %v2742_v25 = vmul.f32 0.6931472, %v5122_v21  ;;  %v3118_v4 = vadd.f32 1.0, %v3117_v12  ;;  %v2752_v59 = vmul.f32 -0.5, %v6771_v22  ;;  %4000 = vmatpush.bf16.msrb.mxu2 %v4520_v27 }
 0x36c   :  { %5127 = vpow2.f32 %v2559_v1  ;;  %v3012_v61 = vand.u32 2147483647, %v6782_v28  ;;  %v2513_v17 = vsub.f32 0.0, %v2487_v52  ;;  %vm6801_vm13 = vcmp.lt.f32.partialorder %v3120_v44, 0.0004427343 }
 0x36d   :  { %v2748_v42 = vsel %vm2747_vm12, %v2745_v0, %v2742_v25  ;;  %v3119_v11 = vmul.f32 %v6766_v36, %v3118_v4  ;;  %v2405_v58 = vpop.f32.mrf.mxu3  ;;  %v2755_v7 = vand.u32 2147483647, %v6771_v22  ;;  %v2753_v49 = vadd.f32 1.0, %v2752_v59 }
 0x36e   :  { %v2822_v55 = vadd.f32 %v2748_v42, %v2458_v13  ;;  %v3038_v39 = vsub.f32 0.0, %v3012_v61  ;;  %v2406_v46 = vadd.f32 %v6729_v8, %v2405_v58  ;;  %v2561_v26 = vmul.f32 1.442695, %v2513_v17 }
 0x36f   :  { %v2754_v62 = vmul.f32 %v6771_v22, %v2753_v49  ;;  %vm6814_vm15 = vcmp.lt.f32.partialorder %v2755_v7, 0.0004427343 }
 0x370   :  { %v5124_v56 = vpop.eup %5123  ;;  %v2838_v18 = vpack.c.bf16 %v2822_v55, %v2821_v57  ;;  %v3066_v38 = vmul.f32 1.442695, %v3038_v39  ;;  %v6796_v10 = vadd.f32 %v2406_v46, %v6205_v2 }
 0x371   :  { %v3123_v48 = vadd.f32 1.0, %v5124_v56  ;;  %v5126_v23 = vpop.eup %5125  ;;  %v3126_v43 = vmul.f32 -0.5, %v5124_v56  ;;  %v3129_v3 = vand.u32 2147483647, %v5124_v56  ;;  %v2926_v50 = vpop.f32.mrf.mxu0 }
 0x372   :  { %v3116_v5 = vmul.f32 0.6931472, %v5126_v23  ;;  %v5128_v30 = vpop.eup %5127  ;;  %v6799_v15 = vadd.f32 %v6735_v45, %v2926_v50  ;;  %2963 = vmatmul.bf16.gmra.mxu0 %v2838_v18  ;;  %v2488_v2 = vand.u32 2147483647, %v6796_v10 }
 0x373   :  { %5129 = vlog2.f32 %v3123_v48  ;;  %v3127_v14 = vadd.f32 1.0, %v3126_v43  ;;  %v2758_v36 = vadd.f32 1.0, %v5128_v30  ;;  %v2761_v63 = vmul.f32 -0.5, %v5128_v30 }
 0x374   :  { %5131 = vlog2.f32 %v2749_v19  ;;  %v3122_v37 = vsel %vm6801_vm13, %v3119_v11, %v3116_v5  ;;  %v3013_v24 = vand.u32 2147483647, %v6799_v15  ;;  %vm3130_vm14 = vcmp.lt.f32.partialorder %v3129_v3, 0.0004427343 }
 0x375   :  { %5133 = vpow2.f32 %v2561_v26  ;;  %v3128_v6 = vmul.f32 %v5124_v56, %v3127_v14  ;;  %v2514_v16 = vsub.f32 0.0, %v2488_v2  ;;  %v2408_v1 = vpop.f32.mrf.mxu3  ;;  %v2762_v51 = vadd.f32 1.0, %v2761_v63 }
 0x376   :  { %5135 = vpow2.f32 %v3066_v38  ;;  %v3039_v21 = vsub.f32 0.0, %v3013_v24  ;;  %v3348_v20 = vadd.f32 %v3122_v37, %v2984_v34  ;;  %v2409_v0 = vadd.f32 %v6729_v8, %v2408_v1 }
 0x377   :  { %5137 = vlog2.f32 %v2758_v36  ;;  %v2563_v4 = vmul.f32 1.442695, %v2514_v16  ;;  %v2764_v32 = vand.u32 2147483647, %v5128_v30  ;;  %v2763_v44 = vmul.f32 %v5128_v30, %v2762_v51 }
 0x378   :  { %v3068_v19 = vmul.f32 1.442695, %v3039_v21  ;;  %v6821_v23 = vadd.f32 %v2409_v0, %v6227_v35  ;;  %v2459_v11 = vmax.f32 %v6753_v9, 0.0  ;;  %v2460_v35 = vmax.f32 %v6764_v31, 0.0 }
 0x379   :  { %v5130_v33 = vpop.eup %5129  ;;  %5139 = vpow2.f32 %v2563_v4  ;;  %vm2765_vm1 = vcmp.lt.f32.partialorder %v2764_v32, 0.0004427343 }
 0x37a   :  { %v5132_v47 = vpop.eup %5131  ;;  %v3125_v12 = vmul.f32 0.6931472, %v5130_v33  ;;  %5141 = vpow2.f32 %v3068_v19  ;;  %v2489_v22 = vand.u32 2147483647, %v6821_v23 }
 0x37b   :  { %v2751_v29 = vmul.f32 0.6931472, %v5132_v47  ;;  %v5134_v56 = vpop.eup %5133  ;;  %v2929_v58 = vpop.f32.mrf.mxu0 }
 0x37c   :  { %v3131_v40 = vsel %vm3130_vm14, %v3128_v6, %v3125_v12  ;;  %v6818_v48 = vpop.eup %5135  ;;  %v2767_v43 = vadd.f32 1.0, %v5134_v56  ;;  %v2515_v17 = vsub.f32 0.0, %v2489_v22  ;;  %v6830_v5 = vadd.f32 %v6735_v45, %v2929_v58 }
 0x37d   :  { %v3349_v25 = vadd.f32 %v3131_v40, %v2985_v54  ;;  %v5138_v52 = vpop.eup %5137  ;;  %v2757_v42 = vsel %vm6814_vm15, %v2754_v62, %v2751_v29  ;;  %v3132_v57 = vadd.f32 1.0, %v6818_v48  ;;  %v2410_v39 = vpop.f32.mrf.mxu3  ;;  %v2770_v30 = vmul.f32 -0.5, %v5134_v56 }
 0x37e   :  { %v2760_v61 = vmul.f32 0.6931472, %v5138_v52  ;;  %5143 = vlog2.f32 %v2767_v43  ;;  %v2823_v46 = vadd.f32 %v2757_v42, %v2459_v11  ;;  %v2565_v3 = vmul.f32 1.442695, %v2515_v17 }
 0x37f   :  { %v3374_v13 = vpack.c.bf16 %v3349_v25, %v3348_v20  ;;  %v5140_v14 = vpop.eup %5139  ;;  %v2411_v26 = vadd.f32 %v6729_v8, %v2410_v39  ;;  %5145 = vlog2.f32 %v3132_v57  ;;  %v3014_v9 = vand.u32 2147483647, %v6830_v5 }
 0x380   :  { %v2766_v55 = vsel %vm2765_vm1, %v2763_v44, %v2760_v61  ;;  %v6833_v18 = vpop.eup %5141  ;;  %v2776_v50 = vadd.f32 1.0, %v5140_v14  ;;  %5147 = vpow2.f32 %v2565_v3  ;;  %v2773_v7 = vand.u32 2147483647, %v5134_v56 }
 0x381   :  { %3463 = vmatmul.bf16.vlgmr.msrb.gmra.mxu1 %v3374_v13  ;;  %v2824_v59 = vadd.f32 %v2766_v55, %v2460_v35  ;;  %v6837_v36 = vadd.f32 %v2411_v26, %v6252_v60  ;;  %v2779_v63 = vmul.f32 -0.5, %v5140_v14  ;;  %v3040_v33 = vsub.f32 0.0, %v3014_v9 }
 0x382   :  { %v2771_v37 = vadd.f32 1.0, %v2770_v30  ;;  %5149 = vlog2.f32 %v2776_v50  ;;  %v3135_v2 = vmul.f32 -0.5, %v6818_v48  ;;  %v3141_v12 = vadd.f32 1.0, %v6833_v18 }
 0x383   :  { %v2839_v31 = vpack.c.bf16 %v2824_v59, %v2823_v46  ;;  %v2490_v8 = vand.u32 2147483647, %v6837_v36  ;;  %v3070_v49 = vmul.f32 1.442695, %v3040_v33  ;;  %v2931_v60 = vpop.f32.mrf.mxu0  ;;  %vm6842_vm2 = vcmp.lt.f32.partialorder %v2773_v7, 0.0004427343 }
 0x384   :  { %v5144_v38 = vpop.eup %5143  ;;  %v2780_v54 = vadd.f32 1.0, %v2779_v63  ;;  %v3144_v16 = vmul.f32 -0.5, %v6833_v18  ;;  %v6848_v40 = vadd.f32 %v6735_v45, %v2931_v60  ;;  %v2772_v21 = vmul.f32 %v5134_v56, %v2771_v37 }
 0x385   :  { %2968 = vmatmul.bf16.gmra.mxu0 %v2839_v31  ;;  %v2769_v47 = vmul.f32 0.6931472, %v5144_v38  ;;  %v5146_v6 = vpop.eup %5145  ;;  %v2516_v24 = vsub.f32 0.0, %v2490_v8  ;;  %5151 = vpow2.f32 %v3070_v49  ;;  %v2782_v1 = vand.u32 2147483647, %v5140_v14 }
 0x386   :  { %v6850_v29 = vpop.eup %5147  ;;  %v3136_v20 = vadd.f32 1.0, %v3135_v2  ;;  %v3138_v25 = vand.u32 2147483647, %v6818_v48  ;;  %5153 = vlog2.f32 %v3141_v12  ;;  %v3015_v0 = vand.u32 2147483647, %v6848_v40 }
 0x387   :  { %v2567_v51 = vmul.f32 1.442695, %v2516_v24  ;;  %v2775_v19 = vsel %vm6842_vm2, %v2772_v21, %v2769_v47  ;;  %v3134_v62 = vmul.f32 0.6931472, %v5146_v6  ;;  %v2785_v53 = vadd.f32 1.0, %v6850_v29 }
 0x388   :  { %v5150_v4 = vpop.eup %5149  ;;  %v2781_v56 = vmul.f32 %v5140_v14, %v2780_v54  ;;  %v3145_v13 = vadd.f32 1.0, %v3144_v16  ;;  %v2461_v43 = vmax.f32 %v6779_v41, 0.0  ;;  %v2462_v52 = vmax.f32 %v6796_v10, 0.0 }
 0x389   :  { %5155 = vpow2.f32 %v2567_v51  ;;  %v2778_v32 = vmul.f32 0.6931472, %v5150_v4  ;;  %v3041_v42 = vsub.f32 0.0, %v3015_v0  ;;  %vm2783_vm3 = vcmp.lt.f32.partialorder %v2782_v1, 0.0004427343 }
 0x38a   :  { %v3137_v22 = vmul.f32 %v6818_v48, %v3136_v20  ;;  %v3147_v61 = vand.u32 2147483647, %v6833_v18  ;;  %5157 = vlog2.f32 %v2785_v53  ;;  %v2825_v35 = vadd.f32 %v2775_v19, %v2461_v43  ;;  %v4519_v53 = vld [vmem:[#allocation9 + $0x30] sm:$0xff] }
 0x38b   :  { %v2784_v44 = vsel %vm2783_vm3, %v2781_v56, %v2778_v32  ;;  %v6861_v57 = vpop.eup %5151  ;;  %v3072_v11 = vmul.f32 1.442695, %v3041_v42  ;;  %vm6863_vm4 = vcmp.lt.f32.partialorder %v3138_v25, 0.0004427343  ;;  %v2934_v55 = vpop.f32.mrf.mxu0  ;;  %v3146_v48 = vmul.f32 %v6833_v18, %v3145_v13  ;;  %4001 = vmatpush.bf16.msrb.mxu2 %v4519_v53 }
 0x38c   :  { %v2826_v17 = vadd.f32 %v2784_v44, %v2462_v52  ;;  %v5154_v41 = vpop.eup %5153  ;;  %v3150_v10 = vadd.f32 1.0, %v6861_v57  ;;  %v3140_v39 = vsel %vm6863_vm4, %v3137_v22, %v3134_v62  ;;  %v2788_v46 = vmul.f32 -0.5, %v6850_v29 }
 0x38d   :  { %5159 = vpow2.f32 %v3072_v11  ;;  %v6873_v59 = vadd.f32 %v6735_v45, %v2934_v55  ;;  %v3143_v14 = vmul.f32 0.6931472, %v5154_v41  ;;  %v2986_v26 = vmax.f32 %v6782_v28, 0.0 }
 0x38e   :  { %v2840_v30 = vpack.c.bf16 %v2826_v17, %v2825_v35  ;;  %v2987_v9 = vmax.f32 %v6799_v15, 0.0  ;;  %vm3148_vm5 = vcmp.lt.f32.partialorder %v3147_v61, 0.0004427343  ;;  %5161 = vlog2.f32 %v3150_v10 }
 0x38f   :  { %v5156_v3 = vpop.eup %5155  ;;  %v3016_v31 = vand.u32 2147483647, %v6873_v59  ;;  %v3149_v50 = vsel %vm3148_vm5, %v3146_v48, %v3143_v14  ;;  %v3350_v27 = vadd.f32 %v3140_v39, %v2986_v26  ;;  %v2789_v37 = vadd.f32 1.0, %v2788_v46 }
 0x390   :  { %v2794_v38 = vadd.f32 1.0, %v5156_v3  ;;  %v5158_v18 = vpop.eup %5157  ;;  %v3351_v7 = vadd.f32 %v3149_v50, %v2987_v9  ;;  %v2797_v63 = vmul.f32 -0.5, %v5156_v3  ;;  %v3153_v8 = vmul.f32 -0.5, %v6861_v57 }
 0x391   :  { %v3042_v33 = vsub.f32 0.0, %v3016_v31  ;;  %v2791_v28 = vand.u32 2147483647, %v6850_v29  ;;  %v2787_v47 = vmul.f32 0.6931472, %v5158_v18  ;;  %v2790_v16 = vmul.f32 %v6850_v29, %v2789_v37 }
 0x392   :  { %5163 = vlog2.f32 %v2794_v38  ;;  %v3375_v2 = vpack.c.bf16 %v3351_v7, %v3350_v27  ;;  %v2798_v60 = vadd.f32 1.0, %v2797_v63  ;;  %v2800_v21 = vand.u32 2147483647, %v5156_v3 }
 0x393   :  { %v5160_v15 = vpop.eup %5159  ;;  %v3074_v49 = vmul.f32 1.442695, %v3042_v33  ;;  %v2936_v24 = vpop.f32.mrf.mxu0  ;;  %v3154_v1 = vadd.f32 1.0, %v3153_v8  ;;  %vm6884_vm6 = vcmp.lt.f32.partialorder %v2791_v28, 0.0004427343  ;;  %v2463_v56 = vmax.f32 %v6821_v23, 0.0 }
 0x394   :  { %v3159_v12 = vadd.f32 1.0, %v5160_v15  ;;  %v3162_v6 = vmul.f32 -0.5, %v5160_v15  ;;  %3468 = vmatmul.bf16.gmra.mxu1 %v3375_v2  ;;  %v5162_v34 = vpop.eup %5161  ;;  %v6881_v54 = vadd.f32 %v6735_v45, %v2936_v24  ;;  %v3156_v25 = vand.u32 2147483647, %v6861_v57  ;;  %v4518_v28 = vld [vmem:[#allocation9 + $0x28] sm:$0xff] }
 0x395   :  { %2973 = vmatmul.bf16.gmra.mxu0 %v2840_v30  ;;  %5165 = vpow2.f32 %v3074_v49  ;;  %v2793_v0 = vsel %vm6884_vm6, %v2790_v16, %v2787_v47  ;;  %v3152_v19 = vmul.f32 0.6931472, %v5162_v34  ;;  %v2799_v29 = vmul.f32 %v5156_v3, %v2798_v60  ;;  %4002 = vmatpush.bf16.msrb.mxu2 %v4518_v28 }
 0x396   :  { %5167 = vlog2.f32 %v3159_v12  ;;  %v3017_v4 = vand.u32 2147483647, %v6881_v54  ;;  %v3163_v62 = vadd.f32 1.0, %v3162_v6  ;;  %v2464_v13 = vmax.f32 %v6837_v36, 0.0 }
 0x397   :  { %vm2801_vm0 = vcmp.lt.f32.partialorder %v2800_v21, 0.0004427343  ;;  %v3155_v52 = vmul.f32 %v6861_v57, %v3154_v1  ;;  %v3165_v42 = vand.u32 2147483647, %v5160_v15  ;;  %vm6895_vm7 = vcmp.lt.f32.partialorder %v3156_v25, 0.0004427343 }
 0x398   :  { %v5164_v20 = vpop.eup %5163  ;;  %v3043_v43 = vsub.f32 0.0, %v3017_v4  ;;  %v2827_v35 = vadd.f32 %v2793_v0, %v2463_v56  ;;  %v3164_v36 = vmul.f32 %v5160_v15, %v3163_v62  ;;  %v2988_v48 = vmax.f32 %v6830_v5, 0.0 }
 0x399   :  { %v2796_v32 = vmul.f32 0.6931472, %v5164_v20  ;;  %v3158_v23 = vsel %vm6895_vm7, %v3155_v52, %v3152_v19  ;;  %v2989_v46 = vmax.f32 %v6848_v40, 0.0  ;;  %vm3166_vm8 = vcmp.lt.f32.partialorder %v3165_v42, 0.0004427343 }
 0x39a   :  { %v3076_v11 = vmul.f32 1.442695, %v3043_v43  ;;  %v3352_v3 = vadd.f32 %v3158_v23, %v2988_v48  ;;  %v2990_v4 = vmax.f32 %v6873_v59, 0.0  ;;  %v2991_v0 = vmax.f32 %v6881_v54, 0.0 }
 0x39b   :  { %v2802_v44 = vsel %vm2801_vm0, %v2799_v29, %v2796_v32  ;;  %v5166_v22 = vpop.eup %5165  ;;  %v2939_v10 = vpop.f32.mrf.mxu0 }
 0x39c   :  { %v2828_v17 = vadd.f32 %v2802_v44, %v2464_v13  ;;  %v5168_v58 = vpop.eup %5167  ;;  %v3168_v41 = vadd.f32 1.0, %v5166_v22  ;;  %5169 = vpow2.f32 %v3076_v11  ;;  %v6902_v57 = vadd.f32 %v6735_v45, %v2939_v10 }
 0x39d   :  { %v3161_v55 = vmul.f32 0.6931472, %v5168_v58  ;;  %v3171_v31 = vmul.f32 -0.5, %v5166_v22  ;;  %v3174_v37 = vand.u32 2147483647, %v5166_v22 }
 0x39e   :  { %v2841_v39 = vpack.c.bf16 %v2828_v17, %v2827_v35  ;;  %5171 = vlog2.f32 %v3168_v41  ;;  %v3018_v14 = vand.u32 2147483647, %v6902_v57 }
 0x39f   :  { %v3167_v30 = vsel %vm3166_vm8, %v3164_v36, %v3161_v55  ;;  %v3172_v33 = vadd.f32 1.0, %v3171_v31  ;;  %vm6911_vm9 = vcmp.lt.f32.partialorder %v3174_v37, 0.0004427343  ;;  %v2992_v31 = vmax.f32 %v6902_v57, 0.0 }
 0x3a0   :  { %v3353_v26 = vadd.f32 %v3167_v30, %v2989_v46  ;;  %v3044_v9 = vsub.f32 0.0, %v3018_v14 }
 0x3a1   :  { %v3173_v47 = vmul.f32 %v5166_v22, %v3172_v33 }
 0x3a2   :  { %v3376_v50 = vpack.c.bf16 %v3353_v26, %v3352_v3  ;;  %v5170_v38 = vpop.eup %5169  ;;  %v3078_v18 = vmul.f32 1.442695, %v3044_v9 }
 0x3a3   :  { %v3177_v27 = vadd.f32 1.0, %v5170_v38  ;;  %v2941_v7 = vpop.f32.mrf.mxu0  ;;  %v3180_v5 = vmul.f32 -0.5, %v5170_v38  ;;  %v3183_v12 = vand.u32 2147483647, %v5170_v38 }
 0x3a4   :  { %3473 = vmatmul.bf16.gmra.mxu1 %v3376_v50  ;;  %v5172_v63 = vpop.eup %5171  ;;  %5173 = vpow2.f32 %v3078_v18  ;;  %v6908_v40 = vadd.f32 %v6735_v45, %v2941_v7 }
 0x3a5   :  { %2978 = vmatmul.bf16.gmra.mxu0 %v2841_v39  ;;  %5175 = vlog2.f32 %v3177_v27  ;;  %v3170_v2 = vmul.f32 0.6931472, %v5172_v63  ;;  %v3181_v15 = vadd.f32 1.0, %v3180_v5  ;;  %vm3184_vm10 = vcmp.lt.f32.partialorder %v3183_v12, 0.0004427343  ;;  %v4517_v63 = vld [vmem:[#allocation9 + $0x20] sm:$0xff] }
 0x3a6   :  { %v3019_v8 = vand.u32 2147483647, %v6908_v40  ;;  %v2993_v50 = vmax.f32 %v6908_v40, 0.0  ;;  %4003 = vmatpush.bf16.msrb.mxu2 %v4517_v63 }
 0x3a7   :  { %v3176_v16 = vsel %vm6911_vm9, %v3173_v47, %v3170_v2  ;;  %v3182_v20 = vmul.f32 %v5170_v38, %v3181_v15 }
 0x3a8   :  { %v3045_v49 = vsub.f32 0.0, %v3019_v8  ;;  %v3354_v53 = vadd.f32 %v3176_v16, %v2990_v4 }
 0x3aa   :  { %v5174_v6 = vpop.eup %5173  ;;  %v3080_v60 = vmul.f32 1.442695, %v3045_v49 }
 0x3ab   :  { %v5176_v34 = vpop.eup %5175  ;;  %v3186_v21 = vadd.f32 1.0, %v5174_v6  ;;  %v2944_v1 = vpop.f32.mrf.mxu0  ;;  %v3189_v56 = vmul.f32 -0.5, %v5174_v6  ;;  %v3192_v11 = vand.u32 2147483647, %v5174_v6 }
 0x3ac   :  { %v3179_v51 = vmul.f32 0.6931472, %v5176_v34  ;;  %5177 = vpow2.f32 %v3080_v60  ;;  %v6918_v25 = vadd.f32 %v6735_v45, %v2944_v1 }
 0x3ad   :  { %5179 = vlog2.f32 %v3186_v21  ;;  %v3190_v54 = vadd.f32 1.0, %v3189_v56  ;;  %vm6927_vm11 = vcmp.lt.f32.partialorder %v3192_v11, 0.0004427343 }
 0x3ae   :  { %v3185_v19 = vsel %vm3184_vm10, %v3182_v20, %v3179_v51  ;;  %v3020_v62 = vand.u32 2147483647, %v6918_v25  ;;  %v2994_v56 = vmax.f32 %v6918_v25, 0.0 }
 0x3af   :  { %v3355_v32 = vadd.f32 %v3185_v19, %v2991_v0  ;;  %v3191_v36 = vmul.f32 %v5174_v6, %v3190_v54 }
 0x3b0   :  { %v3046_v29 = vsub.f32 0.0, %v3020_v62 }
 0x3b1   :  { %v3377_v13 = vpack.c.bf16 %v3355_v32, %v3354_v53 }
 0x3b2   :  { %v5178_v43 = vpop.eup %5177  ;;  %v3082_v52 = vmul.f32 1.442695, %v3046_v29 }
 0x3b3   :  { %v3195_v42 = vadd.f32 1.0, %v5178_v43  ;;  %v2946_v44 = vpop.f32.mrf.mxu0  ;;  %v5180_v22 = vpop.eup %5179  ;;  %v3198_v61 = vmul.f32 -0.5, %v5178_v43  ;;  %v3201_v41 = vand.u32 2147483647, %v5178_v43 }
 0x3b4   :  { %3478 = vmatmul.bf16.gmra.mxu1 %v3377_v13  ;;  %5181 = vpow2.f32 %v3082_v52  ;;  %v6924_v59 = vadd.f32 %v6735_v45, %v2946_v44  ;;  %v3188_v17 = vmul.f32 0.6931472, %v5180_v22  ;;  %v4516_v22 = vld [vmem:[#allocation9 + $0x18] sm:$0xff] }
 0x3b5   :  { %5183 = vlog2.f32 %v3195_v42  ;;  %v3199_v58 = vadd.f32 1.0, %v3198_v61  ;;  %vm3202_vm12 = vcmp.lt.f32.partialorder %v3201_v41, 0.0004427343  ;;  %4004 = vmatpush.bf16.msrb.mxu2 %v4516_v22 }
 0x3b6   :  { %v3021_v35 = vand.u32 2147483647, %v6924_v59  ;;  %v3194_v46 = vsel %vm6927_vm11, %v3191_v36, %v3188_v17  ;;  %v2995_v13 = vmax.f32 %v6924_v59, 0.0 }
 0x3b7   :  { %v3200_v26 = vmul.f32 %v5178_v43, %v3199_v58  ;;  %v3356_v27 = vadd.f32 %v3194_v46, %v2992_v31 }
 0x3b8   :  { %v3047_v23 = vsub.f32 0.0, %v3021_v35 }
 0x3ba   :  { %v5182_v10 = vpop.eup %5181  ;;  %v3084_v39 = vmul.f32 1.442695, %v3047_v23 }
 0x3bb   :  { %v5184_v48 = vpop.eup %5183  ;;  %v3204_v30 = vadd.f32 1.0, %v5182_v10  ;;  %v2949_v14 = vpop.f32.mrf.mxu0  ;;  %v3207_v33 = vmul.f32 -0.5, %v5182_v10  ;;  %v3210_v12 = vand.u32 2147483647, %v5182_v10 }
 0x3bc   :  { %v3197_v3 = vmul.f32 0.6931472, %v5184_v48  ;;  %5185 = vpow2.f32 %v3084_v39  ;;  %v6934_v9 = vadd.f32 %v6735_v45, %v2949_v14 }
 0x3bd   :  { %5187 = vlog2.f32 %v3204_v30  ;;  %v3208_v47 = vadd.f32 1.0, %v3207_v33  ;;  %vm6943_vm13 = vcmp.lt.f32.partialorder %v3210_v12, 0.0004427343 }
 0x3be   :  { %v3203_v38 = vsel %vm3202_vm12, %v3200_v26, %v3197_v3  ;;  %v3022_v18 = vand.u32 2147483647, %v6934_v9 }
 0x3bf   :  { %v3357_v7 = vadd.f32 %v3203_v38, %v2993_v50  ;;  %v3209_v16 = vmul.f32 %v5182_v10, %v3208_v47 }
 0x3c0   :  { %v3048_v5 = vsub.f32 0.0, %v3022_v18 }
 0x3c1   :  { %v3378_v37 = vpack.c.bf16 %v3357_v7, %v3356_v27 }
 0x3c2   :  { %v5186_v8 = vpop.eup %5185  ;;  %v3086_v2 = vmul.f32 1.442695, %v3048_v5  ;;  %v2996_v5 = vmax.f32 %v6934_v9, 0.0 }
 0x3c3   :  { %v3213_v28 = vadd.f32 1.0, %v5186_v8  ;;  %v2951_v15 = vpop.f32.mrf.mxu0  ;;  %v5188_v57 = vpop.eup %5187  ;;  %v3216_v49 = vmul.f32 -0.5, %v5186_v8  ;;  %v3219_v21 = vand.u32 2147483647, %v5186_v8 }
 0x3c4   :  { %3483 = vmatmul.bf16.gmra.mxu1 %v3378_v37  ;;  %5189 = vpow2.f32 %v3086_v2  ;;  %v6940_v40 = vadd.f32 %v6735_v45, %v2951_v15  ;;  %v3206_v24 = vmul.f32 0.6931472, %v5188_v57 }
 0x3c5   :  { %5191 = vlog2.f32 %v3213_v28  ;;  %v3217_v60 = vadd.f32 1.0, %v3216_v49  ;;  %vm3220_vm14 = vcmp.lt.f32.partialorder %v3219_v21, 0.0004427343 }
 0x3c6   :  { %v3023_v6 = vand.u32 2147483647, %v6940_v40  ;;  %v3212_v0 = vsel %vm6943_vm13, %v3209_v16, %v3206_v24  ;;  %v2997_v33 = vmax.f32 %v6940_v40, 0.0 }
 0x3c7   :  { %v3218_v32 = vmul.f32 %v5186_v8, %v3217_v60  ;;  %v3358_v42 = vadd.f32 %v3212_v0, %v2994_v56  ;;  %v4515_v0 = vld [vmem:[#allocation9 + $0x10] sm:$0xff] }
 0x3c8   :  { %v3049_v34 = vsub.f32 0.0, %v3023_v6  ;;  %4005 = vmatpush.bf16.msrb.mxu2 %v4515_v0 }
 0x3ca   :  { %v5190_v1 = vpop.eup %5189  ;;  %v3088_v20 = vmul.f32 1.442695, %v3049_v34 }
 0x3cb   :  { %v5192_v4 = vpop.eup %5191  ;;  %v3222_v19 = vadd.f32 1.0, %v5190_v1  ;;  %v2954_v62 = vpop.f32.mrf.mxu0  ;;  %v3225_v54 = vmul.f32 -0.5, %v5190_v1  ;;  %v3228_v10 = vand.u32 2147483647, %v5190_v1 }
 0x3cc   :  { %v3215_v53 = vmul.f32 0.6931472, %v5192_v4  ;;  %5193 = vpow2.f32 %v3088_v20  ;;  %v6950_v29 = vadd.f32 %v6735_v45, %v2954_v62 }
 0x3cd   :  { %5195 = vlog2.f32 %v3222_v19  ;;  %v3226_v41 = vadd.f32 1.0, %v3225_v54  ;;  %vm3229_vm15 = vcmp.lt.f32.partialorder %v3228_v10, 0.0004427343 }
 0x3ce   :  { %v3221_v43 = vsel %vm3220_vm14, %v3218_v32, %v3215_v53  ;;  %v3024_v52 = vand.u32 2147483647, %v6950_v29 }
 0x3cf   :  { %v3359_v44 = vadd.f32 %v3221_v43, %v2995_v13  ;;  %v3227_v30 = vmul.f32 %v5190_v1, %v3226_v41 }
 0x3d0   :  { %v3050_v61 = vsub.f32 0.0, %v3024_v52  ;;  %v2998_v52 = vmax.f32 %v6950_v29, 0.0 }
 0x3d1   :  { %v3379_v11 = vpack.c.bf16 %v3359_v44, %v3358_v42 }
 0x3d2   :  { %v5194_v35 = vpop.eup %5193  ;;  %v3090_v17 = vmul.f32 1.442695, %v3050_v61  ;;  %v6974_v61 = vld [vmem:[%s7382_s10] ss:$0 sm:$0xff] }
 0x3d3   :  { %v3231_v58 = vadd.f32 1.0, %v5194_v35  ;;  %v2956_v23 = vpop.f32.mrf.mxu0  ;;  %v5196_v25 = vpop.eup %5195  ;;  %v3234_v36 = vmul.f32 -0.5, %v5194_v35  ;;  %v3237_v14 = vand.u32 2147483647, %v5194_v35 }
 0x3d4   :  { %3488 = vmatmul.bf16.gmra.mxu1 %v3379_v11  ;;  %5197 = vpow2.f32 %v3090_v17  ;;  %v6956_v59 = vadd.f32 %v6735_v45, %v2956_v23  ;;  %v3224_v39 = vmul.f32 0.6931472, %v5196_v25 }
 0x3d5   :  { %5199 = vlog2.f32 %v3231_v58  ;;  %v3235_v48 = vadd.f32 1.0, %v3234_v36  ;;  %vm3238_vm1 = vcmp.lt.f32.partialorder %v3237_v14, 0.0004427343 }
 0x3d6   :  { %v3025_v55 = vand.u32 2147483647, %v6956_v59  ;;  %v3230_v50 = vsel %vm3229_vm15, %v3227_v30, %v3224_v39  ;;  %v2999_v42 = vmax.f32 %v6956_v59, 0.0  ;;  %v6983_v59 = vld [vmem:[%s7384_s12] ss:$0 sm:$0xff] }
 0x3d7   :  { %v3236_v7 = vmul.f32 %v5194_v35, %v3235_v48  ;;  %v3360_v2 = vadd.f32 %v3230_v50, %v2996_v5 }
 0x3d8   :  { %v3051_v46 = vsub.f32 0.0, %v3025_v55 }
 0x3da   :  { %v5198_v3 = vpop.eup %5197  ;;  %v3092_v26 = vmul.f32 1.442695, %v3051_v46 }
 0x3db   :  { %v5200_v31 = vpop.eup %5199  ;;  %v3240_v38 = vadd.f32 1.0, %v5198_v3  ;;  %v3243_v47 = vmul.f32 -0.5, %v5198_v3  ;;  %v3246_v21 = vand.u32 2147483647, %v5198_v3 }
 0x3dc   :  { %v2959_v18 = vpop.f32.mrf.mxu0  ;;  %v3233_v27 = vmul.f32 0.6931472, %v5200_v31  ;;  %5201 = vpow2.f32 %v3092_v26 }
 0x3dd   :  { %v6960_v63 = vadd.f32 %v6735_v45, %v2959_v18  ;;  %5203 = vlog2.f32 %v3240_v38  ;;  %v3244_v34 = vadd.f32 1.0, %v3243_v47  ;;  %vm3247_vm2 = vcmp.lt.f32.partialorder %v3246_v21, 0.0004427343 }
 0x3de   :  { %v3239_v37 = vsel %vm3238_vm1, %v3236_v7, %v3233_v27  ;;  %v4514_v27 = vld [vmem:[#allocation9 + $0x8] sm:$0xff] }
 0x3df   :  { %v3026_v8 = vand.u32 2147483647, %v6960_v63  ;;  %v3361_v28 = vadd.f32 %v3239_v37, %v2997_v33  ;;  %v3245_v62 = vmul.f32 %v5198_v3, %v3244_v34  ;;  %v3000_v37 = vmax.f32 %v6960_v63, 0.0  ;;  %4006 = vmatpush.bf16.msrb.mxu2 %v4514_v27 }
 0x3e1   :  { %v3052_v15 = vsub.f32 0.0, %v3026_v8  ;;  %v3380_v57 = vpack.c.bf16 %v3361_v28, %v3360_v2 }
 0x3e2   :  { %v5202_v49 = vpop.eup %5201 }
 0x3e3   :  { %v3094_v12 = vmul.f32 1.442695, %v3052_v15  ;;  %v3249_v6 = vadd.f32 1.0, %v5202_v49  ;;  %v3252_v60 = vmul.f32 -0.5, %v5202_v49  ;;  %v5204_v40 = vpop.eup %5203  ;;  %v3255_v4 = vand.u32 2147483647, %v5202_v49 }
 0x3e4   :  { %v2961_v24 = vpop.f32.mrf.mxu0  ;;  %3493 = vmatmul.bf16.gmra.mxu1 %v3380_v57  ;;  %v3242_v1 = vmul.f32 0.6931472, %v5204_v40 }
 0x3e5   :  { %5205 = vpow2.f32 %v3094_v12  ;;  %v6966_v9 = vadd.f32 %v6735_v45, %v2961_v24  ;;  %v3253_v51 = vadd.f32 1.0, %v3252_v60  ;;  %vm3256_vm3 = vcmp.lt.f32.partialorder %v3255_v4, 0.0004427343 }
 0x3e6   :  { %5207 = vlog2.f32 %v3249_v6  ;;  %v3248_v45 = vsel %vm3247_vm2, %v3245_v62, %v3242_v1 }
 0x3e7   :  { %v3027_v16 = vand.u32 2147483647, %v6966_v9  ;;  %v3254_v43 = vmul.f32 %v5202_v49, %v3253_v51  ;;  %v3362_v11 = vadd.f32 %v3248_v45, %v2998_v52  ;;  %v3001_v12 = vmax.f32 %v6966_v9, 0.0 }
 0x3e9   :  { %v3053_v20 = vsub.f32 0.0, %v3027_v16 }
 0x3eb   :  { %v5206_v19 = vpop.eup %5205  ;;  %v3096_v53 = vmul.f32 1.442695, %v3053_v20 }
 0x3ec   :  { %v5208_v32 = vpop.eup %5207  ;;  %v3258_v56 = vadd.f32 1.0, %v5206_v19  ;;  %v3261_v23 = vmul.f32 -0.5, %v5206_v19  ;;  %v3264_v14 = vand.u32 2147483647, %v5206_v19 }
 0x3ed   :  { %v3251_v13 = vmul.f32 0.6931472, %v5208_v32  ;;  %5209 = vpow2.f32 %v3096_v53 }
 0x3ee   :  { %5211 = vlog2.f32 %v3258_v56  ;;  %v3262_v48 = vadd.f32 1.0, %v3261_v23  ;;  %vm6994_vm4 = vcmp.lt.f32.partialorder %v3264_v14, 0.0004427343 }
 0x3ef   :  { %v2964_v44 = vpop.f32.mrf.mxu0  ;;  %v3257_v22 = vsel %vm3256_vm3, %v3254_v43, %v3251_v13 }
 0x3f0   :  { %v6977_v54 = vadd.f32 %v6974_v61, %v2964_v44  ;;  %v3363_v35 = vadd.f32 %v3257_v22, %v2999_v42  ;;  %v3263_v7 = vmul.f32 %v5206_v19, %v3262_v48  ;;  %v4513_v22 = vld [vmem:[#allocation9] sm:$0xff] }
 0x3f1   :  { %4007 = vmatpush.bf16.msrb.mxu2 %v4513_v22 }
 0x3f2   :  { %v3028_v17 = vand.u32 2147483647, %v6977_v54  ;;  %v3381_v58 = vpack.c.bf16 %v3363_v35, %v3362_v11 }
 0x3f3   :  { %v5210_v29 = vpop.eup %5209 }
 0x3f4   :  { %v3054_v25 = vsub.f32 0.0, %v3028_v17  ;;  %v3267_v36 = vadd.f32 1.0, %v5210_v29  ;;  %3498 = vmatmul.bf16.gmra.mxu1 %v3381_v58  ;;  %v3270_v41 = vmul.f32 -0.5, %v5210_v29  ;;  %v5212_v55 = vpop.eup %5211  ;;  %v3273_v38 = vand.u32 2147483647, %v5210_v29 }
 0x3f5   :  { %v3260_v26 = vmul.f32 0.6931472, %v5212_v55 }
 0x3f6   :  { %v3098_v10 = vmul.f32 1.442695, %v3054_v25  ;;  %5213 = vlog2.f32 %v3267_v36  ;;  %v3271_v31 = vadd.f32 1.0, %v3270_v41  ;;  %vm3274_vm5 = vcmp.lt.f32.partialorder %v3273_v38, 0.0004427343 }
 0x3f7   :  { %v2966_v39 = vpop.f32.mrf.mxu0  ;;  %v3266_v15 = vsel %vm6994_vm4, %v3263_v7, %v3260_v26  ;;  %v3002_v38 = vmax.f32 %v6977_v54, 0.0 }
 0x3f8   :  { %5215 = vpow2.f32 %v3098_v10  ;;  %v6986_v46 = vadd.f32 %v6974_v61, %v2966_v39  ;;  %v3272_v49 = vmul.f32 %v5210_v29, %v3271_v31  ;;  %v3364_v16 = vadd.f32 %v3266_v15, %v3000_v37 }
 0x3fa   :  { %v3029_v50 = vand.u32 2147483647, %v6986_v46 }
 0x3fc   :  { %v3055_v5 = vsub.f32 0.0, %v3029_v50  ;;  %v5214_v33 = vpop.eup %5213 }
 0x3fd   :  { %v3269_v57 = vmul.f32 0.6931472, %v5214_v33 }
 0x3fe   :  { %v3464_v30 = vpop.f32.mrf.mxu1  ;;  %v5216_v28 = vpop.eup %5215  ;;  %v3100_v47 = vmul.f32 1.442695, %v3055_v5 }
 0x3ff   :  { %v6989_v3 = vadd.f32 %v6983_v59, %v3464_v30  ;;  %v3276_v6 = vadd.f32 1.0, %v5216_v28  ;;  %v3275_v63 = vsel %vm3274_vm5, %v3272_v49, %v3269_v57  ;;  %v3279_v0 = vmul.f32 -0.5, %v5216_v28 }
 0x400   :  { %5217 = vpow2.f32 %v3100_v47  ;;  %v3365_v21 = vadd.f32 %v3275_v63, %v3001_v12  ;;  %v3282_v11 = vand.u32 2147483647, %v5216_v28 }
 0x401   :  { %v3555_v18 = vand.u32 2147483647, %v6989_v3  ;;  %5219 = vlog2.f32 %v3276_v6  ;;  %v3280_v44 = vadd.f32 1.0, %v3279_v0 }
 0x402   :  { %v2969_v24 = vpop.f32.mrf.mxu0  ;;  %v3382_v9 = vpack.c.bf16 %v3365_v21, %v3364_v16  ;;  %vm7018_vm6 = vcmp.lt.f32.partialorder %v3282_v11, 0.0004427343 }
 0x403   :  { %v3581_v2 = vsub.f32 0.0, %v3555_v18  ;;  %v7002_v40 = vadd.f32 %v6974_v61, %v2969_v24  ;;  %v3281_v23 = vmul.f32 %v5216_v28, %v3280_v44  ;;  %v3003_v18 = vmax.f32 %v6986_v46, 0.0 }
 0x404   :  { %3503 = vmatmul.bf16.gmra.mxu1 %v3382_v9 }
 0x405   :  { %v3607_v60 = vmul.f32 1.442695, %v3581_v2  ;;  %v3030_v1 = vand.u32 2147483647, %v7002_v40 }
 0x406   :  { %v3466_v34 = vpop.f32.mrf.mxu1  ;;  %v5218_v19 = vpop.eup %5217 }
 0x407   :  { %5221 = vpow2.f32 %v3607_v60  ;;  %v7006_v51 = vadd.f32 %v6983_v59, %v3466_v34  ;;  %v3056_v20 = vsub.f32 0.0, %v3030_v1  ;;  %v5220_v32 = vpop.eup %5219  ;;  %v3285_v56 = vadd.f32 1.0, %v5218_v19 }
 0x408   :  { %v3288_v43 = vmul.f32 -0.5, %v5218_v19  ;;  %v3278_v17 = vmul.f32 0.6931472, %v5220_v32  ;;  %v3291_v25 = vand.u32 2147483647, %v5218_v19 }
 0x409   :  { %v3556_v4 = vand.u32 2147483647, %v7006_v51  ;;  %v3102_v62 = vmul.f32 1.442695, %v3056_v20  ;;  %v3529_v20 = vmax.f32 %v6989_v3, 0.0 }
 0x40a   :  { %v2971_v45 = vpop.f32.mrf.mxu0  ;;  %v3289_v29 = vadd.f32 1.0, %v3288_v43  ;;  %v3284_v39 = vsel %vm7018_vm6, %v3281_v23, %v3278_v17  ;;  %vm3292_vm0 = vcmp.lt.f32.partialorder %v3291_v25, 0.0004427343 }
 0x40b   :  { %v3582_v53 = vsub.f32 0.0, %v3556_v4  ;;  %5223 = vpow2.f32 %v3102_v62  ;;  %v7012_v52 = vadd.f32 %v6974_v61, %v2971_v45  ;;  %v3366_v37 = vadd.f32 %v3284_v39, %v3002_v38 }
 0x40c   :  { %5225 = vlog2.f32 %v3285_v56  ;;  %v3290_v26 = vmul.f32 %v5218_v19, %v3289_v29 }
 0x40d   :  { %v7009_v13 = vpop.eup %5221  ;;  %v3609_v42 = vmul.f32 1.442695, %v3582_v53  ;;  %v3031_v58 = vand.u32 2147483647, %v7012_v52 }
 0x40e   :  { %v3659_v35 = vadd.f32 1.0, %v7009_v13  ;;  %v3662_v27 = vmul.f32 -0.5, %v7009_v13  ;;  %v3665_v47 = vand.u32 2147483647, %v7009_v13 }
 0x40f   :  { %5227 = vpow2.f32 %v3609_v42  ;;  %v3057_v36 = vsub.f32 0.0, %v3031_v58  ;;  %v3530_v58 = vmax.f32 %v7006_v51, 0.0 }
 0x410   :  { %5229 = vlog2.f32 %v3659_v35  ;;  %v3663_v54 = vadd.f32 1.0, %v3662_v27  ;;  %vm7043_vm7 = vcmp.lt.f32.partialorder %v3665_v47, 0.0004427343 }
 0x411   :  { %v7016_v41 = vpop.eup %5223  ;;  %v3104_v48 = vmul.f32 1.442695, %v3057_v36  ;;  %v3469_v33 = vpop.f32.mrf.mxu1 }
 0x412   :  { %v5226_v55 = vpop.eup %5225  ;;  %v2974_v30 = vpop.f32.mrf.mxu0  ;;  %v3294_v31 = vadd.f32 1.0, %v7016_v41  ;;  %v7033_v49 = vadd.f32 %v6983_v59, %v3469_v33  ;;  %v3297_v24 = vmul.f32 -0.5, %v7016_v41  ;;  %v3664_v4 = vmul.f32 %v7009_v13, %v3663_v54 }
 0x413   :  { %v3287_v14 = vmul.f32 0.6931472, %v5226_v55  ;;  %v7026_v50 = vadd.f32 %v6974_v61, %v2974_v30  ;;  %5231 = vpow2.f32 %v3104_v48  ;;  %v3300_v44 = vand.u32 2147483647, %v7016_v41 }
 0x414   :  { %5233 = vlog2.f32 %v3294_v31  ;;  %v3557_v6 = vand.u32 2147483647, %v7033_v49  ;;  %v3298_v42 = vadd.f32 1.0, %v3297_v24 }
 0x415   :  { %v5228_v7 = vpop.eup %5227  ;;  %v3293_v5 = vsel %vm3292_vm0, %v3290_v26, %v3287_v14  ;;  %v3032_v57 = vand.u32 2147483647, %v7026_v50  ;;  %vm7059_vm9 = vcmp.lt.f32.partialorder %v3300_v44, 0.0004427343 }
 0x416   :  { %v3367_v8 = vadd.f32 %v3293_v5, %v3003_v18  ;;  %v3668_v2 = vadd.f32 1.0, %v5228_v7  ;;  %v5230_v28 = vpop.eup %5229  ;;  %v3671_v15 = vmul.f32 -0.5, %v5228_v7  ;;  %v3583_v1 = vsub.f32 0.0, %v3557_v6 }
 0x417   :  { %v3058_v12 = vsub.f32 0.0, %v3032_v57  ;;  %v3661_v60 = vmul.f32 0.6931472, %v5230_v28  ;;  %v3674_v19 = vand.u32 2147483647, %v5228_v7  ;;  %v3299_v10 = vmul.f32 %v7016_v41, %v3298_v42 }
 0x418   :  { %5235 = vlog2.f32 %v3668_v2  ;;  %v3383_v46 = vpack.c.bf16 %v3367_v8, %v3366_v37  ;;  %v3672_v16 = vadd.f32 1.0, %v3671_v15  ;;  %v3611_v56 = vmul.f32 1.442695, %v3583_v1 }
 0x419   :  { %v5232_v34 = vpop.eup %5231  ;;  %v3106_v21 = vmul.f32 1.442695, %v3058_v12  ;;  %v3471_v45 = vpop.f32.mrf.mxu1  ;;  %v3667_v3 = vsel %vm7043_vm7, %v3664_v4, %v3661_v60  ;;  %vm3675_vm8 = vcmp.lt.f32.partialorder %v3674_v19, 0.0004427343  ;;  %v3004_v28 = vmax.f32 %v7002_v40, 0.0 }
 0x41a   :  { %v2976_v63 = vpop.f32.mrf.mxu0  ;;  %3508 = vmatmul.bf16.gmra.mxu1 %v3383_v46  ;;  %v3303_v0 = vadd.f32 1.0, %v5232_v34  ;;  %v5234_v62 = vpop.eup %5233  ;;  %v3306_v32 = vmul.f32 -0.5, %v5232_v34  ;;  %v3673_v22 = vmul.f32 %v5228_v7, %v3672_v16  ;;  %v7052_v35 = vadd.f32 %v6983_v59, %v3471_v45 }
 0x41b   :  { %v7039_v9 = vadd.f32 %v6974_v61, %v2976_v63  ;;  %5237 = vpow2.f32 %v3106_v21  ;;  %v3296_v17 = vmul.f32 0.6931472, %v5234_v62  ;;  %v3893_v55 = vadd.f32 %v3667_v3, %v3529_v20 }
 0x41c   :  { %5239 = vlog2.f32 %v3303_v0  ;;  %v3307_v29 = vadd.f32 1.0, %v3306_v32  ;;  %v3558_v36 = vand.u32 2147483647, %v7052_v35  ;;  %v3309_v39 = vand.u32 2147483647, %v5232_v34 }
 0x41d   :  { %v3033_v11 = vand.u32 2147483647, %v7039_v9  ;;  %5241 = vpow2.f32 %v3611_v56  ;;  %v3302_v27 = vsel %vm7059_vm9, %v3299_v10, %v3296_v17  ;;  %v3005_v15 = vmax.f32 %v7012_v52, 0.0 }
 0x41e   :  { %v5236_v43 = vpop.eup %5235  ;;  %v3584_v31 = vsub.f32 0.0, %v3558_v36  ;;  %v3308_v33 = vmul.f32 %v5232_v34, %v3307_v29  ;;  %vm3310_vm10 = vcmp.lt.f32.partialorder %v3309_v39, 0.0004427343  ;;  %v3368_v47 = vadd.f32 %v3302_v27, %v3004_v28 }
 0x41f   :  { %v3670_v13 = vmul.f32 0.6931472, %v5236_v43  ;;  %v3059_v25 = vsub.f32 0.0, %v3033_v11  ;;  %v3006_v39 = vmax.f32 %v7026_v50, 0.0 }
 0x420   :  { %v3613_v37 = vmul.f32 1.442695, %v3584_v31 }
 0x421   :  { %v3676_v23 = vsel %vm3675_vm8, %v3673_v22, %v3670_v13  ;;  %v7057_v14 = vpop.eup %5237  ;;  %v3108_v51 = vmul.f32 1.442695, %v3059_v25  ;;  %v3474_v8 = vpop.f32.mrf.mxu1 }
 0x422   :  { %v3894_v48 = vadd.f32 %v3676_v23, %v3530_v58  ;;  %v2979_v30 = vpop.f32.mrf.mxu0  ;;  %v5240_v18 = vpop.eup %5239  ;;  %v3312_v41 = vadd.f32 1.0, %v7057_v14  ;;  %v7075_v46 = vadd.f32 %v6983_v59, %v3474_v8  ;;  %v3315_v16 = vmul.f32 -0.5, %v7057_v14 }
 0x423   :  { %v7064_v38 = vadd.f32 %v6974_v61, %v2979_v30  ;;  %v3305_v5 = vmul.f32 0.6931472, %v5240_v18  ;;  %5243 = vpow2.f32 %v3108_v51  ;;  %v7069_v2 = vpop.eup %5241  ;;  %v3318_v43 = vand.u32 2147483647, %v7057_v14 }
 0x424   :  { %v3919_v7 = vpack.c.bf16 %v3894_v48, %v3893_v55  ;;  %5245 = vpow2.f32 %v3613_v37  ;;  %v3559_v24 = vand.u32 2147483647, %v7075_v46  ;;  %v3677_v60 = vadd.f32 1.0, %v7069_v2 }
 0x425   :  { %v3034_v57 = vand.u32 2147483647, %v7064_v38  ;;  %v3311_v54 = vsel %vm3310_vm10, %v3308_v33, %v3305_v5  ;;  %5247 = vlog2.f32 %v3312_v41  ;;  %v3316_v56 = vadd.f32 1.0, %v3315_v16 }
 0x426   :  { %4008 = vmatmul.bf16.vlgmr.msrb.gmra.mxu2 %v3919_v7  ;;  %v3369_v12 = vadd.f32 %v3311_v54, %v3005_v15  ;;  %v3585_v21 = vsub.f32 0.0, %v3559_v24  ;;  %v3680_v44 = vmul.f32 -0.5, %v7069_v2  ;;  %vm7099_vm11 = vcmp.lt.f32.partialorder %v3318_v43, 0.0004427343 }
 0x427   :  { %v3060_v6 = vsub.f32 0.0, %v3034_v57  ;;  %v3317_v25 = vmul.f32 %v7057_v14, %v3316_v56  ;;  %v3007_v30 = vmax.f32 %v7039_v9, 0.0  ;;  %v3683_v9 = vand.u32 2147483647, %v7069_v2 }
 0x428   :  { %v3384_v52 = vpack.c.bf16 %v3369_v12, %v3368_v47  ;;  %v3615_v19 = vmul.f32 1.442695, %v3585_v21  ;;  %v3681_v27 = vadd.f32 1.0, %v3680_v44  ;;  %v3532_v54 = vmax.f32 %v7052_v35, 0.0 }
 0x429   :  { %v3110_v40 = vmul.f32 1.442695, %v3060_v6  ;;  %v5244_v34 = vpop.eup %5243  ;;  %v3476_v62 = vpop.f32.mrf.mxu1  ;;  %vm7119_vm13 = vcmp.lt.f32.partialorder %v3683_v9, 0.0004427343 }
 0x42a   :  { %v2981_v63 = vpop.f32.mrf.mxu0  ;;  %v3321_v20 = vadd.f32 1.0, %v5244_v34  ;;  %3513 = vmatmul.bf16.gmra.mxu1 %v3384_v52  ;;  %v7083_v4 = vpop.eup %5245  ;;  %v3324_v0 = vmul.f32 -0.5, %v5244_v34  ;;  %v7087_v45 = vadd.f32 %v6983_v59, %v3476_v62  ;;  %v3327_v17 = vand.u32 2147483647, %v5244_v34 }
 0x42b   :  { %v7081_v1 = vadd.f32 %v6974_v61, %v2981_v63  ;;  %5249 = vpow2.f32 %v3110_v40  ;;  %v5248_v53 = vpop.eup %5247  ;;  %v3686_v61 = vadd.f32 1.0, %v7083_v4  ;;  %v3689_v29 = vmul.f32 -0.5, %v7083_v4 }
 0x42c   :  { %5251 = vlog2.f32 %v3677_v60  ;;  %v3314_v3 = vmul.f32 0.6931472, %v5248_v53  ;;  %v3325_v13 = vadd.f32 1.0, %v3324_v0  ;;  %v3560_v22 = vand.u32 2147483647, %v7087_v45 }
 0x42d   :  { %5253 = vlog2.f32 %v3321_v20  ;;  %v3035_v32 = vand.u32 2147483647, %v7081_v1  ;;  %vm3328_vm12 = vcmp.lt.f32.partialorder %v3327_v17, 0.0004427343  ;;  %v3690_v50 = vadd.f32 1.0, %v3689_v29 }
 0x42e   :  { %5255 = vpow2.f32 %v3615_v19  ;;  %v3586_v10 = vsub.f32 0.0, %v3560_v22  ;;  %v3320_v51 = vsel %vm7099_vm11, %v3317_v25, %v3314_v3  ;;  %v3326_v14 = vmul.f32 %v5244_v34, %v3325_v13 }
 0x42f   :  { %v3061_v42 = vsub.f32 0.0, %v3035_v32  ;;  %5257 = vlog2.f32 %v3686_v61  ;;  %v3692_v37 = vand.u32 2147483647, %v7083_v4  ;;  %v3370_v8 = vadd.f32 %v3320_v51, %v3006_v39 }
 0x430   :  { %v3617_v41 = vmul.f32 1.442695, %v3586_v10  ;;  %v3682_v40 = vmul.f32 %v7069_v2, %v3681_v27  ;;  %v3691_v63 = vmul.f32 %v7083_v4, %v3690_v50  ;;  %v3531_v19 = vmax.f32 %v7033_v49, 0.0 }
 0x431   :  { %v7093_v11 = vpop.eup %5249  ;;  %v3112_v58 = vmul.f32 1.442695, %v3061_v42  ;;  %v3479_v18 = vpop.f32.mrf.mxu1  ;;  %vm3693_vm14 = vcmp.lt.f32.partialorder %v3692_v37, 0.0004427343 }
 0x432   :  { %v5252_v23 = vpop.eup %5251  ;;  %v3330_v36 = vadd.f32 1.0, %v7093_v11  ;;  %v7109_v33 = vadd.f32 %v6983_v59, %v3479_v18  ;;  %v3333_v24 = vmul.f32 -0.5, %v7093_v11  ;;  %v3336_v43 = vand.u32 2147483647, %v7093_v11 }
 0x433   :  { %v5254_v55 = vpop.eup %5253  ;;  %5259 = vpow2.f32 %v3112_v58  ;;  %v3679_v57 = vmul.f32 0.6931472, %v5252_v23 }
 0x434   :  { %v7104_v26 = vpop.eup %5255  ;;  %v3323_v31 = vmul.f32 0.6931472, %v5254_v55  ;;  %5261 = vlog2.f32 %v3330_v36  ;;  %v3561_v47 = vand.u32 2147483647, %v7109_v33  ;;  %v3334_v62 = vadd.f32 1.0, %v3333_v24 }
 0x435   :  { %v5258_v7 = vpop.eup %5257  ;;  %v3695_v15 = vadd.f32 1.0, %v7104_v26  ;;  %5263 = vpow2.f32 %v3617_v41  ;;  %v3685_v20 = vsel %vm7119_vm13, %v3682_v40, %v3679_v57  ;;  %v3698_v42 = vmul.f32 -0.5, %v7104_v26 }
 0x436   :  { %v3329_v5 = vsel %vm3328_vm12, %v3326_v14, %v3323_v31  ;;  %v3688_v12 = vmul.f32 0.6931472, %v5258_v7  ;;  %v3587_v34 = vsub.f32 0.0, %v3561_v47  ;;  %v3895_v44 = vadd.f32 %v3685_v20, %v3531_v19 }
 0x437   :  { %v3371_v28 = vadd.f32 %v3329_v5, %v3007_v30  ;;  %5265 = vlog2.f32 %v3695_v15  ;;  %v3335_v23 = vmul.f32 %v7093_v11, %v3334_v62  ;;  %vm7133_vm15 = vcmp.lt.f32.partialorder %v3336_v43, 0.0004427343 }
 0x438   :  { %v3694_v0 = vsel %vm3693_vm14, %v3691_v63, %v3688_v12  ;;  %v3619_v2 = vmul.f32 1.442695, %v3587_v34  ;;  %v3699_v10 = vadd.f32 1.0, %v3698_v42  ;;  %v3701_v55 = vand.u32 2147483647, %v7104_v26 }
 0x439   :  { %v5260_v6 = vpop.eup %5259  ;;  %v3385_v60 = vpack.c.bf16 %v3371_v28, %v3370_v8  ;;  %v3481_v4 = vpop.f32.mrf.mxu1  ;;  %v3896_v32 = vadd.f32 %v3694_v0, %v3532_v54  ;;  %v3008_v14 = vmax.f32 %v7064_v38, 0.0  ;;  %v3009_v11 = vmax.f32 %v7081_v1, 0.0 }
 0x43a   :  { %v3339_v52 = vadd.f32 1.0, %v5260_v6  ;;  %v5262_v35 = vpop.eup %5261  ;;  %v3342_v21 = vmul.f32 -0.5, %v5260_v6  ;;  %v7127_v53 = vadd.f32 %v6983_v59, %v3481_v4  ;;  %v3345_v49 = vand.u32 2147483647, %v5260_v6 }
 0x43b   :  { %3518 = vmatmul.bf16.gmra.mxu1 %v3385_v60  ;;  %v5264_v56 = vpop.eup %5263  ;;  %v3332_v61 = vmul.f32 0.6931472, %v5262_v35  ;;  %v3920_v58 = vpack.c.bf16 %v3896_v32, %v3895_v44  ;;  %v3700_v15 = vmul.f32 %v7104_v26, %v3699_v10  ;;  %vm3702_vm2 = vcmp.lt.f32.partialorder %v3701_v55, 0.0004427343 }
 0x43c   :  { %5267 = vlog2.f32 %v3339_v52  ;;  %v3343_v3 = vadd.f32 1.0, %v3342_v21  ;;  %v3704_v13 = vadd.f32 1.0, %v5264_v56  ;;  %v3707_v22 = vmul.f32 -0.5, %v5264_v56 }
 0x43d   :  { %5269 = vpow2.f32 %v3619_v2  ;;  %v3562_v17 = vand.u32 2147483647, %v7127_v53  ;;  %v5266_v29 = vpop.eup %5265  ;;  %4013 = vmatmul.bf16.gmra.mxu2 %v3920_v58  ;;  %v3338_v48 = vsel %vm7133_vm15, %v3335_v23, %v3332_v61  ;;  %vm3346_vm1 = vcmp.lt.f32.partialorder %v3345_v49, 0.0004427343 }
 0x43e   :  { %5271 = vlog2.f32 %v3704_v13  ;;  %v3344_v51 = vmul.f32 %v5260_v6, %v3343_v3  ;;  %v3708_v31 = vadd.f32 1.0, %v3707_v22  ;;  %v3697_v50 = vmul.f32 0.6931472, %v5266_v29 }
 0x43f   :  { %v3588_v39 = vsub.f32 0.0, %v3562_v17  ;;  %v3710_v5 = vand.u32 2147483647, %v5264_v56  ;;  %v3372_v9 = vadd.f32 %v3338_v48, %v3008_v14  ;;  %v3534_v6 = vmax.f32 %v7087_v45, 0.0 }
 0x440   :  { %v3709_v38 = vmul.f32 %v5264_v56, %v3708_v31  ;;  %v3703_v12 = vsel %vm3702_vm2, %v3700_v15, %v3697_v50  ;;  %v3533_v24 = vmax.f32 %v7075_v46, 0.0  ;;  %v3536_v58 = vmax.f32 %v7127_v53, 0.0 }
 0x441   :  { %v3621_v18 = vmul.f32 1.442695, %v3588_v39  ;;  %v3484_v27 = vpop.f32.mrf.mxu1  ;;  %vm3711_vm3 = vcmp.lt.f32.partialorder %v3710_v5, 0.0004427343  ;;  %v3535_v10 = vmax.f32 %v7109_v33, 0.0  ;;  %vm4074_vm15 = vcmask 15360  }
 0x442   :  { %v5268_v25 = vpop.eup %5267  ;;  %v7143_v8 = vadd.f32 %v6983_v59, %v3484_v27  ;;  %v3897_v34 = vadd.f32 %v3703_v12, %v3533_v24 }
 0x443   :  { %v3341_v30 = vmul.f32 0.6931472, %v5268_v25  ;;  %v5270_v41 = vpop.eup %5269  ;;  %5273 = vpow2.f32 %v3621_v18 }
 0x444   :  { %v5272_v28 = vpop.eup %5271  ;;  %v3713_v1 = vadd.f32 1.0, %v5270_v41  ;;  %v3563_v54 = vand.u32 2147483647, %v7143_v8  ;;  %v3716_v45 = vmul.f32 -0.5, %v5270_v41  ;;  %v3719_v61 = vand.u32 2147483647, %v5270_v41 }
 0x445   :  { %v3347_v7 = vsel %vm3346_vm1, %v3344_v51, %v3341_v30  ;;  %v3706_v57 = vmul.f32 0.6931472, %v5272_v28 }
 0x446   :  { %v3373_v37 = vadd.f32 %v3347_v7, %v3009_v11  ;;  %v3589_v40 = vsub.f32 0.0, %v3563_v54  ;;  %5275 = vlog2.f32 %v3713_v1  ;;  %v3717_v62 = vadd.f32 1.0, %v3716_v45 }
 0x447   :  { %v3712_v60 = vsel %vm3711_vm3, %v3709_v38, %v3706_v57  ;;  %vm3720_vm5 = vcmp.lt.f32.partialorder %v3719_v61, 0.0004427343 }
 0x448   :  { %v3386_v47 = vpack.c.bf16 %v3373_v37, %v3372_v9  ;;  %v3898_v63 = vadd.f32 %v3712_v60, %v3534_v6  ;;  %v3623_v26 = vmul.f32 1.442695, %v3589_v40  ;;  %v3718_v17 = vmul.f32 %v5270_v41, %v3717_v62 }
 0x449   :  { %v5274_v52 = vpop.eup %5273  ;;  %v3486_v16 = vpop.f32.mrf.mxu1 }
 0x44a   :  { %v3722_v35 = vadd.f32 1.0, %v5274_v52  ;;  %v7150_v21 = vadd.f32 %v6983_v59, %v3486_v16  ;;  %v3725_v20 = vmul.f32 -0.5, %v5274_v52  ;;  %5277 = vpow2.f32 %v3623_v26 }
 0x44b   :  { %3523 = vmatmul.bf16.gmra.mxu1 %v3386_v47  ;;  %v3921_v0 = vpack.c.bf16 %v3898_v63, %v3897_v34  ;;  %v3728_v32 = vand.u32 2147483647, %v5274_v52  ;;  %v3537_v34 = vmax.f32 %v7143_v8, 0.0 }
 0x44c   :  { %5279 = vlog2.f32 %v3722_v35  ;;  %v3564_v46 = vand.u32 2147483647, %v7150_v21  ;;  %v5276_v19 = vpop.eup %5275  ;;  %v3726_v2 = vadd.f32 1.0, %v3725_v20  ;;  %v3538_v24 = vmax.f32 %v7150_v21, 0.0 }
 0x44d   :  { %4018 = vmatmul.bf16.gmra.mxu2 %v3921_v0  ;;  %v3715_v3 = vmul.f32 0.6931472, %v5276_v19  ;;  %vm3729_vm4 = vcmp.lt.f32.partialorder %v3728_v32, 0.0004427343 }
 0x44e   :  { %v3590_v4 = vsub.f32 0.0, %v3564_v46  ;;  %v3727_v49 = vmul.f32 %v5274_v52, %v3726_v2 }
 0x44f   :  { %v3721_v36 = vsel %vm3720_vm5, %v3718_v17, %v3715_v3 }
 0x450   :  { %v5278_v56 = vpop.eup %5277  ;;  %v3625_v43 = vmul.f32 1.442695, %v3590_v4  ;;  %v3899_v30 = vadd.f32 %v3721_v36, %v3535_v10 }
 0x451   :  { %v3489_v42 = vpop.f32.mrf.mxu1  ;;  %v3731_v23 = vadd.f32 1.0, %v5278_v56  ;;  %v3734_v27 = vmul.f32 -0.5, %v5278_v56  ;;  %v3737_v28 = vand.u32 2147483647, %v5278_v56 }
 0x452   :  { %v5280_v44 = vpop.eup %5279  ;;  %v7154_v13 = vadd.f32 %v6983_v59, %v3489_v42  ;;  %5281 = vpow2.f32 %v3625_v43 }
 0x453   :  { %v3724_v22 = vmul.f32 0.6931472, %v5280_v44  ;;  %5283 = vlog2.f32 %v3731_v23  ;;  %v3735_v5 = vadd.f32 1.0, %v3734_v27  ;;  %vm3738_vm0 = vcmp.lt.f32.partialorder %v3737_v28, 0.0004427343 }
 0x454   :  { %v3565_v25 = vand.u32 2147483647, %v7154_v13 }
 0x455   :  { %v3730_v29 = vsel %vm3729_vm4, %v3727_v49, %v3724_v22  ;;  %v3736_v6 = vmul.f32 %v5278_v56, %v3735_v5 }
 0x456   :  { %v3900_v55 = vadd.f32 %v3730_v29, %v3536_v58  ;;  %v3591_v39 = vsub.f32 0.0, %v3565_v25 }
 0x458   :  { %v5282_v48 = vpop.eup %5281  ;;  %v3627_v51 = vmul.f32 1.442695, %v3591_v39  ;;  %v3922_v18 = vpack.c.bf16 %v3900_v55, %v3899_v30  ;;  %v3539_v30 = vmax.f32 %v7154_v13, 0.0 }
 0x459   :  { %v3491_v31 = vpop.f32.mrf.mxu1  ;;  %v3740_v14 = vadd.f32 1.0, %v5282_v48  ;;  %v3743_v53 = vmul.f32 -0.5, %v5282_v48  ;;  %v5284_v50 = vpop.eup %5283  ;;  %v3746_v9 = vand.u32 2147483647, %v5282_v48 }
 0x45a   :  { %v7160_v11 = vadd.f32 %v6983_v59, %v3491_v31  ;;  %5285 = vpow2.f32 %v3627_v51  ;;  %v3733_v1 = vmul.f32 0.6931472, %v5284_v50 }
 0x45b   :  { %5287 = vlog2.f32 %v3740_v14  ;;  %v3744_v33 = vadd.f32 1.0, %v3743_v53  ;;  %vm3747_vm6 = vcmp.lt.f32.partialorder %v3746_v9, 0.0004427343 }
 0x45c   :  { %v3566_v41 = vand.u32 2147483647, %v7160_v11  ;;  %v3739_v52 = vsel %vm3738_vm0, %v3736_v6, %v3733_v1  ;;  %v3540_v36 = vmax.f32 %v7160_v11, 0.0 }
 0x45d   :  { %4023 = vmatmul.bf16.gmra.mxu2 %v3922_v18  ;;  %v3745_v12 = vmul.f32 %v5282_v48, %v3744_v33  ;;  %v3901_v20 = vadd.f32 %v3739_v52, %v3537_v34 }
 0x45e   :  { %v3592_v7 = vsub.f32 0.0, %v3566_v41 }
 0x460   :  { %v5286_v37 = vpop.eup %5285  ;;  %v3629_v15 = vmul.f32 1.442695, %v3592_v7 }
 0x461   :  { %v3494_v38 = vpop.f32.mrf.mxu1  ;;  %v5288_v57 = vpop.eup %5287  ;;  %v3749_v40 = vadd.f32 1.0, %v5286_v37  ;;  %v3752_v4 = vmul.f32 -0.5, %v5286_v37  ;;  %v3755_v44 = vand.u32 2147483647, %v5286_v37 }
 0x462   :  { %v7164_v54 = vadd.f32 %v6983_v59, %v3494_v38  ;;  %v3742_v47 = vmul.f32 0.6931472, %v5288_v57  ;;  %5289 = vpow2.f32 %v3629_v15 }
 0x463   :  { %5291 = vlog2.f32 %v3749_v40  ;;  %v3753_v61 = vadd.f32 1.0, %v3752_v4  ;;  %vm3756_vm8 = vcmp.lt.f32.partialorder %v3755_v44, 0.0004427343 }
 0x464   :  { %v3748_v60 = vsel %vm3747_vm6, %v3745_v12, %v3742_v47  ;;  %v3567_v63 = vand.u32 2147483647, %v7164_v54 }
 0x465   :  { %v3902_v26 = vadd.f32 %v3748_v60, %v3538_v24  ;;  %v3754_v25 = vmul.f32 %v5286_v37, %v3753_v61 }
 0x466   :  { %v3593_v16 = vsub.f32 0.0, %v3567_v63 }
 0x467   :  { %v3923_v2 = vpack.c.bf16 %v3902_v26, %v3901_v20  ;;  %v3541_v20 = vmax.f32 %v7164_v54, 0.0 }
 0x468   :  { %v5290_v35 = vpop.eup %5289  ;;  %v3631_v0 = vmul.f32 1.442695, %v3593_v16 }
 0x469   :  { %v3496_v45 = vpop.f32.mrf.mxu1  ;;  %v3758_v46 = vadd.f32 1.0, %v5290_v35  ;;  %v3761_v21 = vmul.f32 -0.5, %v5290_v35  ;;  %v5292_v32 = vpop.eup %5291  ;;  %v3764_v43 = vand.u32 2147483647, %v5290_v35 }
 0x46a   :  { %v7170_v19 = vadd.f32 %v6983_v59, %v3496_v45  ;;  %5293 = vpow2.f32 %v3631_v0  ;;  %v3751_v17 = vmul.f32 0.6931472, %v5292_v32 }
 0x46b   :  { %5295 = vlog2.f32 %v3758_v46  ;;  %v3762_v8 = vadd.f32 1.0, %v3761_v21  ;;  %vm3765_vm7 = vcmp.lt.f32.partialorder %v3764_v43, 0.0004427343 }
 0x46c   :  { %v3568_v62 = vand.u32 2147483647, %v7170_v19  ;;  %v3757_v48 = vsel %vm3756_vm8, %v3754_v25, %v3751_v17  ;;  %v3542_v52 = vmax.f32 %v7170_v19, 0.0 }
 0x46d   :  { %4028 = vmatmul.bf16.gmra.mxu2 %v3923_v2  ;;  %v3763_v23 = vmul.f32 %v5290_v35, %v3762_v8  ;;  %v3903_v53 = vadd.f32 %v3757_v48, %v3539_v30 }
 0x46e   :  { %v3594_v56 = vsub.f32 0.0, %v3568_v62 }
 0x470   :  { %v5294_v42 = vpop.eup %5293  ;;  %v3633_v3 = vmul.f32 1.442695, %v3594_v56 }
 0x471   :  { %v3499_v22 = vpop.f32.mrf.mxu1  ;;  %v5296_v49 = vpop.eup %5295  ;;  %v3767_v55 = vadd.f32 1.0, %v5294_v42  ;;  %v3770_v7 = vmul.f32 -0.5, %v5294_v42  ;;  %v3773_v57 = vand.u32 2147483647, %v5294_v42 }
 0x472   :  { %v7174_v58 = vadd.f32 %v6983_v59, %v3499_v22  ;;  %v3760_v29 = vmul.f32 0.6931472, %v5296_v49  ;;  %5297 = vpow2.f32 %v3633_v3 }
 0x473   :  { %5299 = vlog2.f32 %v3767_v55  ;;  %v3771_v28 = vadd.f32 1.0, %v3770_v7  ;;  %vm3774_vm10 = vcmp.lt.f32.partialorder %v3773_v57, 0.0004427343 }
 0x474   :  { %v3766_v10 = vsel %vm3765_vm7, %v3763_v23, %v3760_v29  ;;  %v3569_v39 = vand.u32 2147483647, %v7174_v58 }
 0x475   :  { %v3904_v51 = vadd.f32 %v3766_v10, %v3540_v36  ;;  %v3772_v63 = vmul.f32 %v5294_v42, %v3771_v28 }
 0x476   :  { %v3595_v31 = vsub.f32 0.0, %v3569_v39 }
 0x477   :  { %v3924_v33 = vpack.c.bf16 %v3904_v51, %v3903_v53  ;;  %v3543_v53 = vmax.f32 %v7174_v58, 0.0 }
 0x478   :  { %v5298_v14 = vpop.eup %5297  ;;  %v3635_v18 = vmul.f32 1.442695, %v3595_v31 }
 0x479   :  { %v3501_v27 = vpop.f32.mrf.mxu1  ;;  %v3776_v41 = vadd.f32 1.0, %v5298_v14  ;;  %v3779_v11 = vmul.f32 -0.5, %v5298_v14  ;;  %v5300_v9 = vpop.eup %5299  ;;  %v3782_v15 = vand.u32 2147483647, %v5298_v14 }
 0x47a   :  { %v7180_v50 = vadd.f32 %v6983_v59, %v3501_v27  ;;  %5301 = vpow2.f32 %v3635_v18  ;;  %v3769_v6 = vmul.f32 0.6931472, %v5300_v9 }
 0x47b   :  { %5303 = vlog2.f32 %v3776_v41  ;;  %v3780_v13 = vadd.f32 1.0, %v3779_v11  ;;  %vm3783_vm9 = vcmp.lt.f32.partialorder %v3782_v15, 0.0004427343 }
 0x47c   :  { %v3570_v5 = vand.u32 2147483647, %v7180_v50  ;;  %v3775_v35 = vsel %vm3774_vm10, %v3772_v63, %v3769_v6  ;;  %v3544_v48 = vmax.f32 %v7180_v50, 0.0  ;;  %v7202_v50 = vld [vmem:[%s7384_s12] ss:$0 sm:$0xff] }
 0x47d   :  { %4033 = vmatmul.bf16.gmra.mxu2 %v3924_v33  ;;  %v3781_v40 = vmul.f32 %v5298_v14, %v3780_v13  ;;  %v3905_v21 = vadd.f32 %v3775_v35, %v3541_v20 }
 0x47e   :  { %v3596_v37 = vsub.f32 0.0, %v3570_v5 }
 0x480   :  { %v5302_v38 = vpop.eup %5301  ;;  %v3637_v1 = vmul.f32 1.442695, %v3596_v37 }
 0x481   :  { %v3504_v47 = vpop.f32.mrf.mxu1  ;;  %v5304_v12 = vpop.eup %5303  ;;  %v3785_v26 = vadd.f32 1.0, %v5302_v38  ;;  %v3788_v56 = vmul.f32 -0.5, %v5302_v38  ;;  %v3791_v49 = vand.u32 2147483647, %v5302_v38 }
 0x482   :  { %v7184_v24 = vadd.f32 %v6983_v59, %v3504_v47  ;;  %v3778_v60 = vmul.f32 0.6931472, %v5304_v12  ;;  %5305 = vpow2.f32 %v3637_v1 }
 0x483   :  { %5307 = vlog2.f32 %v3785_v26  ;;  %v3789_v44 = vadd.f32 1.0, %v3788_v56  ;;  %vm3792_vm12 = vcmp.lt.f32.partialorder %v3791_v49, 0.0004427343 }
 0x484   :  { %v3784_v34 = vsel %vm3783_vm9, %v3781_v40, %v3778_v60  ;;  %v3571_v16 = vand.u32 2147483647, %v7184_v24 }
 0x485   :  { %v3906_v0 = vadd.f32 %v3784_v34, %v3542_v52  ;;  %v3790_v55 = vmul.f32 %v5302_v38, %v3789_v44  ;;  %v7211_v34 = vld [vmem:[%s7386_s14] ss:$0 sm:$0xff] }
 0x486   :  { %v3597_v45 = vsub.f32 0.0, %v3571_v16 }
 0x487   :  { %v3925_v8 = vpack.c.bf16 %v3906_v0, %v3905_v21  ;;  %v3545_v21 = vmax.f32 %v7184_v24, 0.0 }
 0x488   :  { %v5306_v46 = vpop.eup %5305  ;;  %v3639_v2 = vmul.f32 1.442695, %v3597_v45 }
 0x489   :  { %v3506_v4 = vpop.f32.mrf.mxu1  ;;  %v3794_v62 = vadd.f32 1.0, %v5306_v46  ;;  %v3797_v19 = vmul.f32 -0.5, %v5306_v46  ;;  %v5308_v43 = vpop.eup %5307  ;;  %v3800_v3 = vand.u32 2147483647, %v5306_v46 }
 0x48a   :  { %v7190_v32 = vadd.f32 %v6983_v59, %v3506_v4  ;;  %5309 = vpow2.f32 %v3639_v2  ;;  %v3787_v23 = vmul.f32 0.6931472, %v5308_v43 }
 0x48b   :  { %5311 = vlog2.f32 %v3794_v62  ;;  %v3798_v54 = vadd.f32 1.0, %v3797_v19  ;;  %vm3801_vm11 = vcmp.lt.f32.partialorder %v3800_v3, 0.0004427343 }
 0x48c   :  { %v3572_v61 = vand.u32 2147483647, %v7190_v32  ;;  %v3793_v31 = vsel %vm3792_vm12, %v3790_v55, %v3787_v23  ;;  %v3546_v16 = vmax.f32 %v7190_v32, 0.0 }
 0x48d   :  { %4038 = vmatmul.bf16.gmra.mxu2 %v3925_v8  ;;  %v3799_v36 = vmul.f32 %v5306_v46, %v3798_v54  ;;  %v3907_v11 = vadd.f32 %v3793_v31, %v3543_v53 }
 0x48e   :  { %v3598_v42 = vsub.f32 0.0, %v3572_v61 }
 0x490   :  { %v5310_v22 = vpop.eup %5309  ;;  %v3641_v17 = vmul.f32 1.442695, %v3598_v42 }
 0x491   :  { %v5312_v29 = vpop.eup %5311  ;;  %v3803_v51 = vadd.f32 1.0, %v5310_v22  ;;  %v3806_v13 = vmul.f32 -0.5, %v5310_v22  ;;  %v3809_v47 = vand.u32 2147483647, %v5310_v22 }
 0x492   :  { %v3796_v25 = vmul.f32 0.6931472, %v5312_v29  ;;  %5313 = vpow2.f32 %v3641_v17 }
 0x493   :  { %5315 = vlog2.f32 %v3803_v51  ;;  %v3807_v38 = vadd.f32 1.0, %v3806_v13  ;;  %vm3810_vm14 = vcmp.lt.f32.partialorder %v3809_v47, 0.0004427343 }
 0x494   :  { %v3802_v30 = vsel %vm3801_vm11, %v3799_v36, %v3796_v25 }
 0x495   :  { %v3908_v18 = vadd.f32 %v3802_v30, %v3544_v48  ;;  %v3808_v26 = vmul.f32 %v5310_v22, %v3807_v38 }
 0x497   :  { %v3509_v10 = vpop.f32.mrf.mxu1  ;;  %v3926_v9 = vpack.c.bf16 %v3908_v18, %v3907_v11 }
 0x498   :  { %v7194_v39 = vadd.f32 %v6983_v59, %v3509_v10  ;;  %v5314_v41 = vpop.eup %5313 }
 0x499   :  { %v3812_v33 = vadd.f32 1.0, %v5314_v41  ;;  %v3815_v5 = vmul.f32 -0.5, %v5314_v41  ;;  %v5316_v28 = vpop.eup %5315  ;;  %v3818_v57 = vand.u32 2147483647, %v5314_v41 }
 0x49a   :  { %v3573_v14 = vand.u32 2147483647, %v7194_v39  ;;  %v3805_v6 = vmul.f32 0.6931472, %v5316_v28 }
 0x49b   :  { %5317 = vlog2.f32 %v3812_v33  ;;  %v3816_v15 = vadd.f32 1.0, %v3815_v5  ;;  %vm3819_vm13 = vcmp.lt.f32.partialorder %v3818_v57, 0.0004427343 }
 0x49c   :  { %v3599_v27 = vsub.f32 0.0, %v3573_v14  ;;  %v3811_v46 = vsel %vm3810_vm14, %v3808_v26, %v3805_v6 }
 0x49d   :  { %4043 = vmatmul.bf16.gmra.mxu2 %v3926_v9  ;;  %v3817_v52 = vmul.f32 %v5314_v41, %v3816_v15  ;;  %v3909_v19 = vadd.f32 %v3811_v46, %v3545_v21 }
 0x49e   :  { %v3643_v7 = vmul.f32 1.442695, %v3599_v27 }
 0x49f   :  { %v3511_v59 = vpop.f32.mrf.mxu1 }
 0x4a0   :  { %v7205_v37 = vadd.f32 %v7202_v50, %v3511_v59  ;;  %5319 = vpow2.f32 %v3643_v7  ;;  %v3547_v59 = vmax.f32 %v7194_v39, 0.0 }
 0x4a1   :  { %v5318_v12 = vpop.eup %5317 }
 0x4a2   :  { %v3574_v58 = vand.u32 2147483647, %v7205_v37  ;;  %v3814_v63 = vmul.f32 0.6931472, %v5318_v12  ;;  %v3548_v27 = vmax.f32 %v7205_v37, 0.0 }
 0x4a4   :  { %v3600_v1 = vsub.f32 0.0, %v3574_v58  ;;  %v3820_v35 = vsel %vm3819_vm13, %v3817_v52, %v3814_v63 }
 0x4a5   :  { %v3910_v2 = vadd.f32 %v3820_v35, %v3546_v16 }
 0x4a6   :  { %v3645_v60 = vmul.f32 1.442695, %v3600_v1  ;;  %v5320_v40 = vpop.eup %5319 }
 0x4a7   :  { %v3821_v20 = vadd.f32 1.0, %v5320_v40  ;;  %v3514_v0 = vpop.f32.mrf.mxu1  ;;  %v3927_v43 = vpack.c.bf16 %v3910_v2, %v3909_v19  ;;  %v3824_v54 = vmul.f32 -0.5, %v5320_v40  ;;  %v3827_v10 = vand.u32 2147483647, %v5320_v40 }
 0x4a8   :  { %5321 = vpow2.f32 %v3645_v60  ;;  %v7216_v4 = vadd.f32 %v7202_v50, %v3514_v0 }
 0x4a9   :  { %v4009_v45 = vpop.f32.mrf.mxu2  ;;  %5323 = vlog2.f32 %v3821_v20  ;;  %v3825_v29 = vadd.f32 1.0, %v3824_v54  ;;  %vm3828_vm1 = vcmp.lt.f32.partialorder %v3827_v10, 0.0004427343 }
 0x4aa   :  { %v4010_v62 = vadd.f32 %v7211_v34, %v4009_v45  ;;  %v3575_v8 = vand.u32 2147483647, %v7216_v4 }
 0x4ab   :  { %v3826_v31 = vmul.f32 %v5320_v40, %v3825_v29 }
 0x4ac   :  { %4075 = vst.msk [vmem:[#allocation10] sm:$0xff] %vm4074_vm15, %v4010_v62  ;;  %v3601_v61 = vsub.f32 0.0, %v3575_v8 }
 0x4ad   :  { %4048 = vmatmul.bf16.gmra.mxu2 %v3927_v43 }
 0x4ae   :  { %v5322_v32 = vpop.eup %5321  ;;  %v3647_v3 = vmul.f32 1.442695, %v3601_v61 }
 0x4af   :  { %v3830_v56 = vadd.f32 1.0, %v5322_v32  ;;  %v3833_v42 = vmul.f32 -0.5, %v5322_v32  ;;  %v3516_v24 = vpop.f32.mrf.mxu1  ;;  %v5324_v17 = vpop.eup %5323  ;;  %v3836_v55 = vand.u32 2147483647, %v5322_v32 }
 0x4b0   :  { %v7222_v22 = vadd.f32 %v7202_v50, %v3516_v24  ;;  %v3823_v48 = vmul.f32 0.6931472, %v5324_v17 }
 0x4b1   :  { %5325 = vlog2.f32 %v3830_v56  ;;  %v4011_v44 = vpop.f32.mrf.mxu2  ;;  %v3834_v23 = vadd.f32 1.0, %v3833_v42  ;;  %vm3837_vm2 = vcmp.lt.f32.partialorder %v3836_v55, 0.0004427343  ;;  %v3549_v42 = vmax.f32 %v7216_v4, 0.0 }
 0x4b2   :  { %v4012_v49 = vadd.f32 %v7211_v34, %v4011_v44  ;;  %5327 = vpow2.f32 %v3647_v3  ;;  %v3576_v25 = vand.u32 2147483647, %v7222_v22  ;;  %v3829_v33 = vsel %vm3828_vm1, %v3826_v31, %v3823_v48 }
 0x4b3   :  { %v4179_v36 = vld [vmem:[#allocation10] sm:$0xff]  ;;  %v3835_v53 = vmul.f32 %v5322_v32, %v3834_v23  ;;  %v3911_v37 = vadd.f32 %v3829_v33, %v3547_v59  ;;  %v3550_v24 = vmax.f32 %v7222_v22, 0.0 }
 0x4b4   :  { %4076 = vst.msk [vmem:[#allocation10 + $0x8] sm:$0xff] %vm4074_vm15, %v4012_v49  ;;  %v3602_v30 = vsub.f32 0.0, %v3576_v25 }
 0x4b5   :  { %4180 = vst [vmem:[%s7387_s15] sm:$0xff] %v4179_v36 }
 0x4b6   :  { %v3649_v18 = vmul.f32 1.442695, %v3602_v30 }
 0x4b7   :  { %v5326_v51 = vpop.eup %5325 }
 0x4b8   :  { %v3832_v14 = vmul.f32 0.6931472, %v5326_v51  ;;  %v3519_v41 = vpop.f32.mrf.mxu1  ;;  %v5328_v11 = vpop.eup %5327  ;;  %5329 = vpow2.f32 %v3649_v18 }
 0x4b9   :  { %v7232_v5 = vadd.f32 %v7202_v50, %v3519_v41  ;;  %v3839_v13 = vadd.f32 1.0, %v5328_v11  ;;  %v3842_v1 = vmul.f32 -0.5, %v5328_v11  ;;  %v3845_v26 = vand.u32 2147483647, %v5328_v11 }
 0x4ba   :  { %v3838_v7 = vsel %vm3837_vm2, %v3835_v53, %v3832_v14 }
 0x4bb   :  { %v3912_v9 = vadd.f32 %v3838_v7, %v3548_v27  ;;  %v4181_v58 = vld [vmem:[#allocation10 + $0x8] sm:$0xff]  ;;  %v3577_v28 = vand.u32 2147483647, %v7232_v5  ;;  %5331 = vlog2.f32 %v3839_v13  ;;  %v3843_v63 = vadd.f32 1.0, %v3842_v1 }
 0x4bc   :  { %4182 = vst [vmem:[%s7387_s15 + $0x8] sm:$0xff] %v4181_v58  ;;  %vm3846_vm3 = vcmp.lt.f32.partialorder %v3845_v26, 0.0004427343 }
 0x4bd   :  { %v3603_v15 = vsub.f32 0.0, %v3577_v28  ;;  %v3928_v38 = vpack.c.bf16 %v3912_v9, %v3911_v37  ;;  %v3844_v2 = vmul.f32 %v5328_v11, %v3843_v63 }
 0x4be   :  { %v5330_v57 = vpop.eup %5329 }
 0x4bf   :  { %v3651_v47 = vmul.f32 1.442695, %v3603_v15  ;;  %v3848_v12 = vadd.f32 1.0, %v5330_v57  ;;  %v3851_v6 = vmul.f32 -0.5, %v5330_v57  ;;  %4053 = vmatmul.bf16.gmra.mxu2 %v3928_v38  ;;  %v3854_v45 = vand.u32 2147483647, %v5330_v57 }
 0x4c0   :  { %v3521_v60 = vpop.f32.mrf.mxu1  ;;  %v4014_v0 = vpop.f32.mrf.mxu2 }
 0x4c1   :  { %5333 = vpow2.f32 %v3651_v47  ;;  %v7240_v39 = vadd.f32 %v7202_v50, %v3521_v60  ;;  %v5332_v40 = vpop.eup %5331  ;;  %v3852_v16 = vadd.f32 1.0, %v3851_v6  ;;  %v4015_v46 = vadd.f32 %v7211_v34, %v4014_v0 }
 0x4c2   :  { %5335 = vlog2.f32 %v3848_v12  ;;  %v3841_v35 = vmul.f32 0.6931472, %v5332_v40  ;;  %vm3855_vm4 = vcmp.lt.f32.partialorder %v3854_v45, 0.0004427343  ;;  %v3551_v47 = vmax.f32 %v7232_v5, 0.0 }
 0x4c3   :  { %v3578_v52 = vand.u32 2147483647, %v7240_v39  ;;  %v3853_v8 = vmul.f32 %v5330_v57, %v3852_v16  ;;  %4077 = vst.msk [vmem:[#allocation10 + $0x10] sm:$0xff] %vm4074_vm15, %v4015_v46  ;;  %v3552_v12 = vmax.f32 %v7240_v39, 0.0 }
 0x4c4   :  { %v3847_v61 = vsel %vm3846_vm3, %v3844_v2, %v3841_v35 }
 0x4c5   :  { %v3604_v20 = vsub.f32 0.0, %v3578_v52  ;;  %v3913_v49 = vadd.f32 %v3847_v61, %v3549_v42 }
 0x4c7   :  { %v5334_v21 = vpop.eup %5333  ;;  %v3653_v62 = vmul.f32 1.442695, %v3604_v20 }
 0x4c8   :  { %v5336_v19 = vpop.eup %5335  ;;  %v3857_v32 = vadd.f32 1.0, %v5334_v21  ;;  %v3524_v56 = vpop.f32.mrf.mxu1  ;;  %v3860_v55 = vmul.f32 -0.5, %v5334_v21  ;;  %v3863_v27 = vand.u32 2147483647, %v5334_v21 }
 0x4c9   :  { %v3850_v43 = vmul.f32 0.6931472, %v5336_v19  ;;  %5337 = vpow2.f32 %v3653_v62  ;;  %v7246_v54 = vadd.f32 %v7202_v50, %v3524_v56  ;;  %v4016_v23 = vpop.f32.mrf.mxu2 }
 0x4ca   :  { %5339 = vlog2.f32 %v3857_v32  ;;  %v4017_v25 = vadd.f32 %v7211_v34, %v4016_v23  ;;  %v4183_v48 = vld [vmem:[#allocation10 + $0x10] sm:$0xff]  ;;  %v3861_v53 = vadd.f32 1.0, %v3860_v55  ;;  %vm3864_vm5 = vcmp.lt.f32.partialorder %v3863_v27, 0.0004427343 }
 0x4cb   :  { %v3856_v44 = vsel %vm3855_vm4, %v3853_v8, %v3850_v43  ;;  %v3579_v3 = vand.u32 2147483647, %v7246_v54  ;;  %4184 = vst [vmem:[%s7387_s15 + $0x10] sm:$0xff] %v4183_v48 }
 0x4cc   :  { %v3914_v17 = vadd.f32 %v3856_v44, %v3550_v24  ;;  %4078 = vst.msk [vmem:[#allocation10 + $0x18] sm:$0xff] %vm4074_vm15, %v4017_v25  ;;  %v3862_v58 = vmul.f32 %v5334_v21, %v3861_v53  ;;  %v3553_v44 = vmax.f32 %v7246_v54, 0.0 }
 0x4cd   :  { %v3605_v29 = vsub.f32 0.0, %v3579_v3 }
 0x4ce   :  { %v3929_v36 = vpack.c.bf16 %v3914_v17, %v3913_v49 }
 0x4cf   :  { %v5338_v10 = vpop.eup %5337  ;;  %v3655_v30 = vmul.f32 1.442695, %v3605_v29 }
 0x4d0   :  { %v3866_v51 = vadd.f32 1.0, %v5338_v10  ;;  %v3526_v4 = vpop.f32.mrf.mxu1  ;;  %v3869_v22 = vmul.f32 -0.5, %v5338_v10  ;;  %v5340_v14 = vpop.eup %5339  ;;  %4058 = vmatmul.bf16.gmra.mxu2 %v3929_v36  ;;  %v3872_v59 = vand.u32 2147483647, %v5338_v10 }
 0x4d1   :  { %5341 = vpow2.f32 %v3655_v30  ;;  %v7257_v31 = vadd.f32 %v7202_v50, %v3526_v4  ;;  %v3859_v41 = vmul.f32 0.6931472, %v5340_v14  ;;  %v4019_v7 = vpop.f32.mrf.mxu2 }
 0x4d2   :  { %5343 = vlog2.f32 %v3866_v51  ;;  %v3870_v11 = vadd.f32 1.0, %v3869_v22  ;;  %v4020_v9 = vadd.f32 %v7211_v34, %v4019_v7  ;;  %vm3873_vm6 = vcmp.lt.f32.partialorder %v3872_v59, 0.0004427343 }
 0x4d3   :  { %v3580_v18 = vand.u32 2147483647, %v7257_v31  ;;  %v4185_v15 = vld [vmem:[#allocation10 + $0x18] sm:$0xff]  ;;  %v3865_v38 = vsel %vm3864_vm5, %v3862_v58, %v3859_v41  ;;  %v3554_v3 = vmax.f32 %v7257_v31, 0.0 }
 0x4d4   :  { %4079 = vst.msk [vmem:[#allocation10 + $0x20] sm:$0xff] %vm4074_vm15, %v4020_v9  ;;  %v3871_v1 = vmul.f32 %v5338_v10, %v3870_v11  ;;  %v3915_v60 = vadd.f32 %v3865_v38, %v3551_v47 }
 0x4d5   :  { %v3606_v33 = vsub.f32 0.0, %v3580_v18  ;;  %4186 = vst [vmem:[%s7387_s15 + $0x18] sm:$0xff] %v4185_v15 }
 0x4d7   :  { %v5342_v13 = vpop.eup %5341  ;;  %v3657_v28 = vmul.f32 1.442695, %v3606_v33 }
 0x4d8   :  { %v5344_v37 = vpop.eup %5343  ;;  %v3875_v50 = vadd.f32 1.0, %v5342_v13  ;;  %v3878_v35 = vmul.f32 -0.5, %v5342_v13  ;;  %v3881_v46 = vand.u32 2147483647, %v5342_v13 }
 0x4d9   :  { %v3868_v57 = vmul.f32 0.6931472, %v5344_v37  ;;  %5345 = vpow2.f32 %v3657_v28  ;;  %v4021_v63 = vpop.f32.mrf.mxu2 }
 0x4da   :  { %5347 = vlog2.f32 %v3875_v50  ;;  %v4022_v52 = vadd.f32 %v7211_v34, %v4021_v63  ;;  %v3879_v45 = vadd.f32 1.0, %v3878_v35  ;;  %vm3882_vm0 = vcmp.lt.f32.partialorder %v3881_v46, 0.0004427343 }
 0x4db   :  { %v3874_v6 = vsel %vm3873_vm6, %v3871_v1, %v3868_v57  ;;  %v4187_v20 = vld [vmem:[#allocation10 + $0x20] sm:$0xff] }
 0x4dc   :  { %v3916_v40 = vadd.f32 %v3874_v6, %v3552_v12  ;;  %4188 = vst [vmem:[%s7387_s15 + $0x20] sm:$0xff] %v4187_v20  ;;  %v3880_v32 = vmul.f32 %v5342_v13, %v3879_v45 }
 0x4dd   :  { %4080 = vst.msk [vmem:[#allocation10 + $0x28] sm:$0xff] %vm4074_vm15, %v4022_v52 }
 0x4de   :  { %v3930_v26 = vpack.c.bf16 %v3916_v40, %v3915_v60 }
 0x4df   :  { %v5346_v16 = vpop.eup %5345 }
 0x4e0   :  { %v3884_v0 = vadd.f32 1.0, %v5346_v16  ;;  %v3887_v5 = vmul.f32 -0.5, %v5346_v16  ;;  %v5348_v39 = vpop.eup %5347  ;;  %4063 = vmatmul.bf16.gmra.mxu2 %v3930_v26  ;;  %v3890_v19 = vand.u32 2147483647, %v5346_v16 }
 0x4e1   :  { %v3877_v21 = vmul.f32 0.6931472, %v5348_v39  ;;  %v4024_v62 = vpop.f32.mrf.mxu2 }
 0x4e2   :  { %5349 = vlog2.f32 %v3884_v0  ;;  %v3888_v2 = vadd.f32 1.0, %v3887_v5  ;;  %v4025_v8 = vadd.f32 %v7211_v34, %v4024_v62  ;;  %vm3891_vm7 = vcmp.lt.f32.partialorder %v3890_v19, 0.0004427343 }
 0x4e3   :  { %v3883_v43 = vsel %vm3882_vm0, %v3880_v32, %v3877_v21 }
 0x4e4   :  { %v4189_v61 = vld [vmem:[#allocation10 + $0x28] sm:$0xff]  ;;  %4081 = vst.msk [vmem:[#allocation10 + $0x30] sm:$0xff] %vm4074_vm15, %v4025_v8  ;;  %v3889_v24 = vmul.f32 %v5346_v16, %v3888_v2  ;;  %v3917_v17 = vadd.f32 %v3883_v43, %v3553_v44 }
 0x4e5   :  { %4190 = vst [vmem:[%s7387_s15 + $0x28] sm:$0xff] %v4189_v61 }
 0x4e8   :  { %v5350_v56 = vpop.eup %5349 }
 0x4e9   :  { %v3886_v42 = vmul.f32 0.6931472, %v5350_v56  ;;  %v4026_v23 = vpop.f32.mrf.mxu2 }
 0x4ea   :  { %v4027_v25 = vadd.f32 %v7211_v34, %v4026_v23 }
 0x4eb   :  { %v3892_v49 = vsel %vm3891_vm7, %v3889_v24, %v3886_v42  ;;  %v4191_v10 = vld [vmem:[#allocation10 + $0x30] sm:$0xff] }
 0x4ec   :  { %v3918_v29 = vadd.f32 %v3892_v49, %v3554_v3  ;;  %4192 = vst [vmem:[%s7387_s15 + $0x30] sm:$0xff] %v4191_v10 }
 0x4ed   :  { %4082 = vst.msk [vmem:[#allocation10 + $0x38] sm:$0xff] %vm4074_vm15, %v4027_v25 }
 0x4ee   :  { %v3931_v36 = vpack.c.bf16 %v3918_v29, %v3917_v17 }
 0x4f0   :  { %4068 = vmatmul.bf16.gmra.mxu2 %v3931_v36 }
 0x4f1   :  { %v4029_v55 = vpop.f32.mrf.mxu2 }
 0x4f2   :  { %v4030_v54 = vadd.f32 %v7211_v34, %v4029_v55 }
 0x4f4   :  { %v4193_v48 = vld [vmem:[#allocation10 + $0x38] sm:$0xff]  ;;  %4083 = vst.msk [vmem:[#allocation10 + $0x40] sm:$0xff] %vm4074_vm15, %v4030_v54 }
 0x4f5   :  { %4194 = vst [vmem:[%s7387_s15 + $0x38] sm:$0xff] %v4193_v48 }
 0x4f9   :  { %v4031_v30 = vpop.f32.mrf.mxu2 }
 0x4fa   :  { %v4032_v51 = vadd.f32 %v7211_v34, %v4031_v30 }
 0x4fb   :  { %v4195_v4 = vld [vmem:[#allocation10 + $0x40] sm:$0xff] }
 0x4fc   :  { %4196 = vst [vmem:[%s7387_s15 + $0x40] sm:$0xff] %v4195_v4 }
 0x4fd   :  { %4084 = vst.msk [vmem:[#allocation10 + $0x48] sm:$0xff] %vm4074_vm15, %v4032_v51 }
 0x501   :  { %v4034_v22 = vpop.f32.mrf.mxu2 }
 0x502   :  { %v4035_v31 = vadd.f32 %v7211_v34, %v4034_v22 }
 0x504   :  { %v4197_v14 = vld [vmem:[#allocation10 + $0x48] sm:$0xff]  ;;  %4085 = vst.msk [vmem:[#allocation10 + $0x50] sm:$0xff] %vm4074_vm15, %v4035_v31 }
 0x505   :  { %4198 = vst [vmem:[%s7387_s15 + $0x48] sm:$0xff] %v4197_v14 }
 0x509   :  { %v4036_v53 = vpop.f32.mrf.mxu2 }
 0x50a   :  { %v4037_v18 = vadd.f32 %v7211_v34, %v4036_v53 }
 0x50b   :  { %v4199_v27 = vld [vmem:[#allocation10 + $0x50] sm:$0xff] }
 0x50c   :  { %4200 = vst [vmem:[%s7387_s15 + $0x50] sm:$0xff] %v4199_v27 }
 0x50d   :  { %4086 = vst.msk [vmem:[#allocation10 + $0x58] sm:$0xff] %vm4074_vm15, %v4037_v18 }
 0x511   :  { %v4039_v41 = vpop.f32.mrf.mxu2 }
 0x512   :  { %v4040_v11 = vadd.f32 %v7211_v34, %v4039_v41 }
 0x514   :  { %v4201_v33 = vld [vmem:[#allocation10 + $0x58] sm:$0xff]  ;;  %4087 = vst.msk [vmem:[#allocation10 + $0x60] sm:$0xff] %vm4074_vm15, %v4040_v11 }
 0x515   :  { %4202 = vst [vmem:[%s7387_s15 + $0x58] sm:$0xff] %v4201_v33 }
 0x519   :  { %v4041_v7 = vpop.f32.mrf.mxu2 }
 0x51a   :  { %v4042_v59 = vadd.f32 %v7211_v34, %v4041_v7 }
 0x51b   :  { %v4203_v9 = vld [vmem:[#allocation10 + $0x60] sm:$0xff] }
 0x51c   :  { %4204 = vst [vmem:[%s7387_s15 + $0x60] sm:$0xff] %v4203_v9 }
 0x51d   :  { %4088 = vst.msk [vmem:[#allocation10 + $0x68] sm:$0xff] %vm4074_vm15, %v4042_v59 }
 0x521   :  { %v4044_v13 = vpop.f32.mrf.mxu2 }
 0x522   :  { %v4045_v58 = vadd.f32 %v7211_v34, %v4044_v13 }
 0x524   :  { %v4205_v28 = vld [vmem:[#allocation10 + $0x68] sm:$0xff]  ;;  %4089 = vst.msk [vmem:[#allocation10 + $0x70] sm:$0xff] %vm4074_vm15, %v4045_v58 }
 0x525   :  { %4206 = vst [vmem:[%s7387_s15 + $0x68] sm:$0xff] %v4205_v28 }
 0x529   :  { %v4046_v37 = vpop.f32.mrf.mxu2 }
 0x52a   :  { %v4047_v50 = vadd.f32 %v7211_v34, %v4046_v37 }
 0x52b   :  { %v4207_v15 = vld [vmem:[#allocation10 + $0x70] sm:$0xff] }
 0x52c   :  { %4208 = vst [vmem:[%s7387_s15 + $0x70] sm:$0xff] %v4207_v15 }
 0x52d   :  { %4090 = vst.msk [vmem:[#allocation10 + $0x78] sm:$0xff] %vm4074_vm15, %v4047_v50 }
 0x531   :  { %v4049_v38 = vpop.f32.mrf.mxu2 }
 0x532   :  { %v4050_v57 = vadd.f32 %v7211_v34, %v4049_v38 }
 0x534   :  { %v4209_v1 = vld [vmem:[#allocation10 + $0x78] sm:$0xff]  ;;  %4091 = vst.msk [vmem:[#allocation10 + $0x80] sm:$0xff] %vm4074_vm15, %v4050_v57 }
 0x535   :  { %4210 = vst [vmem:[%s7387_s15 + $0x78] sm:$0xff] %v4209_v1 }
 0x539   :  { %v4051_v47 = vpop.f32.mrf.mxu2 }
 0x53a   :  { %v4052_v12 = vadd.f32 %v7211_v34, %v4051_v47 }
 0x53b   :  { %v4211_v6 = vld [vmem:[#allocation10 + $0x80] sm:$0xff] }
 0x53c   :  { %4212 = vst [vmem:[%s7387_s15 + $0x80] sm:$0xff] %v4211_v6 }
 0x53d   :  { %4092 = vst.msk [vmem:[#allocation10 + $0x88] sm:$0xff] %vm4074_vm15, %v4052_v12 }
 0x542   :  { %v4054_v60 = vpop.f32.mrf.mxu2 }
 0x543   :  { %v4055_v40 = vadd.f32 %v7211_v34, %v4054_v60 }
 0x544   :  { %v4213_v63 = vld [vmem:[#allocation10 + $0x88] sm:$0xff] }
 0x545   :  { %4093 = vst.msk [vmem:[#allocation10 + $0x90] sm:$0xff] %vm4074_vm15, %v4055_v40 }
 0x546   :  { %4214 = vst [vmem:[%s7387_s15 + $0x88] sm:$0xff] %v4213_v63 }
 0x54a   :  { %v4056_v52 = vpop.f32.mrf.mxu2 }
 0x54b   :  { %v4057_v26 = vadd.f32 %v7211_v34, %v4056_v52 }
 0x54c   :  { %v4215_v16 = vld [vmem:[#allocation10 + $0x90] sm:$0xff] }
 0x54d   :  { %4216 = vst [vmem:[%s7387_s15 + $0x90] sm:$0xff] %v4215_v16 }
 0x54e   :  { %4094 = vst.msk [vmem:[#allocation10 + $0x98] sm:$0xff] %vm4074_vm15, %v4057_v26 }
 0x553   :  { %v4059_v35 = vpop.f32.mrf.mxu2 }
 0x554   :  { %v4060_v20 = vadd.f32 %v7211_v34, %v4059_v35 }
 0x555   :  { %v4217_v0 = vld [vmem:[#allocation10 + $0x98] sm:$0xff] }
 0x556   :  { %4095 = vst.msk [vmem:[#allocation10 + $0xa0] sm:$0xff] %vm4074_vm15, %v4060_v20 }
 0x557   :  { %4218 = vst [vmem:[%s7387_s15 + $0x98] sm:$0xff] %v4217_v0 }
 0x55b   :  { %v4061_v5 = vpop.f32.mrf.mxu2 }
 0x55c   :  { %v4062_v39 = vadd.f32 %v7211_v34, %v4061_v5 }
 0x55d   :  { %v4219_v45 = vld [vmem:[#allocation10 + $0xa0] sm:$0xff] }
 0x55e   :  { %4220 = vst [vmem:[%s7387_s15 + $0xa0] sm:$0xff] %v4219_v45 }
 0x55f   :  { %4096 = vst.msk [vmem:[#allocation10 + $0xa8] sm:$0xff] %vm4074_vm15, %v4062_v39 }
 0x563   :  { %v4064_v46 = vpop.f32.mrf.mxu2 }
 0x564   :  { %v4065_v21 = vadd.f32 %v7211_v34, %v4064_v46 }
 0x566   :  { %v4221_v2 = vld [vmem:[#allocation10 + $0xa8] sm:$0xff]  ;;  %4097 = vst.msk [vmem:[#allocation10 + $0xb0] sm:$0xff] %vm4074_vm15, %v4065_v21 }
 0x567   :  { %4222 = vst [vmem:[%s7387_s15 + $0xa8] sm:$0xff] %v4221_v2 }
 0x56b   :  { %v4066_v62 = vpop.f32.mrf.mxu2 }
 0x56c   :  { %v4067_v19 = vadd.f32 %v7211_v34, %v4066_v62 }
 0x56d   :  { %v4223_v8 = vld [vmem:[#allocation10 + $0xb0] sm:$0xff] }
 0x56e   :  { %4224 = vst [vmem:[%s7387_s15 + $0xb0] sm:$0xff] %v4223_v8 }
 0x56f   :  { %4098 = vst.msk [vmem:[#allocation10 + $0xb8] sm:$0xff] %vm4074_vm15, %v4067_v19 }
 0x573   :  { %v4069_v32 = vpop.f32.mrf.mxu2 }
 0x574   :  { %v4070_v56 = vadd.f32 %v7211_v34, %v4069_v32 }
 0x576   :  { %v4225_v61 = vld [vmem:[#allocation10 + $0xb8] sm:$0xff]  ;;  %4099 = vst.msk [vmem:[#allocation10 + $0xc0] sm:$0xff] %vm4074_vm15, %v4070_v56 }
 0x577   :  { %4226 = vst [vmem:[%s7387_s15 + $0xb8] sm:$0xff] %v4225_v61 }
 0x57b   :  { %v4071_v43 = vpop.f32.mrf.mxu2 }
 0x57d   :  { %v4227_v42 = vld [vmem:[#allocation10 + $0xc0] sm:$0xff] }
 0x57e   :  { %4228 = vst [vmem:[%s7387_s15 + $0xc0] sm:$0xff] %v4227_v42 }
 0x57f   :  { %4234 = vsyncpa [#allocation3], 1 }
 0x580   :  { %4235 = vsyncpa [#allocation5], 1 }
 0x581   :  { %4236 = vsyncpa [#allocation8], 1 }

</bundles_post_ra>
